<compile_context>
chip_gen: v7x
topology: tpu7x:2x2x1
jax: 0.10.0
libtpu: 0.0.40
codegen_flags: <defaults>
</compile_context>

<pallas_src>
import functools

import jax
import jax.numpy as jnp
from jax.experimental import pallas as pl
from jax.experimental.pallas import tpu as pltpu


_EPS = 1e-5


# ----------------------------------------------------------------------------
# small helpers / per-generation knobs
# ----------------------------------------------------------------------------

def _round_up(x, m):
    return -(-x // m) * m


def _query_vmem_capacity():
    try:
        return int(pltpu.get_tpu_info().vmem_capacity_bytes)
    except Exception:
        return 64 * 1024 * 1024          # conservative fallback (v7x per-core VMEM)


_VMEM_CAP = _query_vmem_capacity()
# ~half of physical VMEM: ~64 MiB on v5e/v6e (128 MiB physical), ~32 MiB on v7x (64 MiB).
_VMEM_LIMIT = int(min(max(_VMEM_CAP // 2, 24 * 1024 * 1024), 96 * 1024 * 1024))
_ROW_TILE_CAP = 1024 if _VMEM_CAP >= 96 * 1024 * 1024 else 512


def _pick_tile(dim, align, cap):
    """Largest t with t % align == 0, t <= cap, dim % t == 0 (dim % align == 0 assumed)."""
    best = align
    t = align
    limit = min(dim, cap)
    while t <= limit:
        if dim % t == 0:
            best = t
        t += align
    return best


def _pick_row_tile(m):
    """Row tile for (M, C) elementwise kernels: large, but >= 2 grid steps (v7x megacore)."""
    cap = _ROW_TILE_CAP
    half = (m // 2) // 8 * 8
    cap = min(cap, half) if half >= 8 else min(cap, m)
    return _pick_tile(m, 8, max(cap, 8))


# ----------------------------------------------------------------------------
# Pallas kernels
# ----------------------------------------------------------------------------

def _conv3x3_kernel(x_ref, w_ref, o_ref, st_ref, acc_ref):
    """3x3 conv (stride 1, pad 1) over one image + fused per-channel [sum; sumsq].

    x_ref:   (1, H+2, W+2, Cin)  bf16 spatially padded image
    w_ref:   (3, 3, Cin, tn)     bf16 weights (HWIO, channel-padded)
    o_ref:   (1, H, W, tn)       bf16 raw conv output (pre-BN)
    st_ref:  (1, 2, tn)          f32  per-(image, cout-tile) [sum; sumsq] partials
    acc_ref: (H*W, tn)           f32  MXU accumulator scratch
    """
    _, H, W, tn = o_ref.shape
    cin = x_ref.shape[-1]
    acc_ref[...] = jnp.zeros_like(acc_ref)
    for kh in range(3):                      # taps unrolled in-kernel (static slices)
        for kw in range(3):
            patch = x_ref[0, kh:kh + H, kw:kw + W, :].reshape(H * W, cin)
            acc_ref[...] += jnp.dot(patch, w_ref[kh, kw],
                                    preferred_element_type=jnp.float32)
    acc = acc_ref[...]
    o_ref[...] = acc.reshape(1, H, W, tn).astype(o_ref.dtype)
    s = jnp.sum(acc, axis=0, keepdims=True)
    sq = jnp.sum(acc * acc, axis=0, keepdims=True)
    st_ref[...] = jnp.concatenate([s, sq], axis=0)[None]


def _matmul_stats_kernel(a_ref, b_ref, o_ref, st_ref):
    """(tm, K) @ (K, tn) shortcut 1x1 conv + fused per-channel [sum; sumsq] partials."""
    acc = jnp.dot(a_ref[...], b_ref[...], preferred_element_type=jnp.float32)
    o_ref[...] = acc.astype(o_ref.dtype)
    s = jnp.sum(acc, axis=0, keepdims=True)
    sq = jnp.sum(acc * acc, axis=0, keepdims=True)
    st_ref[...] = jnp.concatenate([s, sq], axis=0)[None]


def _affine_from_stats(st, gb, count, eps):
    """scale/shift from [sum; sumsq] stats + [gamma; beta] (training-mode, biased var)."""
    inv_n = 1.0 / count
    mean = st[0:1, :] * inv_n
    var = jnp.maximum(st[1:2, :] * inv_n - mean * mean, 0.0)   # clamp f32 rounding
    scale = gb[0:1, :] * jax.lax.rsqrt(var + eps)
    shift = gb[1:2, :] - mean * scale
    return scale, shift


def _bn_act_kernel(x_ref, st_ref, gb_ref, o_ref, *, count, eps, relu):
    scale, shift = _affine_from_stats(st_ref[...], gb_ref[...], count, eps)
    y = x_ref[...].astype(jnp.float32) * scale + shift
    if relu:
        y = jnp.maximum(y, 0.0)
    o_ref[...] = y.astype(o_ref.dtype)


def _bn_add_relu_kernel(x_ref, st_ref, gb_ref, id_ref, o_ref, *, count, eps):
    """relu(BN(x) + identity) — identity shortcut (in_channels == out_channels)."""
    scale, shift = _affine_from_stats(st_ref[...], gb_ref[...], count, eps)
    y = x_ref[...].astype(jnp.float32) * scale + shift + id_ref[...].astype(jnp.float32)
    o_ref[...] = jnp.maximum(y, 0.0).astype(o_ref.dtype)


def _bn_add_bn_relu_kernel(x_ref, xst_ref, xgb_ref, id_ref, ist_ref, igb_ref, o_ref,
                           *, count, eps):
    """relu(BN(x) + BN(shortcut)) — shortcut's BatchNorm fused in as well."""
    s1, b1 = _affine_from_stats(xst_ref[...], xgb_ref[...], count, eps)
    s2, b2 = _affine_from_stats(ist_ref[...], igb_ref[...], count, eps)
    y = (x_ref[...].astype(jnp.float32) * s1 + b1
         + id_ref[...].astype(jnp.float32) * s2 + b2)
    o_ref[...] = jnp.maximum(y, 0.0).astype(o_ref.dtype)


# ----------------------------------------------------------------------------
# Pallas wrappers
# ----------------------------------------------------------------------------

def conv3x3(xp, w4, out_hw):
    """xp: (N, H+2, W+2, cin_p) bf16;  w4: (3, 3, cin_p, pc) bf16.  No bias (cancels in BN)."""
    N, H, W = out_hw
    cin_p = xp.shape[-1]
    pc = w4.shape[-1]
    tn = _pick_tile(pc, 128, 512)
    out, st = pl.pallas_call(
        _conv3x3_kernel,
        out_shape=[jax.ShapeDtypeStruct((N, H, W, pc), jnp.bfloat16),
                   jax.ShapeDtypeStruct((N, 2, pc), jnp.float32)],
        grid_spec=pltpu.PrefetchScalarGridSpec(
            num_scalar_prefetch=0,
            grid=(N, pc // tn),
            in_specs=[
                pl.BlockSpec((1, H + 2, W + 2, cin_p), lambda n, j: (n, 0, 0, 0)),
                pl.BlockSpec((3, 3, cin_p, tn), lambda n, j: (0, 0, 0, j)),
            ],
            out_specs=[
                pl.BlockSpec((1, H, W, tn), lambda n, j: (n, 0, 0, j)),
                pl.BlockSpec((1, 2, tn), lambda n, j: (n, 0, j)),
            ],
            scratch_shapes=[pltpu.VMEM((H * W, tn), jnp.float32)],
        ),
        compiler_params=pltpu.CompilerParams(
            dimension_semantics=("parallel", "parallel"),
            vmem_limit_bytes=_VMEM_LIMIT),
    )(xp, w4)
    return out, st


def conv1x1(x2d, w):
    """Shortcut 1x1 conv (bias=False).  x2d: (M, cin_p) bf16;  w: (cin_p, pc) bf16."""
    M, K = x2d.shape
    pc = w.shape[-1]
    tm = _pick_row_tile(M)
    tn = _pick_tile(pc, 128, 512)
    out, st = pl.pallas_call(
        _matmul_stats_kernel,
        out_shape=[jax.ShapeDtypeStruct((M, pc), jnp.bfloat16),
                   jax.ShapeDtypeStruct((M // tm, 2, pc), jnp.float32)],
        grid_spec=pltpu.PrefetchScalarGridSpec(
            num_scalar_prefetch=0,
            grid=(M // tm, pc // tn),
            in_specs=[pl.BlockSpec((tm, K), lambda i, j: (i, 0)),
                      pl.BlockSpec((K, tn), lambda i, j: (0, j))],
            out_specs=[pl.BlockSpec((tm, tn), lambda i, j: (i, j)),
                       pl.BlockSpec((1, 2, tn), lambda i, j: (i, 0, j))],
        ),
        compiler_params=pltpu.CompilerParams(
            dimension_semantics=("parallel", "parallel"),
            vmem_limit_bytes=_VMEM_LIMIT),
    )(x2d, w)
    return out, st


def _launch_rowwise(kernel, args, row_flags, out_dtype):
    """Grid a normalize-style kernel over lane-dense row tiles (>= 2 steps for megacore)."""
    M, C = args[0].shape
    tm = _pick_row_tile(M)
    in_specs = []
    for is_row in row_flags:
        if is_row:
            in_specs.append(pl.BlockSpec((tm, C), lambda i: (i, 0)))
        else:
            in_specs.append(pl.BlockSpec((2, C), lambda i: (0, 0)))
    return pl.pallas_call(
        kernel,
        out_shape=jax.ShapeDtypeStruct((M, C), out_dtype),
        grid_spec=pltpu.PrefetchScalarGridSpec(
            num_scalar_prefetch=0,
            grid=(M // tm,),
            in_specs=in_specs,
            out_specs=pl.BlockSpec((tm, C), lambda i: (i, 0)),
        ),
        compiler_params=pltpu.CompilerParams(
            dimension_semantics=("parallel",),
            vmem_limit_bytes=_VMEM_LIMIT),
    )(*args)


def bn_act(x2d, stats, gb, *, count, relu, out_dtype):
    kern = functools.partial(_bn_act_kernel, count=float(count), eps=_EPS, relu=relu)
    return _launch_rowwise(kern, [x2d, stats, gb], [True, False, False], out_dtype)


def bn_add_relu(x2d, stats, gb, ident2d, *, count):
    kern = functools.partial(_bn_add_relu_kernel, count=float(count), eps=_EPS)
    return _launch_rowwise(kern, [x2d, stats, gb, ident2d],
                           [True, False, False, True], jnp.float32)


def bn_add_bn_relu(x2d, stats_x, gb_x, id2d, stats_id, gb_id, *, count):
    kern = functools.partial(_bn_add_bn_relu_kernel, count=float(count), eps=_EPS)
    return _launch_rowwise(kern, [x2d, stats_x, gb_x, id2d, stats_id, gb_id],
                           [True, False, False, True, False, False], jnp.float32)


# ----------------------------------------------------------------------------
# ResidualBlock forward
# ----------------------------------------------------------------------------

def residual_block_forward(x_nchw, p):
    N, cin, H, W = x_nchw.shape
    assert cin == p["cin"]
    cin_p, pc, cout = p["cin_p"], p["pcout"], p["cout"]
    M = N * H * W
    assert M % 8 == 0

    # XLA glue: NCHW -> NHWC, channel-pad to a lane-dense multiple of 128, bf16.
    x = jnp.transpose(x_nchw, (0, 2, 3, 1))
    xc = jnp.pad(x, ((0, 0), (0, 0), (0, 0), (0, cin_p - cin))).astype(jnp.bfloat16)
    xp = jnp.pad(xc, ((0, 0), (1, 1), (1, 1), (0, 0)))        # "same" spatial pad

    # conv1 (bias cancels in BN; stats fused) -> BN1 -> ReLU  (bf16, only feeds conv2)
    t1, st1 = conv3x3(xp, p["w1"], (N, H, W))
    a1 = bn_act(t1.reshape(M, pc), jnp.sum(st1, axis=0), p["gb1"],
                count=M, relu=True, out_dtype=jnp.bfloat16)

    # conv2 (stats fused)
    a1p = jnp.pad(a1.reshape(N, H, W, pc), ((0, 0), (1, 1), (1, 1), (0, 0)))
    t2, st2 = conv3x3(a1p, p["w2"], (N, H, W))
    t2_2d = t2.reshape(M, pc)
    stats2 = jnp.sum(st2, axis=0)

    if p["has_shortcut"]:
        # shortcut: 1x1 conv (bias=False) -> BN, both BNs + add + ReLU fused at the end
        tid, stid = conv1x1(xc.reshape(M, cin_p), p["wsc"])
        out = bn_add_bn_relu(t2_2d, stats2, p["gb2"],
                             tid, jnp.sum(stid, axis=0), p["gbsc"], count=M)
    else:
        # identity shortcut: cin == cout, so the channel-padded input is already (M, pc)
        out = bn_add_relu(t2_2d, stats2, p["gb2"], xc.reshape(M, cin_p), count=M)

    out = out.reshape(N, H, W, pc)
    if pc != cout:
        out = out[..., :cout]
    return jnp.transpose(out, (0, 3, 1, 2))                    # back to NCHW


# ----------------------------------------------------------------------------
# Deterministic parameter construction (PyTorch shapes, pre-padded for Pallas)
# ----------------------------------------------------------------------------

class KeyGen:
    def __init__(self, seed):
        self._key = jax.random.PRNGKey(seed)

    def __call__(self):
        self._key, k = jax.random.split(self._key)
        return k


def _pad_conv_w(w, cin_pad, cout_pad):
    """(3,3,cin,cout) f32 -> (3,3,cin_pad,cout_pad) bf16, zero-padded."""
    kh, kw, cin, cout = w.shape
    wp = jnp.zeros((kh, kw, cin_pad, cout_pad), jnp.float32)
    wp = wp.at[:, :, :cin, :cout].set(w)
    return wp.astype(jnp.bfloat16)


def _pad_mat(w, cin_pad, cout_pad):
    cin, cout = w.shape
    wp = jnp.zeros((cin_pad, cout_pad), jnp.float32).at[:cin, :cout].set(w)
    return wp.astype(jnp.bfloat16)


def _gb(cout, cout_pad):
    # PyTorch BatchNorm2d default affine init: gamma=1, beta=0.
    # gamma is zeroed on padded lanes so padded channels are exactly 0 after BN.
    gamma = jnp.zeros((cout_pad,), jnp.float32).at[:cout].set(1.0)
    beta = jnp.zeros((cout_pad,), jnp.float32)
    return jnp.stack([gamma, beta], axis=0)            # (2, pc)


def init_residual_params(seed, cin, cout):
    kg = KeyGen(seed)

    def randf(shape):
        return 0.05 * jax.random.normal(kg(), shape, jnp.float32)

    cin_p = _round_up(cin, 128)
    pc = _round_up(cout, 128)
    w1 = randf((3, 3, cin, cout))
    b1 = randf((cout,))
    w2 = randf((3, 3, cout, cout))
    b2 = randf((cout,))

    p = {
        "cout": cout, "cin": cin, "cin_p": cin_p, "pcout": pc,
        "has_shortcut": cin != cout,
        # conv1/conv2 biases are NOT used on the Pallas path: a per-channel bias added
        # before training-mode BatchNorm cancels exactly (mean shifts, variance unchanged).
        "w1": _pad_conv_w(w1, cin_p, pc), "gb1": _gb(cout, pc),
        "w2": _pad_conv_w(w2, pc, pc), "gb2": _gb(cout, pc),
        "ref": {"w1": w1, "b1": b1, "w2": w2, "b2": b2},
    }
    if cin != cout:
        wsc = randf((cin, cout))
        p["wsc"] = _pad_mat(wsc, cin_p, pc)             # shortcut conv has bias=False
        p["gbsc"] = _gb(cout, pc)
        p["ref"]["wsc"] = wsc
    return p


# ----------------------------------------------------------------------------
# Pure-JAX reference (training-mode BatchNorm, WITH conv biases) for a tolerance check
# ----------------------------------------------------------------------------

def residual_block_reference(x_nchw, p):
    r = p["ref"]

    def conv(x, w, b):
        y = jax.lax.conv_general_dilated(
            x, w, window_strides=(1, 1), padding="SAME",
            dimension_numbers=("NCHW", "HWIO", "NCHW"),
            precision=jax.lax.Precision.HIGHEST)
        if b is not None:
            y = y + b.reshape(1, -1, 1, 1)
        return y

    def bn(x):
        mean = jnp.mean(x, axis=(0, 2, 3), keepdims=True)
        var = jnp.mean((x - mean) ** 2, axis=(0, 2, 3), keepdims=True)
        return (x - mean) * jax.lax.rsqrt(var + _EPS)

    if p["has_shortcut"]:
        wsc = r["wsc"].reshape(1, 1, *r["wsc"].shape)
        identity = bn(conv(x_nchw, wsc, None))
    else:
        identity = x_nchw
    out = jax.nn.relu(bn(conv(x_nchw, r["w1"], r["b1"])))
    out = bn(conv(out, r["w2"], r["b2"])) + identity
    return jax.nn.relu(out)


# ----------------------------------------------------------------------------

if __name__ == "__main__":
    IN_C, OUT_C, BATCH, SIZE = 4, 128, 2, 16
    params = init_residual_params(0, IN_C, OUT_C)
    x = jax.random.normal(jax.random.PRNGKey(0), (BATCH, IN_C, SIZE, SIZE), jnp.float32)

    fwd = jax.jit(lambda inp: residual_block_forward(inp, params))
    y = jax.block_until_ready(fwd(x))

    assert y.shape == (BATCH, OUT_C, SIZE, SIZE), y.shape
    assert bool(jnp.all(jnp.isfinite(y)))

    y_ref = residual_block_reference(x, params)
    err = float(jnp.max(jnp.abs(y - y_ref)))
    assert err < 0.25, f"max abs err vs f32 reference: {err}"   # bf16 MXU tolerance

    print("KERNEL_OK")
</pallas_src>

<mosaic_0001>
module attributes {stable_mosaic.version = 11 : i64} {
  func.func @_matmul_stats_kernel(%arg0: i32, %arg1: i32, %arg2: memref<256x128xbf16, #tpu.memory_space<vmem>>, %arg3: memref<128x128xbf16, #tpu.memory_space<vmem>>, %arg4: memref<256x128xbf16, #tpu.memory_space<vmem>>, %arg5: memref<1x2x128xf32, #tpu.memory_space<vmem>>) attributes {dimension_semantics = [#tpu.dimension_semantics<parallel>, #tpu.dimension_semantics<parallel>], iteration_bounds = array<i64: 2, 1>, scalar_prefetch = 0 : i64, scratch_operands = 0 : i64, tpu.core_type = #tpu.core_type<tc>, window_params = [{transform_indices = @transform_0, window_bounds = array<i64: 256, 128>}, {transform_indices = @transform_1, window_bounds = array<i64: 128, 128>}, {transform_indices = @transform_2, window_bounds = array<i64: 256, 128>}, {transform_indices = @transform_3, window_bounds = array<i64: 1, 2, 128>}]} {
    %c0 = arith.constant 0 : index
    %c0_0 = arith.constant 0 : index
    %0 = vector.load %arg2[%c0, %c0_0] : memref<256x128xbf16, #tpu.memory_space<vmem>>, vector<256x128xbf16>
    %c0_1 = arith.constant 0 : index
    %c0_2 = arith.constant 0 : index
    %1 = vector.load %arg3[%c0_1, %c0_2] : memref<128x128xbf16, #tpu.memory_space<vmem>>, vector<128x128xbf16>
    %cst = arith.constant dense<0.000000e+00> : vector<256x128xf32>
    %2 = tpu.matmul %0, %1, %cst {dimension_numbers = #tpu.dot_dimension_numbers<[1], [0], [0], [1], [0, 0, 1, 1], [], []>} : vector<256x128xbf16>, vector<128x128xbf16>, vector<256x128xf32> -> vector<256x128xf32>
    %3 = arith.truncf %2 : vector<256x128xf32> to vector<256x128xbf16>
    %c0_3 = arith.constant 0 : index
    %c0_4 = arith.constant 0 : index
    %4 = vector.load %arg4[%c0_3, %c0_4] : memref<256x128xbf16, #tpu.memory_space<vmem>>, vector<256x128xbf16>
    tpu.vector_store %arg4[%c0_3, %c0_4], %3 {strides = array<i32>} : memref<256x128xbf16, #tpu.memory_space<vmem>>, vector<256x128xbf16>,
    %cst_5 = arith.constant dense<0.000000e+00> : vector<128xf32>
    %5 = vector.multi_reduction <add>, %2, %cst_5 [0] : vector<256x128xf32> to vector<128xf32>
    %6 = vector.shape_cast %5 : vector<128xf32> to vector<1x128xf32>
    %7 = arith.mulf %2, %2 : vector<256x128xf32>
    %cst_6 = arith.constant dense<0.000000e+00> : vector<128xf32>
    %8 = vector.multi_reduction <add>, %7, %cst_6 [0] : vector<256x128xf32> to vector<128xf32>
    %9 = vector.shape_cast %8 : vector<128xf32> to vector<1x128xf32>
    %10 = tpu.concatenate %6, %9 in 0 : vector<1x128xf32>, vector<1x128xf32> -> vector<2x128xf32>
    %11 = vector.shape_cast %10 : vector<2x128xf32> to vector<1x2x128xf32>
    %c0_7 = arith.constant 0 : index
    %c0_8 = arith.constant 0 : index
    %c0_9 = arith.constant 0 : index
    %12 = vector.load %arg5[%c0_7, %c0_8, %c0_9] : memref<1x2x128xf32, #tpu.memory_space<vmem>>, vector<1x2x128xf32>
    tpu.vector_store %arg5[%c0_7, %c0_8, %c0_9], %11 {strides = array<i32>} : memref<1x2x128xf32, #tpu.memory_space<vmem>>, vector<1x2x128xf32>,
    return
  }
  func.func @transform_0(%arg0: i32, %arg1: i32) -> (i32, i32) {
    %c0_i32 = arith.constant 0 : i32
    %c0_i32_0 = arith.constant 0 : i32
    return %arg0, %c0_i32 : i32, i32
  }
  func.func @transform_1(%arg0: i32, %arg1: i32) -> (i32, i32) {
    %c0_i32 = arith.constant 0 : i32
    %c0_i32_0 = arith.constant 0 : i32
    return %c0_i32, %arg1 : i32, i32
  }
  func.func @transform_2(%arg0: i32, %arg1: i32) -> (i32, i32) {
    %c0_i32 = arith.constant 0 : i32
    return %arg0, %arg1 : i32, i32
  }
  func.func @transform_3(%arg0: i32, %arg1: i32) -> (i32, i32, i32) {
    %c0_i32 = arith.constant 0 : i32
    %c0_i32_0 = arith.constant 0 : i32
    return %arg0, %c0_i32, %arg1 : i32, i32, i32
  }
}

module attributes {stable_mosaic.version = 11 : i64} {
  func.func @_bn_act_kernel(%arg0: i32, %arg1: memref<256x128xbf16, #tpu.memory_space<vmem>>, %arg2: memref<2x128xf32, #tpu.memory_space<vmem>>, %arg3: memref<2x128xf32, #tpu.memory_space<vmem>>, %arg4: memref<256x128xbf16, #tpu.memory_space<vmem>>) attributes {dimension_semantics = [#tpu.dimension_semantics<parallel>], iteration_bounds = array<i64: 2>, scalar_prefetch = 0 : i64, scratch_operands = 0 : i64, tpu.core_type = #tpu.core_type<tc>, window_params = [{transform_indices = @transform_0, window_bounds = array<i64: 256, 128>}, {pipeline_mode = #tpu.pipeline_mode<synchronous>, transform_indices = @transform_1, window_bounds = array<i64: 2, 128>}, {pipeline_mode = #tpu.pipeline_mode<synchronous>, transform_indices = @transform_2, window_bounds = array<i64: 2, 128>}, {transform_indices = @transform_3, window_bounds = array<i64: 256, 128>}]} {
    %c0 = arith.constant 0 : index
    %c0_0 = arith.constant 0 : index
    %0 = vector.load %arg2[%c0, %c0_0] : memref<2x128xf32, #tpu.memory_space<vmem>>, vector<2x128xf32>
    %c0_1 = arith.constant 0 : index
    %c0_2 = arith.constant 0 : index
    %1 = vector.load %arg3[%c0_1, %c0_2] : memref<2x128xf32, #tpu.memory_space<vmem>>, vector<2x128xf32>
    %2 = vector.extract_strided_slice %0 {offsets = [0, 0], sizes = [1, 128], strides = [1, 1]} : vector<2x128xf32> to vector<1x128xf32>
    %cst = arith.constant 0.001953125 : f32
    %3 = vector.broadcast %cst : f32 to vector<1x128xf32>
    %4 = arith.mulf %2, %3 : vector<1x128xf32>
    %5 = vector.extract_strided_slice %0 {offsets = [1, 0], sizes = [1, 128], strides = [1, 1]} : vector<2x128xf32> to vector<1x128xf32>
    %cst_3 = arith.constant 0.001953125 : f32
    %6 = vector.broadcast %cst_3 : f32 to vector<1x128xf32>
    %7 = arith.mulf %5, %6 : vector<1x128xf32>
    %8 = arith.mulf %4, %4 : vector<1x128xf32>
    %9 = arith.subf %7, %8 : vector<1x128xf32>
    %cst_4 = arith.constant 0.000000e+00 : f32
    %10 = vector.broadcast %cst_4 : f32 to vector<1x128xf32>
    %11 = arith.maximumf %9, %10 : vector<1x128xf32>
    %12 = vector.extract_strided_slice %1 {offsets = [0, 0], sizes = [1, 128], strides = [1, 1]} : vector<2x128xf32> to vector<1x128xf32>
    %cst_5 = arith.constant 9.99999974E-6 : f32
    %13 = vector.broadcast %cst_5 : f32 to vector<1x128xf32>
    %14 = arith.addf %11, %13 : vector<1x128xf32>
    %15 = math.rsqrt %14 : vector<1x128xf32>
    %16 = arith.mulf %12, %15 : vector<1x128xf32>
    %17 = vector.extract_strided_slice %1 {offsets = [1, 0], sizes = [1, 128], strides = [1, 1]} : vector<2x128xf32> to vector<1x128xf32>
    %18 = arith.mulf %4, %16 : vector<1x128xf32>
    %19 = arith.subf %17, %18 : vector<1x128xf32>
    %c0_6 = arith.constant 0 : index
    %c0_7 = arith.constant 0 : index
    %20 = vector.load %arg1[%c0_6, %c0_7] : memref<256x128xbf16, #tpu.memory_space<vmem>>, vector<256x128xbf16>
    %21 = arith.extf %20 : vector<256x128xbf16> to vector<256x128xf32>
    %22 = vector.broadcast %16 : vector<1x128xf32> to vector<256x128xf32>
    %23 = arith.mulf %21, %22 : vector<256x128xf32>
    %24 = vector.broadcast %19 : vector<1x128xf32> to vector<256x128xf32>
    %25 = arith.addf %23, %24 : vector<256x128xf32>
    %cst_8 = arith.constant 0.000000e+00 : f32
    %26 = vector.broadcast %cst_8 : f32 to vector<256x128xf32>
    %27 = arith.maximumf %25, %26 : vector<256x128xf32>
    %28 = arith.truncf %27 : vector<256x128xf32> to vector<256x128xbf16>
    %c0_9 = arith.constant 0 : index
    %c0_10 = arith.constant 0 : index
    %29 = vector.load %arg4[%c0_9, %c0_10] : memref<256x128xbf16, #tpu.memory_space<vmem>>, vector<256x128xbf16>
    tpu.vector_store %arg4[%c0_9, %c0_10], %28 {strides = array<i32>} : memref<256x128xbf16, #tpu.memory_space<vmem>>, vector<256x128xbf16>,
    return
  }
  func.func @transform_0(%arg0: i32) -> (i32, i32) {
    %c0_i32 = arith.constant 0 : i32
    %c0_i32_0 = arith.constant 0 : i32
    return %arg0, %c0_i32 : i32, i32
  }
  func.func @transform_1(%arg0: i32) -> (i32, i32) {
    %c0_i32 = arith.constant 0 : i32
    %c0_i32_0 = arith.constant 0 : i32
    %c0_i32_1 = arith.constant 0 : i32
    return %c0_i32, %c0_i32_0 : i32, i32
  }
  func.func @transform_2(%arg0: i32) -> (i32, i32) {
    %c0_i32 = arith.constant 0 : i32
    %c0_i32_0 = arith.constant 0 : i32
    %c0_i32_1 = arith.constant 0 : i32
    return %c0_i32, %c0_i32_0 : i32, i32
  }
  func.func @transform_3(%arg0: i32) -> (i32, i32) {
    %c0_i32 = arith.constant 0 : i32
    %c0_i32_0 = arith.constant 0 : i32
    return %arg0, %c0_i32 : i32, i32
  }
}

module attributes {stable_mosaic.version = 11 : i64} {
  func.func @_conv3x3_kernel(%arg0: i32, %arg1: i32, %arg2: memref<1x18x18x128xbf16, #tpu.memory_space<vmem>>, %arg3: memref<3x3x128x128xbf16, #tpu.memory_space<vmem>>, %arg4: memref<1x16x16x128xbf16, #tpu.memory_space<vmem>>, %arg5: memref<1x2x128xf32, #tpu.memory_space<vmem>>, %arg6: memref<256x128xf32, #tpu.memory_space<vmem>>) attributes {dimension_semantics = [#tpu.dimension_semantics<parallel>, #tpu.dimension_semantics<parallel>], iteration_bounds = array<i64: 2, 1>, scalar_prefetch = 0 : i64, scratch_operands = 1 : i64, tpu.core_type = #tpu.core_type<tc>, window_params = [{transform_indices = @transform_0, window_bounds = array<i64: 1, 18, 18, 128>}, {transform_indices = @transform_1, window_bounds = array<i64: 3, 3, 128, 128>}, {transform_indices = @transform_2, window_bounds = array<i64: 1, 16, 16, 128>}, {transform_indices = @transform_3, window_bounds = array<i64: 1, 2, 128>}]} {
    %cst = arith.constant 0.000000e+00 : f32
    %0 = vector.broadcast %cst : f32 to vector<256x128xf32>
    %c0 = arith.constant 0 : index
    %c0_0 = arith.constant 0 : index
    %1 = vector.load %arg6[%c0, %c0_0] : memref<256x128xf32, #tpu.memory_space<vmem>>, vector<256x128xf32>
    tpu.vector_store %arg6[%c0, %c0_0], %0 {strides = array<i32>} : memref<256x128xf32, #tpu.memory_space<vmem>>, vector<256x128xf32>,
    %c0_1 = arith.constant 0 : index
    %c0_2 = arith.constant 0 : index
    %c0_3 = arith.constant 0 : index
    %c0_4 = arith.constant 0 : index
    %2 = vector.load %arg2[%c0_1, %c0_2, %c0_3, %c0_4] : memref<1x18x18x128xbf16, #tpu.memory_space<vmem>>, vector<1x16x16x128xbf16>
    %3 = vector.shape_cast %2 : vector<1x16x16x128xbf16> to vector<16x16x128xbf16>
    %4 = vector.shape_cast %3 : vector<16x16x128xbf16> to vector<256x128xbf16>
    %c0_5 = arith.constant 0 : index
    %c0_6 = arith.constant 0 : index
    %5 = vector.load %arg6[%c0_5, %c0_6] : memref<256x128xf32, #tpu.memory_space<vmem>>, vector<256x128xf32>
    %c0_7 = arith.constant 0 : index
    %c0_8 = arith.constant 0 : index
    %c0_9 = arith.constant 0 : index
    %c0_10 = arith.constant 0 : index
    %6 = vector.load %arg3[%c0_7, %c0_8, %c0_9, %c0_10] : memref<3x3x128x128xbf16, #tpu.memory_space<vmem>>, vector<1x1x128x128xbf16>
    %7 = vector.shape_cast %6 : vector<1x1x128x128xbf16> to vector<128x128xbf16>
    %cst_11 = arith.constant dense<0.000000e+00> : vector<256x128xf32>
    %8 = tpu.matmul %4, %7, %cst_11 {dimension_numbers = #tpu.dot_dimension_numbers<[1], [0], [0], [1], [0, 0, 1, 1], [], []>} : vector<256x128xbf16>, vector<128x128xbf16>, vector<256x128xf32> -> vector<256x128xf32>
    %9 = arith.addf %5, %8 : vector<256x128xf32>
    %c0_12 = arith.constant 0 : index
    %c0_13 = arith.constant 0 : index
    %10 = vector.load %arg6[%c0_12, %c0_13] : memref<256x128xf32, #tpu.memory_space<vmem>>, vector<256x128xf32>
    tpu.vector_store %arg6[%c0_12, %c0_13], %9 {strides = array<i32>} : memref<256x128xf32, #tpu.memory_space<vmem>>, vector<256x128xf32>,
    %c0_14 = arith.constant 0 : index
    %c0_15 = arith.constant 0 : index
    %c1 = arith.constant 1 : index
    %c0_16 = arith.constant 0 : index
    %11 = vector.load %arg2[%c0_14, %c0_15, %c1, %c0_16] : memref<1x18x18x128xbf16, #tpu.memory_space<vmem>>, vector<1x16x16x128xbf16>
    %12 = vector.shape_cast %11 : vector<1x16x16x128xbf16> to vector<16x16x128xbf16>
    %13 = vector.shape_cast %12 : vector<16x16x128xbf16> to vector<256x128xbf16>
    %c0_17 = arith.constant 0 : index
    %c0_18 = arith.constant 0 : index
    %14 = vector.load %arg6[%c0_17, %c0_18] : memref<256x128xf32, #tpu.memory_space<vmem>>, vector<256x128xf32>
    %c0_19 = arith.constant 0 : index
    %c1_20 = arith.constant 1 : index
    %c0_21 = arith.constant 0 : index
    %c0_22 = arith.constant 0 : index
    %15 = vector.load %arg3[%c0_19, %c1_20, %c0_21, %c0_22] : memref<3x3x128x128xbf16, #tpu.memory_space<vmem>>, vector<1x1x128x128xbf16>
    %16 = vector.shape_cast %15 : vector<1x1x128x128xbf16> to vector<128x128xbf16>
    %cst_23 = arith.constant dense<0.000000e+00> : vector<256x128xf32>
    %17 = tpu.matmul %13, %16, %cst_23 {dimension_numbers = #tpu.dot_dimension_numbers<[1], [0], [0], [1], [0, 0, 1, 1], [], []>} : vector<256x128xbf16>, vector<128x128xbf16>, vector<256x128xf32> -> vector<256x128xf32>
    %18 = arith.addf %14, %17 : vector<256x128xf32>
    %c0_24 = arith.constant 0 : index
    %c0_25 = arith.constant 0 : index
    %19 = vector.load %arg6[%c0_24, %c0_25] : memref<256x128xf32, #tpu.memory_space<vmem>>, vector<256x128xf32>
    tpu.vector_store %arg6[%c0_24, %c0_25], %18 {strides = array<i32>} : memref<256x128xf32, #tpu.memory_space<vmem>>, vector<256x128xf32>,
    %c0_26 = arith.constant 0 : index
    %c0_27 = arith.constant 0 : index
    %c2 = arith.constant 2 : index
    %c0_28 = arith.constant 0 : index
    %20 = vector.load %arg2[%c0_26, %c0_27, %c2, %c0_28] : memref<1x18x18x128xbf16, #tpu.memory_space<vmem>>, vector<1x16x16x128xbf16>
    %21 = vector.shape_cast %20 : vector<1x16x16x128xbf16> to vector<16x16x128xbf16>
    %22 = vector.shape_cast %21 : vector<16x16x128xbf16> to vector<256x128xbf16>
    %c0_29 = arith.constant 0 : index
    %c0_30 = arith.constant 0 : index
    %23 = vector.load %arg6[%c0_29, %c0_30] : memref<256x128xf32, #tpu.memory_space<vmem>>, vector<256x128xf32>
    %c0_31 = arith.constant 0 : index
    %c2_32 = arith.constant 2 : index
    %c0_33 = arith.constant 0 : index
    %c0_34 = arith.constant 0 : index
    %24 = vector.load %arg3[%c0_31, %c2_32, %c0_33, %c0_34] : memref<3x3x128x128xbf16, #tpu.memory_space<vmem>>, vector<1x1x128x128xbf16>
    %25 = vector.shape_cast %24 : vector<1x1x128x128xbf16> to vector<128x128xbf16>
    %cst_35 = arith.constant dense<0.000000e+00> : vector<256x128xf32>
    %26 = tpu.matmul %22, %25, %cst_35 {dimension_numbers = #tpu.dot_dimension_numbers<[1], [0], [0], [1], [0, 0, 1, 1], [], []>} : vector<256x128xbf16>, vector<128x128xbf16>, vector<256x128xf32> -> vector<256x128xf32>
    %27 = arith.addf %23, %26 : vector<256x128xf32>
    %c0_36 = arith.constant 0 : index
    %c0_37 = arith.constant 0 : index
    %28 = vector.load %arg6[%c0_36, %c0_37] : memref<256x128xf32, #tpu.memory_space<vmem>>, vector<256x128xf32>
    tpu.vector_store %arg6[%c0_36, %c0_37], %27 {strides = array<i32>} : memref<256x128xf32, #tpu.memory_space<vmem>>, vector<256x128xf32>,
    %c0_38 = arith.constant 0 : index
    %c1_39 = arith.constant 1 : index
    %c0_40 = arith.constant 0 : index
    %c0_41 = arith.constant 0 : index
    %29 = vector.load %arg2[%c0_38, %c1_39, %c0_40, %c0_41] : memref<1x18x18x128xbf16, #tpu.memory_space<vmem>>, vector<1x16x16x128xbf16>
    %30 = vector.shape_cast %29 : vector<1x16x16x128xbf16> to vector<16x16x128xbf16>
    %31 = vector.shape_cast %30 : vector<16x16x128xbf16> to vector<256x128xbf16>
    %c0_42 = arith.constant 0 : index
    %c0_43 = arith.constant 0 : index
    %32 = vector.load %arg6[%c0_42, %c0_43] : memref<256x128xf32, #tpu.memory_space<vmem>>, vector<256x128xf32>
    %c1_44 = arith.constant 1 : index
    %c0_45 = arith.constant 0 : index
    %c0_46 = arith.constant 0 : index
    %c0_47 = arith.constant 0 : index
    %33 = vector.load %arg3[%c1_44, %c0_45, %c0_46, %c0_47] : memref<3x3x128x128xbf16, #tpu.memory_space<vmem>>, vector<1x1x128x128xbf16>
    %34 = vector.shape_cast %33 : vector<1x1x128x128xbf16> to vector<128x128xbf16>
    %cst_48 = arith.constant dense<0.000000e+00> : vector<256x128xf32>
    %35 = tpu.matmul %31, %34, %cst_48 {dimension_numbers = #tpu.dot_dimension_numbers<[1], [0], [0], [1], [0, 0, 1, 1], [], []>} : vector<256x128xbf16>, vector<128x128xbf16>, vector<256x128xf32> -> vector<256x128xf32>
    %36 = arith.addf %32, %35 : vector<256x128xf32>
    %c0_49 = arith.constant 0 : index
    %c0_50 = arith.constant 0 : index
    %37 = vector.load %arg6[%c0_49, %c0_50] : memref<256x128xf32, #tpu.memory_space<vmem>>, vector<256x128xf32>
    tpu.vector_store %arg6[%c0_49, %c0_50], %36 {strides = array<i32>} : memref<256x128xf32, #tpu.memory_space<vmem>>, vector<256x128xf32>,
    %c0_51 = arith.constant 0 : index
    %c1_52 = arith.constant 1 : index
    %c1_53 = arith.constant 1 : index
    %c0_54 = arith.constant 0 : index
    %38 = vector.load %arg2[%c0_51, %c1_52, %c1_53, %c0_54] : memref<1x18x18x128xbf16, #tpu.memory_space<vmem>>, vector<1x16x16x128xbf16>
    %39 = vector.shape_cast %38 : vector<1x16x16x128xbf16> to vector<16x16x128xbf16>
    %40 = vector.shape_cast %39 : vector<16x16x128xbf16> to vector<256x128xbf16>
    %c0_55 = arith.constant 0 : index
    %c0_56 = arith.constant 0 : index
    %41 = vector.load %arg6[%c0_55, %c0_56] : memref<256x128xf32, #tpu.memory_space<vmem>>, vector<256x128xf32>
    %c1_57 = arith.constant 1 : index
    %c1_58 = arith.constant 1 : index
    %c0_59 = arith.constant 0 : index
    %c0_60 = arith.constant 0 : index
    %42 = vector.load %arg3[%c1_57, %c1_58, %c0_59, %c0_60] : memref<3x3x128x128xbf16, #tpu.memory_space<vmem>>, vector<1x1x128x128xbf16>
    %43 = vector.shape_cast %42 : vector<1x1x128x128xbf16> to vector<128x128xbf16>
    %cst_61 = arith.constant dense<0.000000e+00> : vector<256x128xf32>
    %44 = tpu.matmul %40, %43, %cst_61 {dimension_numbers = #tpu.dot_dimension_numbers<[1], [0], [0], [1], [0, 0, 1, 1], [], []>} : vector<256x128xbf16>, vector<128x128xbf16>, vector<256x128xf32> -> vector<256x128xf32>
    %45 = arith.addf %41, %44 : vector<256x128xf32>
    %c0_62 = arith.constant 0 : index
    %c0_63 = arith.constant 0 : index
    %46 = vector.load %arg6[%c0_62, %c0_63] : memref<256x128xf32, #tpu.memory_space<vmem>>, vector<256x128xf32>
    tpu.vector_store %arg6[%c0_62, %c0_63], %45 {strides = array<i32>} : memref<256x128xf32, #tpu.memory_space<vmem>>, vector<256x128xf32>,
    %c0_64 = arith.constant 0 : index
    %c1_65 = arith.constant 1 : index
    %c2_66 = arith.constant 2 : index
    %c0_67 = arith.constant 0 : index
    %47 = vector.load %arg2[%c0_64, %c1_65, %c2_66, %c0_67] : memref<1x18x18x128xbf16, #tpu.memory_space<vmem>>, vector<1x16x16x128xbf16>
    %48 = vector.shape_cast %47 : vector<1x16x16x128xbf16> to vector<16x16x128xbf16>
    %49 = vector.shape_cast %48 : vector<16x16x128xbf16> to vector<256x128xbf16>
    %c0_68 = arith.constant 0 : index
    %c0_69 = arith.constant 0 : index
    %50 = vector.load %arg6[%c0_68, %c0_69] : memref<256x128xf32, #tpu.memory_space<vmem>>, vector<256x128xf32>
    %c1_70 = arith.constant 1 : index
    %c2_71 = arith.constant 2 : index
    %c0_72 = arith.constant 0 : index
    %c0_73 = arith.constant 0 : index
    %51 = vector.load %arg3[%c1_70, %c2_71, %c0_72, %c0_73] : memref<3x3x128x128xbf16, #tpu.memory_space<vmem>>, vector<1x1x128x128xbf16>
    %52 = vector.shape_cast %51 : vector<1x1x128x128xbf16> to vector<128x128xbf16>
    %cst_74 = arith.constant dense<0.000000e+00> : vector<256x128xf32>
    %53 = tpu.matmul %49, %52, %cst_74 {dimension_numbers = #tpu.dot_dimension_numbers<[1], [0], [0], [1], [0, 0, 1, 1], [], []>} : vector<256x128xbf16>, vector<128x128xbf16>, vector<256x128xf32> -> vector<256x128xf32>
    %54 = arith.addf %50, %53 : vector<256x128xf32>
    %c0_75 = arith.constant 0 : index
    %c0_76 = arith.constant 0 : index
    %55 = vector.load %arg6[%c0_75, %c0_76] : memref<256x128xf32, #tpu.memory_space<vmem>>, vector<256x128xf32>
    tpu.vector_store %arg6[%c0_75, %c0_76], %54 {strides = array<i32>} : memref<256x128xf32, #tpu.memory_space<vmem>>, vector<256x128xf32>,
    %c0_77 = arith.constant 0 : index
    %c2_78 = arith.constant 2 : index
    %c0_79 = arith.constant 0 : index
    %c0_80 = arith.constant 0 : index
    %56 = vector.load %arg2[%c0_77, %c2_78, %c0_79, %c0_80] : memref<1x18x18x128xbf16, #tpu.memory_space<vmem>>, vector<1x16x16x128xbf16>
    %57 = vector.shape_cast %56 : vector<1x16x16x128xbf16> to vector<16x16x128xbf16>
    %58 = vector.shape_cast %57 : vector<16x16x128xbf16> to vector<256x128xbf16>
    %c0_81 = arith.constant 0 : index
    %c0_82 = arith.constant 0 : index
    %59 = vector.load %arg6[%c0_81, %c0_82] : memref<256x128xf32, #tpu.memory_space<vmem>>, vector<256x128xf32>
    %c2_83 = arith.constant 2 : index
    %c0_84 = arith.constant 0 : index
    %c0_85 = arith.constant 0 : index
    %c0_86 = arith.constant 0 : index
    %60 = vector.load %arg3[%c2_83, %c0_84, %c0_85, %c0_86] : memref<3x3x128x128xbf16, #tpu.memory_space<vmem>>, vector<1x1x128x128xbf16>
    %61 = vector.shape_cast %60 : vector<1x1x128x128xbf16> to vector<128x128xbf16>
    %cst_87 = arith.constant dense<0.000000e+00> : vector<256x128xf32>
    %62 = tpu.matmul %58, %61, %cst_87 {dimension_numbers = #tpu.dot_dimension_numbers<[1], [0], [0], [1], [0, 0, 1, 1], [], []>} : vector<256x128xbf16>, vector<128x128xbf16>, vector<256x128xf32> -> vector<256x128xf32>
    %63 = arith.addf %59, %62 : vector<256x128xf32>
    %c0_88 = arith.constant 0 : index
    %c0_89 = arith.constant 0 : index
    %64 = vector.load %arg6[%c0_88, %c0_89] : memref<256x128xf32, #tpu.memory_space<vmem>>, vector<256x128xf32>
    tpu.vector_store %arg6[%c0_88, %c0_89], %63 {strides = array<i32>} : memref<256x128xf32, #tpu.memory_space<vmem>>, vector<256x128xf32>,
    %c0_90 = arith.constant 0 : index
    %c2_91 = arith.constant 2 : index
    %c1_92 = arith.constant 1 : index
    %c0_93 = arith.constant 0 : index
    %65 = vector.load %arg2[%c0_90, %c2_91, %c1_92, %c0_93] : memref<1x18x18x128xbf16, #tpu.memory_space<vmem>>, vector<1x16x16x128xbf16>
    %66 = vector.shape_cast %65 : vector<1x16x16x128xbf16> to vector<16x16x128xbf16>
    %67 = vector.shape_cast %66 : vector<16x16x128xbf16> to vector<256x128xbf16>
    %c0_94 = arith.constant 0 : index
    %c0_95 = arith.constant 0 : index
    %68 = vector.load %arg6[%c0_94, %c0_95] : memref<256x128xf32, #tpu.memory_space<vmem>>, vector<256x128xf32>
    %c2_96 = arith.constant 2 : index
    %c1_97 = arith.constant 1 : index
    %c0_98 = arith.constant 0 : index
    %c0_99 = arith.constant 0 : index
    %69 = vector.load %arg3[%c2_96, %c1_97, %c0_98, %c0_99] : memref<3x3x128x128xbf16, #tpu.memory_space<vmem>>, vector<1x1x128x128xbf16>
    %70 = vector.shape_cast %69 : vector<1x1x128x128xbf16> to vector<128x128xbf16>
    %cst_100 = arith.constant dense<0.000000e+00> : vector<256x128xf32>
    %71 = tpu.matmul %67, %70, %cst_100 {dimension_numbers = #tpu.dot_dimension_numbers<[1], [0], [0], [1], [0, 0, 1, 1], [], []>} : vector<256x128xbf16>, vector<128x128xbf16>, vector<256x128xf32> -> vector<256x128xf32>
    %72 = arith.addf %68, %71 : vector<256x128xf32>
    %c0_101 = arith.constant 0 : index
    %c0_102 = arith.constant 0 : index
    %73 = vector.load %arg6[%c0_101, %c0_102] : memref<256x128xf32, #tpu.memory_space<vmem>>, vector<256x128xf32>
    tpu.vector_store %arg6[%c0_101, %c0_102], %72 {strides = array<i32>} : memref<256x128xf32, #tpu.memory_space<vmem>>, vector<256x128xf32>,
    %c0_103 = arith.constant 0 : index
    %c2_104 = arith.constant 2 : index
    %c2_105 = arith.constant 2 : index
    %c0_106 = arith.constant 0 : index
    %74 = vector.load %arg2[%c0_103, %c2_104, %c2_105, %c0_106] : memref<1x18x18x128xbf16, #tpu.memory_space<vmem>>, vector<1x16x16x128xbf16>
    %75 = vector.shape_cast %74 : vector<1x16x16x128xbf16> to vector<16x16x128xbf16>
    %76 = vector.shape_cast %75 : vector<16x16x128xbf16> to vector<256x128xbf16>
    %c0_107 = arith.constant 0 : index
    %c0_108 = arith.constant 0 : index
    %77 = vector.load %arg6[%c0_107, %c0_108] : memref<256x128xf32, #tpu.memory_space<vmem>>, vector<256x128xf32>
    %c2_109 = arith.constant 2 : index
    %c2_110 = arith.constant 2 : index
    %c0_111 = arith.constant 0 : index
    %c0_112 = arith.constant 0 : index
    %78 = vector.load %arg3[%c2_109, %c2_110, %c0_111, %c0_112] : memref<3x3x128x128xbf16, #tpu.memory_space<vmem>>, vector<1x1x128x128xbf16>
    %79 = vector.shape_cast %78 : vector<1x1x128x128xbf16> to vector<128x128xbf16>
    %cst_113 = arith.constant dense<0.000000e+00> : vector<256x128xf32>
    %80 = tpu.matmul %76, %79, %cst_113 {dimension_numbers = #tpu.dot_dimension_numbers<[1], [0], [0], [1], [0, 0, 1, 1], [], []>} : vector<256x128xbf16>, vector<128x128xbf16>, vector<256x128xf32> -> vector<256x128xf32>
    %81 = arith.addf %77, %80 : vector<256x128xf32>
    %c0_114 = arith.constant 0 : index
    %c0_115 = arith.constant 0 : index
    %82 = vector.load %arg6[%c0_114, %c0_115] : memref<256x128xf32, #tpu.memory_space<vmem>>, vector<256x128xf32>
    tpu.vector_store %arg6[%c0_114, %c0_115], %81 {strides = array<i32>} : memref<256x128xf32, #tpu.memory_space<vmem>>, vector<256x128xf32>,
    %c0_116 = arith.constant 0 : index
    %c0_117 = arith.constant 0 : index
    %83 = vector.load %arg6[%c0_116, %c0_117] : memref<256x128xf32, #tpu.memory_space<vmem>>, vector<256x128xf32>
    %84 = vector.shape_cast %83 : vector<256x128xf32> to vector<1x16x16x128xf32>
    %85 = arith.truncf %84 : vector<1x16x16x128xf32> to vector<1x16x16x128xbf16>
    %c0_118 = arith.constant 0 : index
    %c0_119 = arith.constant 0 : index
    %c0_120 = arith.constant 0 : index
    %c0_121 = arith.constant 0 : index
    %86 = vector.load %arg4[%c0_118, %c0_119, %c0_120, %c0_121] : memref<1x16x16x128xbf16, #tpu.memory_space<vmem>>, vector<1x16x16x128xbf16>
    tpu.vector_store %arg4[%c0_118, %c0_119, %c0_120, %c0_121], %85 {strides = array<i32>} : memref<1x16x16x128xbf16, #tpu.memory_space<vmem>>, vector<1x16x16x128xbf16>,
    %cst_122 = arith.constant dense<0.000000e+00> : vector<128xf32>
    %87 = vector.multi_reduction <add>, %83, %cst_122 [0] : vector<256x128xf32> to vector<128xf32>
    %88 = vector.shape_cast %87 : vector<128xf32> to vector<1x128xf32>
    %89 = arith.mulf %83, %83 : vector<256x128xf32>
    %cst_123 = arith.constant dense<0.000000e+00> : vector<128xf32>
    %90 = vector.multi_reduction <add>, %89, %cst_123 [0] : vector<256x128xf32> to vector<128xf32>
    %91 = vector.shape_cast %90 : vector<128xf32> to vector<1x128xf32>
    %92 = tpu.concatenate %88, %91 in 0 : vector<1x128xf32>, vector<1x128xf32> -> vector<2x128xf32>
    %93 = vector.shape_cast %92 : vector<2x128xf32> to vector<1x2x128xf32>
    %c0_124 = arith.constant 0 : index
    %c0_125 = arith.constant 0 : index
    %c0_126 = arith.constant 0 : index
    %94 = vector.load %arg5[%c0_124, %c0_125, %c0_126] : memref<1x2x128xf32, #tpu.memory_space<vmem>>, vector<1x2x128xf32>
    tpu.vector_store %arg5[%c0_124, %c0_125, %c0_126], %93 {strides = array<i32>} : memref<1x2x128xf32, #tpu.memory_space<vmem>>, vector<1x2x128xf32>,
    return
  }
  func.func @transform_0(%arg0: i32, %arg1: i32) -> (i32, i32, i32, i32) {
    %c0_i32 = arith.constant 0 : i32
    %c0_i32_0 = arith.constant 0 : i32
    %c0_i32_1 = arith.constant 0 : i32
    %c0_i32_2 = arith.constant 0 : i32
    return %arg0, %c0_i32, %c0_i32_0, %c0_i32_1 : i32, i32, i32, i32
  }
  func.func @transform_1(%arg0: i32, %arg1: i32) -> (i32, i32, i32, i32) {
    %c0_i32 = arith.constant 0 : i32
    %c0_i32_0 = arith.constant 0 : i32
    %c0_i32_1 = arith.constant 0 : i32
    %c0_i32_2 = arith.constant 0 : i32
    return %c0_i32, %c0_i32_0, %c0_i32_1, %arg1 : i32, i32, i32, i32
  }
  func.func @transform_2(%arg0: i32, %arg1: i32) -> (i32, i32, i32, i32) {
    %c0_i32 = arith.constant 0 : i32
    %c0_i32_0 = arith.constant 0 : i32
    %c0_i32_1 = arith.constant 0 : i32
    return %arg0, %c0_i32, %c0_i32_0, %arg1 : i32, i32, i32, i32
  }
  func.func @transform_3(%arg0: i32, %arg1: i32) -> (i32, i32, i32) {
    %c0_i32 = arith.constant 0 : i32
    %c0_i32_0 = arith.constant 0 : i32
    return %arg0, %c0_i32, %arg1 : i32, i32, i32
  }
}

module attributes {stable_mosaic.version = 11 : i64} {
  func.func @_bn_add_bn_relu_kernel(%arg0: i32, %arg1: memref<256x128xbf16, #tpu.memory_space<vmem>>, %arg2: memref<2x128xf32, #tpu.memory_space<vmem>>, %arg3: memref<2x128xf32, #tpu.memory_space<vmem>>, %arg4: memref<256x128xbf16, #tpu.memory_space<vmem>>, %arg5: memref<2x128xf32, #tpu.memory_space<vmem>>, %arg6: memref<2x128xf32, #tpu.memory_space<vmem>>, %arg7: memref<256x128xf32, #tpu.memory_space<vmem>>) attributes {dimension_semantics = [#tpu.dimension_semantics<parallel>], iteration_bounds = array<i64: 2>, scalar_prefetch = 0 : i64, scratch_operands = 0 : i64, tpu.core_type = #tpu.core_type<tc>, window_params = [{transform_indices = @transform_0, window_bounds = array<i64: 256, 128>}, {pipeline_mode = #tpu.pipeline_mode<synchronous>, transform_indices = @transform_1, window_bounds = array<i64: 2, 128>}, {pipeline_mode = #tpu.pipeline_mode<synchronous>, transform_indices = @transform_2, window_bounds = array<i64: 2, 128>}, {transform_indices = @transform_3, window_bounds = array<i64: 256, 128>}, {pipeline_mode = #tpu.pipeline_mode<synchronous>, transform_indices = @transform_4, window_bounds = array<i64: 2, 128>}, {pipeline_mode = #tpu.pipeline_mode<synchronous>, transform_indices = @transform_5, window_bounds = array<i64: 2, 128>}, {transform_indices = @transform_6, window_bounds = array<i64: 256, 128>}]} {
    %c0 = arith.constant 0 : index
    %c0_0 = arith.constant 0 : index
    %0 = vector.load %arg2[%c0, %c0_0] : memref<2x128xf32, #tpu.memory_space<vmem>>, vector<2x128xf32>
    %c0_1 = arith.constant 0 : index
    %c0_2 = arith.constant 0 : index
    %1 = vector.load %arg3[%c0_1, %c0_2] : memref<2x128xf32, #tpu.memory_space<vmem>>, vector<2x128xf32>
    %2 = vector.extract_strided_slice %0 {offsets = [0, 0], sizes = [1, 128], strides = [1, 1]} : vector<2x128xf32> to vector<1x128xf32>
    %cst = arith.constant 0.001953125 : f32
    %3 = vector.broadcast %cst : f32 to vector<1x128xf32>
    %4 = arith.mulf %2, %3 : vector<1x128xf32>
    %5 = vector.extract_strided_slice %0 {offsets = [1, 0], sizes = [1, 128], strides = [1, 1]} : vector<2x128xf32> to vector<1x128xf32>
    %cst_3 = arith.constant 0.001953125 : f32
    %6 = vector.broadcast %cst_3 : f32 to vector<1x128xf32>
    %7 = arith.mulf %5, %6 : vector<1x128xf32>
    %8 = arith.mulf %4, %4 : vector<1x128xf32>
    %9 = arith.subf %7, %8 : vector<1x128xf32>
    %cst_4 = arith.constant 0.000000e+00 : f32
    %10 = vector.broadcast %cst_4 : f32 to vector<1x128xf32>
    %11 = arith.maximumf %9, %10 : vector<1x128xf32>
    %12 = vector.extract_strided_slice %1 {offsets = [0, 0], sizes = [1, 128], strides = [1, 1]} : vector<2x128xf32> to vector<1x128xf32>
    %cst_5 = arith.constant 9.99999974E-6 : f32
    %13 = vector.broadcast %cst_5 : f32 to vector<1x128xf32>
    %14 = arith.addf %11, %13 : vector<1x128xf32>
    %15 = math.rsqrt %14 : vector<1x128xf32>
    %16 = arith.mulf %12, %15 : vector<1x128xf32>
    %17 = vector.extract_strided_slice %1 {offsets = [1, 0], sizes = [1, 128], strides = [1, 1]} : vector<2x128xf32> to vector<1x128xf32>
    %18 = arith.mulf %4, %16 : vector<1x128xf32>
    %19 = arith.subf %17, %18 : vector<1x128xf32>
    %c0_6 = arith.constant 0 : index
    %c0_7 = arith.constant 0 : index
    %20 = vector.load %arg5[%c0_6, %c0_7] : memref<2x128xf32, #tpu.memory_space<vmem>>, vector<2x128xf32>
    %c0_8 = arith.constant 0 : index
    %c0_9 = arith.constant 0 : index
    %21 = vector.load %arg6[%c0_8, %c0_9] : memref<2x128xf32, #tpu.memory_space<vmem>>, vector<2x128xf32>
    %22 = vector.extract_strided_slice %20 {offsets = [0, 0], sizes = [1, 128], strides = [1, 1]} : vector<2x128xf32> to vector<1x128xf32>
    %cst_10 = arith.constant 0.001953125 : f32
    %23 = vector.broadcast %cst_10 : f32 to vector<1x128xf32>
    %24 = arith.mulf %22, %23 : vector<1x128xf32>
    %25 = vector.extract_strided_slice %20 {offsets = [1, 0], sizes = [1, 128], strides = [1, 1]} : vector<2x128xf32> to vector<1x128xf32>
    %cst_11 = arith.constant 0.001953125 : f32
    %26 = vector.broadcast %cst_11 : f32 to vector<1x128xf32>
    %27 = arith.mulf %25, %26 : vector<1x128xf32>
    %28 = arith.mulf %24, %24 : vector<1x128xf32>
    %29 = arith.subf %27, %28 : vector<1x128xf32>
    %cst_12 = arith.constant 0.000000e+00 : f32
    %30 = vector.broadcast %cst_12 : f32 to vector<1x128xf32>
    %31 = arith.maximumf %29, %30 : vector<1x128xf32>
    %32 = vector.extract_strided_slice %21 {offsets = [0, 0], sizes = [1, 128], strides = [1, 1]} : vector<2x128xf32> to vector<1x128xf32>
    %cst_13 = arith.constant 9.99999974E-6 : f32
    %33 = vector.broadcast %cst_13 : f32 to vector<1x128xf32>
    %34 = arith.addf %31, %33 : vector<1x128xf32>
    %35 = math.rsqrt %34 : vector<1x128xf32>
    %36 = arith.mulf %32, %35 : vector<1x128xf32>
    %37 = vector.extract_strided_slice %21 {offsets = [1, 0], sizes = [1, 128], strides = [1, 1]} : vector<2x128xf32> to vector<1x128xf32>
    %38 = arith.mulf %24, %36 : vector<1x128xf32>
    %39 = arith.subf %37, %38 : vector<1x128xf32>
    %c0_14 = arith.constant 0 : index
    %c0_15 = arith.constant 0 : index
    %40 = vector.load %arg1[%c0_14, %c0_15] : memref<256x128xbf16, #tpu.memory_space<vmem>>, vector<256x128xbf16>
    %41 = arith.extf %40 : vector<256x128xbf16> to vector<256x128xf32>
    %42 = vector.broadcast %16 : vector<1x128xf32> to vector<256x128xf32>
    %43 = arith.mulf %41, %42 : vector<256x128xf32>
    %44 = vector.broadcast %19 : vector<1x128xf32> to vector<256x128xf32>
    %45 = arith.addf %43, %44 : vector<256x128xf32>
    %c0_16 = arith.constant 0 : index
    %c0_17 = arith.constant 0 : index
    %46 = vector.load %arg4[%c0_16, %c0_17] : memref<256x128xbf16, #tpu.memory_space<vmem>>, vector<256x128xbf16>
    %47 = arith.extf %46 : vector<256x128xbf16> to vector<256x128xf32>
    %48 = vector.broadcast %36 : vector<1x128xf32> to vector<256x128xf32>
    %49 = arith.mulf %47, %48 : vector<256x128xf32>
    %50 = arith.addf %45, %49 : vector<256x128xf32>
    %51 = vector.broadcast %39 : vector<1x128xf32> to vector<256x128xf32>
    %52 = arith.addf %50, %51 : vector<256x128xf32>
    %cst_18 = arith.constant 0.000000e+00 : f32
    %53 = vector.broadcast %cst_18 : f32 to vector<256x128xf32>
    %54 = arith.maximumf %52, %53 : vector<256x128xf32>
    %c0_19 = arith.constant 0 : index
    %c0_20 = arith.constant 0 : index
    %55 = vector.load %arg7[%c0_19, %c0_20] : memref<256x128xf32, #tpu.memory_space<vmem>>, vector<256x128xf32>
    tpu.vector_store %arg7[%c0_19, %c0_20], %54 {strides = array<i32>} : memref<256x128xf32, #tpu.memory_space<vmem>>, vector<256x128xf32>,
    return
  }
  func.func @transform_0(%arg0: i32) -> (i32, i32) {
    %c0_i32 = arith.constant 0 : i32
    %c0_i32_0 = arith.constant 0 : i32
    return %arg0, %c0_i32 : i32, i32
  }
  func.func @transform_1(%arg0: i32) -> (i32, i32) {
    %c0_i32 = arith.constant 0 : i32
    %c0_i32_0 = arith.constant 0 : i32
    %c0_i32_1 = arith.constant 0 : i32
    return %c0_i32, %c0_i32_0 : i32, i32
  }
  func.func @transform_2(%arg0: i32) -> (i32, i32) {
    %c0_i32 = arith.constant 0 : i32
    %c0_i32_0 = arith.constant 0 : i32
    %c0_i32_1 = arith.constant 0 : i32
    return %c0_i32, %c0_i32_0 : i32, i32
  }
  func.func @transform_3(%arg0: i32) -> (i32, i32) {
    %c0_i32 = arith.constant 0 : i32
    %c0_i32_0 = arith.constant 0 : i32
    return %arg0, %c0_i32 : i32, i32
  }
  func.func @transform_4(%arg0: i32) -> (i32, i32) {
    %c0_i32 = arith.constant 0 : i32
    %c0_i32_0 = arith.constant 0 : i32
    %c0_i32_1 = arith.constant 0 : i32
    return %c0_i32, %c0_i32_0 : i32, i32
  }
  func.func @transform_5(%arg0: i32) -> (i32, i32) {
    %c0_i32 = arith.constant 0 : i32
    %c0_i32_0 = arith.constant 0 : i32
    %c0_i32_1 = arith.constant 0 : i32
    return %c0_i32, %c0_i32_0 : i32, i32
  }
  func.func @transform_6(%arg0: i32) -> (i32, i32) {
    %c0_i32 = arith.constant 0 : i32
    %c0_i32_0 = arith.constant 0 : i32
    return %arg0, %c0_i32 : i32, i32
  }
}

</mosaic_0001>

<bundles_post_ra>
// kernel: _lambda_.8
= control target key start
LH: loop header
LB: loop body
LE: loop exit
PB: predicated region body
PF: predicated region fallthrough
CT: control target
= control target key end

     0   :  { %s1360_s12 = smov 0   ;;  %s1362_s13 = smov 0   ;;  %s1552_s0 = inlined_call_operand.vmem [shape: bf16[512,128], index: 0, kind: input, shape index: {}]   ;;  %s1553_s1 = inlined_call_operand.vmem [shape: bf16[128,128], index: 1, kind: input, shape index: {}]   ;;  %s1554_s2 = inlined_call_operand.vmem [shape: bf16[512,128], index: 2, kind: output, shape index: {0}]   ;;  %s1555_s3 = inlined_call_operand.vmem [shape: f32[2,2,128], index: 3, kind: output, shape index: {1}]  }
   0x1   :  { %s1364_s14 = smov 0  }
   0x2 LB: > { %s26_s15 = sadd.s32 1, %s1334_s13  ;;  %p989_p0 = scmp.ge.s32.totalorder %s1338_s14, 1  ;;  %s1338_s14 = sphi %s1364_s14, %s14_s14   ;;  %s1334_s13 = sphi %s1362_s13, %s1557_s13   ;;  %s1330_s12 = sphi %s1360_s12, %s1556_s12  }
   0x3   : > { %p28_p1 = scmp.ge.s32.totalorder %s26_s15, 2  ;;  %p166_p2 = scmp.lt.s32.totalorder %s1338_s14, 3 }
   0x5   : > { %s1559_s15 = smov (%p28_p1, %s26_s15), 0  ;;  %p167_p3 = pnand %p989_p0, %p166_p2 }
   0x6   : > { %v1292_v0 = vld [vmem:[%s1553_s1] sm:$0xff] (!%p167_p3)   ;;  %s990_s18 = sshll.u32 (!%p167_p3), %s1330_s12, 5  ;;  %v1293_v1 = vld [vmem:[%s1553_s1 + $0x8] sm:$0xff] (!%p167_p3)   ;;  %v1294_v2 = vld [vmem:[%s1553_s1 + $0x10] sm:$0xff] (!%p167_p3)   ;;  %p223_p5 = scmp.lt.s32.totalorder (!%p167_p3), %s1330_s12, 1  ;;  %vm850_vm0 = vcmask (!%p167_p3), 1040384  }
   0x7   : > { %170 = sbr.rel (%p167_p3) target bundleno = 332 (0x14c), region = 28  ;;  %p205_p4 = scmp.lt.s32.totalorder (!%p167_p3), %s990_s18, 63  ;;  %1204 = vmatprep.subr.bf16.mxu0 (!%p167_p3), %v1292_v0  ;;  %1252 = vmatprep.subr.bf16.mxu1 (!%p167_p3), %v1292_v0  ;;  %v1295_v3 = vld [vmem:[%s1553_s1 + $0x18] sm:$0xff] (!%p167_p3)   ;;  %v1296_v5 = vld [vmem:[%s1553_s1 + $0x20] sm:$0xff] (!%p167_p3)   ;;  %v1297_v6 = vld [vmem:[%s1553_s1 + $0x28] sm:$0xff] (!%p167_p3)  }
   0x8   : > { %1205 = vmatpush3.bf16.msra.mxu0 (!%p167_p3), %v1292_v0  ;;  %1260 = vmatpush3.bf16.msra.mxu1 (!%p167_p3), %v1292_v0  ;;  %v1298_v8 = vld [vmem:[%s1553_s1 + $0x30] sm:$0xff] (!%p167_p3)   ;;  %v1299_v9 = vld [vmem:[%s1553_s1 + $0x38] sm:$0xff] (!%p167_p3)  }
   0x9   : > { %1206 = vmatprep.subr.bf16.mxu0 (!%p167_p3), %v1293_v1  ;;  %1253 = vmatprep.subr.bf16.mxu1 (!%p167_p3), %v1293_v1 }
   0xc   : > { %1207 = vmatpush3.bf16.msra.mxu0 (!%p167_p3), %v1293_v1  ;;  %1261 = vmatpush3.bf16.msra.mxu1 (!%p167_p3), %v1293_v1 }
   0xd   : > { %1208 = vmatprep.subr.bf16.mxu0 (!%p167_p3), %v1294_v2  ;;  %1254 = vmatprep.subr.bf16.mxu1 (!%p167_p3), %v1294_v2 }
   0xe   : > { %s1561_s18 = smov (!%p205_p4, %s990_s18), 63  ;;  %s1563_s12 = smov (!%p223_p5, %s1330_s12), 1 }
   0xf   : > { %s991_s23 = sshll.u32 %s1561_s18, 2  ;;  %s994_s17 = sshll.u32 %s1563_s12, 1 }
  0x10   : > { %s1398_s26 = scalar_lea.vmem %s1552_s0, %s991_s23  ;;  %1209 = vmatpush3.bf16.msra.mxu0 %v1294_v2  ;;  %1262 = vmatpush3.bf16.msra.mxu1 %v1294_v2  ;;  %s1440_s16 = scalar_lea.vmem %s1554_s2, %s991_s23 }
  0x11   : > { %v1300_v4 = vld [vmem:[%s1398_s26] sm:$0xff]   ;;  %1210 = vmatprep.subr.bf16.mxu0 %v1295_v3  ;;  %1255 = vmatprep.subr.bf16.mxu1 %v1295_v3  ;;  %v1301_v10 = vld [vmem:[%s1398_s26 + $0x8] sm:$0xff]   ;;  %v1302_v12 = vld [vmem:[%s1398_s26 + $0x10] sm:$0xff]   ;;  %s229_s20 = scalar_lea.vmem %s1555_s3, %s994_s17 }
  0x12   : > { %1220 = vmatprep.mubr.bf16.mxu0 %v1300_v4  ;;  %v1308_v7 = vld [vmem:[%s1398_s26 + $0x40] sm:$0xff]   ;;  %v1309_v11 = vld [vmem:[%s1398_s26 + $0x48] sm:$0xff]   ;;  %v1310_v13 = vld [vmem:[%s1398_s26 + $0x50] sm:$0xff]  }
  0x13   : > { %1236 = vmatprep.mubr.bf16.mxu1 %v1308_v7  ;;  %v1303_v14 = vld [vmem:[%s1398_s26 + $0x18] sm:$0xff]   ;;  %v1304_v16 = vld [vmem:[%s1398_s26 + $0x20] sm:$0xff]   ;;  %v1305_v18 = vld [vmem:[%s1398_s26 + $0x28] sm:$0xff]  }
  0x14   : > { %1211 = vmatpush3.bf16.msra.mxu0 %v1295_v3  ;;  %1263 = vmatpush3.bf16.msra.mxu1 %v1295_v3  ;;  %v1311_v15 = vld [vmem:[%s1398_s26 + $0x58] sm:$0xff]   ;;  %v1312_v17 = vld [vmem:[%s1398_s26 + $0x60] sm:$0xff]   ;;  %v1313_v19 = vld [vmem:[%s1398_s26 + $0x68] sm:$0xff]  }
  0x15   : > { %1212 = vmatprep.subr.bf16.mxu0 %v1296_v5  ;;  %1256 = vmatprep.subr.bf16.mxu1 %v1296_v5  ;;  %v1306_v20 = vld [vmem:[%s1398_s26 + $0x30] sm:$0xff]   ;;  %v1307_v22 = vld [vmem:[%s1398_s26 + $0x38] sm:$0xff]  }
  0x16   : > { %v1314_v21 = vld [vmem:[%s1398_s26 + $0x70] sm:$0xff]   ;;  %v1315_v23 = vld [vmem:[%s1398_s26 + $0x78] sm:$0xff]  }
  0x18   : > { %1213 = vmatpush3.bf16.msra.mxu0 %v1296_v5  ;;  %1264 = vmatpush3.bf16.msra.mxu1 %v1296_v5 }
  0x19   : > { %1214 = vmatprep.subr.bf16.mxu0 %v1297_v6  ;;  %1257 = vmatprep.subr.bf16.mxu1 %v1297_v6 }
  0x1c   : > { %1215 = vmatpush3.bf16.msra.mxu0 %v1297_v6  ;;  %1265 = vmatpush3.bf16.msra.mxu1 %v1297_v6 }
  0x1d   : > { %1216 = vmatprep.subr.bf16.mxu0 %v1298_v8  ;;  %1258 = vmatprep.subr.bf16.mxu1 %v1298_v8 }
  0x20   : > { %1217 = vmatpush3.bf16.msra.mxu0 %v1298_v8  ;;  %1266 = vmatpush3.bf16.msra.mxu1 %v1298_v8 }
  0x21   : > { %1218 = vmatprep.subr.bf16.mxu0 %v1299_v9  ;;  %1259 = vmatprep.subr.bf16.mxu1 %v1299_v9 }
  0x24   : > { %1219 = vmatpush3.bf16.msra.mxu0 %v1299_v9  ;;  %1267 = vmatpush3.bf16.msra.mxu1 %v1299_v9 }
  0x27   : > { %1221 = vmatmul.mubr.bf16.vlgmr.msra.gmra.mrb[0].mxu0 %v1301_v10  ;;  %1237 = vmatmul.mubr.bf16.vlgmr.msra.gmra.mrb[0].mxu1 %v1309_v11 }
  0x28   : > { %1224 = vmatprep.mubr.bf16.mxu0 %v1302_v12  ;;  %1240 = vmatprep.mubr.bf16.mxu1 %v1310_v13 }
  0x2f   : > { %1225 = vmatmul.mubr.bf16.gmra.mrb[4].mxu0 %v1303_v14  ;;  %1241 = vmatmul.mubr.bf16.gmra.mrb[4].mxu1 %v1311_v15 }
  0x30   : > { %1228 = vmatprep.mubr.bf16.mxu0 %v1304_v16  ;;  %1244 = vmatprep.mubr.bf16.mxu1 %v1312_v17 }
  0x37   : > { %1229 = vmatmul.mubr.bf16.gmra.mrb[8].mxu0 %v1305_v18  ;;  %1245 = vmatmul.mubr.bf16.gmra.mrb[8].mxu1 %v1313_v19 }
  0x38   : > { %1232 = vmatprep.mubr.bf16.mxu0 %v1306_v20  ;;  %1248 = vmatprep.mubr.bf16.mxu1 %v1314_v21 }
  0x3f   : > { %1233 = vmatmul.mubr.bf16.gmra.mrb[12].mxu0 %v1307_v22  ;;  %1249 = vmatmul.mubr.bf16.gmra.mrb[12].mxu1 %v1315_v23 }
  0xfa   : > { %v1222_v24 = vpop.f32.mrb[0].mxu0  ;;  %v1431_v25 = vpop.f32.mrb[0].mxu1 }
  0xfb   : > { %v457_v26 = vpop.f32.mrb[1].mxu0  ;;  %v1433_v27 = vpop.f32.mrb[1].mxu1  ;;  %v783_v39 = vmul.f32 %v1222_v24, %v1222_v24 }
  0xfc   : > { %v1223_v28 = vpop.f32.mrb[2].mxu0  ;;  %v1442_v29 = vpop.f32.mrb[2].mxu1  ;;  %v781_v30 = vmul.f32 %v457_v26, %v457_v26 }
  0xfd   : > { %v1093_v31 = vpack.c.bf16 %v1223_v28, %v1222_v24  ;;  %v460_v32 = vpop.f32.mrb[3].mxu0  ;;  %v1133_v33 = vpack.c.bf16 %v1442_v29, %v1431_v25  ;;  %v1446_v34 = vpop.f32.mrb[3].mxu1  ;;  %v784_v42 = vmul.f32 %v1223_v28, %v1223_v28 }
  0xfe   : > { %v1088_v35 = vpack.c.bf16 %v460_v32, %v457_v26  ;;  %v744_v36 = vadd.f32 %v460_v32, %v457_v26  ;;  %v782_v37 = vmul.f32 %v460_v32, %v460_v32  ;;  %v1128_v38 = vpack.c.bf16 %v1446_v34, %v1433_v27 }
  0xff   : > { %1165 = vst [vmem:[%s1440_s16 + $0x8] sm:$0xff] %v1093_v31   ;;  %1173 = vst [vmem:[%s1440_s16 + $0x48] sm:$0xff] %v1133_v33  }
 0x100   : > { %1089 = vst [vmem:[%s1440_s16] sm:$0xff] %v1088_v35   ;;  %v745_v40 = vadd.f32 %v1222_v24, %v744_v36  ;;  %v813_v41 = vadd.f32 %v782_v37, %v781_v30  ;;  %1172 = vst [vmem:[%s1440_s16 + $0x40] sm:$0xff] %v1128_v38  }
 0x102   : > { %v814_v43 = vadd.f32 %v813_v41, %v783_v39  ;;  %v1226_v44 = vpop.f32.mrb[4].mxu0  ;;  %v746_v45 = vadd.f32 %v1223_v28, %v745_v40  ;;  %v1454_v46 = vpop.f32.mrb[4].mxu1 }
 0x103   : > { %v473_v47 = vpop.f32.mrb[5].mxu0  ;;  %v1456_v48 = vpop.f32.mrb[5].mxu1  ;;  %v787_v63 = vmul.f32 %v1226_v44, %v1226_v44 }
 0x104   : > { %v747_v49 = vadd.f32 %v746_v45, %v473_v47  ;;  %v785_v50 = vmul.f32 %v473_v47, %v473_v47  ;;  %v815_v51 = vadd.f32 %v814_v43, %v784_v42  ;;  %v1227_v52 = vpop.f32.mrb[6].mxu0  ;;  %v1458_v53 = vpop.f32.mrb[6].mxu1 }
 0x105   : > { %v1103_v54 = vpack.c.bf16 %v1227_v52, %v1226_v44  ;;  %v476_v55 = vpop.f32.mrb[7].mxu0  ;;  %v1143_v56 = vpack.c.bf16 %v1458_v53, %v1454_v46  ;;  %v1462_v57 = vpop.f32.mrb[7].mxu1  ;;  %v788_v2 = vmul.f32 %v1227_v52, %v1227_v52 }
 0x106   : > { %v816_v58 = vadd.f32 %v815_v51, %v785_v50  ;;  %v1098_v59 = vpack.c.bf16 %v476_v55, %v473_v47  ;;  %v748_v60 = vadd.f32 %v747_v49, %v476_v55  ;;  %v786_v61 = vmul.f32 %v476_v55, %v476_v55 }
 0x107   : > { %1167 = vst [vmem:[%s1440_s16 + $0x18] sm:$0xff] %v1103_v54   ;;  %1175 = vst [vmem:[%s1440_s16 + $0x58] sm:$0xff] %v1143_v56   ;;  %v1138_v62 = vpack.c.bf16 %v1462_v57, %v1456_v48 }
 0x108   : > { %1166 = vst [vmem:[%s1440_s16 + $0x10] sm:$0xff] %v1098_v59   ;;  %v749_v0 = vadd.f32 %v1226_v44, %v748_v60  ;;  %v817_v1 = vadd.f32 %v816_v58, %v786_v61  ;;  %v797_v61 = vmul.f32 %v1433_v27, %v1433_v27 }
 0x109   : > { %1174 = vst [vmem:[%s1440_s16 + $0x50] sm:$0xff] %v1138_v62  }
 0x10a   : > { %v818_v3 = vadd.f32 %v817_v1, %v787_v63  ;;  %v1230_v4 = vpop.f32.mrb[8].mxu0  ;;  %v750_v5 = vadd.f32 %v1227_v52, %v749_v0  ;;  %v1470_v6 = vpop.f32.mrb[8].mxu1 }
 0x10b   : > { %v489_v7 = vpop.f32.mrb[9].mxu0  ;;  %v1472_v8 = vpop.f32.mrb[9].mxu1  ;;  %v791_v23 = vmul.f32 %v1230_v4, %v1230_v4 }
 0x10c   : > { %v751_v9 = vadd.f32 %v750_v5, %v489_v7  ;;  %v789_v10 = vmul.f32 %v489_v7, %v489_v7  ;;  %v819_v11 = vadd.f32 %v818_v3, %v788_v2  ;;  %v1231_v12 = vpop.f32.mrb[10].mxu0  ;;  %v1474_v13 = vpop.f32.mrb[10].mxu1  ;;  %v798_v2 = vmul.f32 %v1446_v34, %v1446_v34 }
 0x10d   : > { %v1113_v14 = vpack.c.bf16 %v1231_v12, %v1230_v4  ;;  %v492_v15 = vpop.f32.mrb[11].mxu0  ;;  %v1153_v16 = vpack.c.bf16 %v1474_v13, %v1470_v6  ;;  %v1478_v17 = vpop.f32.mrb[11].mxu1  ;;  %v792_v28 = vmul.f32 %v1231_v12, %v1231_v12  ;;  %v799_v3 = vmul.f32 %v1431_v25, %v1431_v25 }
 0x10e   : > { %v820_v18 = vadd.f32 %v819_v11, %v789_v10  ;;  %v1108_v19 = vpack.c.bf16 %v492_v15, %v489_v7  ;;  %v752_v20 = vadd.f32 %v751_v9, %v492_v15  ;;  %v790_v21 = vmul.f32 %v492_v15, %v492_v15 }
 0x10f   : > { %1169 = vst [vmem:[%s1440_s16 + $0x28] sm:$0xff] %v1113_v14   ;;  %1177 = vst [vmem:[%s1440_s16 + $0x68] sm:$0xff] %v1153_v16   ;;  %v1148_v22 = vpack.c.bf16 %v1478_v17, %v1472_v8  ;;  %v800_v7 = vmul.f32 %v1442_v29, %v1442_v29  ;;  %v802_v15 = vmul.f32 %v1462_v57, %v1462_v57 }
 0x110   : > { %1168 = vst [vmem:[%s1440_s16 + $0x20] sm:$0xff] %v1108_v19   ;;  %v753_v24 = vadd.f32 %v1230_v4, %v752_v20  ;;  %v821_v26 = vadd.f32 %v820_v18, %v790_v21 }
 0x111   : > { %1176 = vst [vmem:[%s1440_s16 + $0x60] sm:$0xff] %v1148_v22  }
 0x112   : > { %v822_v30 = vadd.f32 %v821_v26, %v791_v23  ;;  %v1234_v31 = vpop.f32.mrb[12].mxu0  ;;  %v754_v32 = vadd.f32 %v1231_v12, %v753_v24  ;;  %v1486_v33 = vpop.f32.mrb[12].mxu1  ;;  %v806_v24 = vmul.f32 %v1478_v17, %v1478_v17 }
 0x113   : > { %v505_v35 = vpop.f32.mrb[13].mxu0  ;;  %v569_v36 = vpop.f32.mrb[13].mxu1  ;;  %v795_v54 = vmul.f32 %v1234_v31, %v1234_v31 }
 0x114   : > { %v755_v37 = vadd.f32 %v754_v32, %v505_v35  ;;  %v793_v38 = vmul.f32 %v505_v35, %v505_v35  ;;  %v823_v39 = vadd.f32 %v822_v30, %v792_v28  ;;  %v1235_v40 = vpop.f32.mrb[14].mxu0  ;;  %v1488_v41 = vpop.f32.mrb[14].mxu1 }
 0x115   : > { %v1123_v42 = vpack.c.bf16 %v1235_v40, %v1234_v31  ;;  %v508_v43 = vpop.f32.mrb[15].mxu0  ;;  %v1163_v44 = vpack.c.bf16 %v1488_v41, %v1486_v33  ;;  %v572_v45 = vpop.f32.mrb[15].mxu1  ;;  %v796_v58 = vmul.f32 %v1235_v40, %v1235_v40 }
 0x116   : > { %v824_v47 = vadd.f32 %v823_v39, %v793_v38  ;;  %v1118_v49 = vpack.c.bf16 %v508_v43, %v505_v35  ;;  %v756_v50 = vadd.f32 %v755_v37, %v508_v43  ;;  %v794_v51 = vmul.f32 %v508_v43, %v508_v43 }
 0x117   : > { %1171 = vst [vmem:[%s1440_s16 + $0x38] sm:$0xff] %v1123_v42   ;;  %1179 = vst [vmem:[%s1440_s16 + $0x78] sm:$0xff] %v1163_v44   ;;  %v1158_v52 = vpack.c.bf16 %v572_v45, %v569_v36  ;;  %v811_v39 = vmul.f32 %v1486_v33, %v1486_v33  ;;  %v812_v42 = vmul.f32 %v1488_v41, %v1488_v41 }
 0x118   : > { %1170 = vst [vmem:[%s1440_s16 + $0x30] sm:$0xff] %v1118_v49   ;;  %v757_v55 = vadd.f32 %v1234_v31, %v756_v50  ;;  %v825_v56 = vadd.f32 %v824_v47, %v794_v51  ;;  %v809_v31 = vmul.f32 %v569_v36, %v569_v36 }
 0x119   : > { %1178 = vst [vmem:[%s1440_s16 + $0x70] sm:$0xff] %v1158_v52  }
 0x11a   : > { %v826_v59 = vadd.f32 %v825_v56, %v795_v54  ;;  %v758_v60 = vadd.f32 %v1235_v40, %v757_v55 }
 0x11c   : > { %v759_v62 = vadd.f32 %v758_v60, %v1433_v27  ;;  %v827_v63 = vadd.f32 %v826_v59, %v796_v58  ;;  %v801_v27 = vmul.f32 %v1456_v48, %v1456_v48 }
 0x11e   : > { %v828_v0 = vadd.f32 %v827_v63, %v797_v61  ;;  %v760_v1 = vadd.f32 %v759_v62, %v1446_v34 }
 0x120   : > { %v761_v4 = vadd.f32 %v1431_v25, %v760_v1  ;;  %v829_v5 = vadd.f32 %v828_v0, %v798_v2  ;;  %v803_v25 = vmul.f32 %v1454_v46, %v1454_v46 }
 0x122   : > { %v830_v9 = vadd.f32 %v829_v5, %v799_v3  ;;  %v762_v10 = vadd.f32 %v1442_v29, %v761_v4  ;;  %v804_v29 = vmul.f32 %v1458_v53, %v1458_v53 }
 0x124   : > { %v763_v11 = vadd.f32 %v762_v10, %v1456_v48  ;;  %v831_v12 = vadd.f32 %v830_v9, %v800_v7  ;;  %v805_v48 = vmul.f32 %v1472_v8, %v1472_v8 }
 0x126   : > { %v832_v14 = vadd.f32 %v831_v12, %v801_v27  ;;  %v764_v34 = vadd.f32 %v763_v11, %v1462_v57 }
 0x128   : > { %v765_v16 = vadd.f32 %v1454_v46, %v764_v34  ;;  %v833_v18 = vadd.f32 %v832_v14, %v802_v15  ;;  %v807_v46 = vmul.f32 %v1470_v6, %v1470_v6 }
 0x12a   : > { %v834_v19 = vadd.f32 %v833_v18, %v803_v25  ;;  %v766_v20 = vadd.f32 %v1458_v53, %v765_v16  ;;  %v808_v53 = vmul.f32 %v1474_v13, %v1474_v13 }
 0x12c   : > { %v767_v21 = vadd.f32 %v766_v20, %v1472_v8  ;;  %v835_v22 = vadd.f32 %v834_v19, %v804_v29 }
 0x12e   : > { %v836_v23 = vadd.f32 %v835_v22, %v805_v48  ;;  %v768_v57 = vadd.f32 %v767_v21, %v1478_v17  ;;  %v810_v17 = vmul.f32 %v572_v45, %v572_v45 }
 0x130   : > { %v769_v26 = vadd.f32 %v1470_v6, %v768_v57  ;;  %v837_v28 = vadd.f32 %v836_v23, %v806_v24 }
 0x132   : > { %v838_v30 = vadd.f32 %v837_v28, %v807_v46  ;;  %v770_v8 = vadd.f32 %v1474_v13, %v769_v26 }
 0x134   : > { %v771_v32 = vadd.f32 %v770_v8, %v569_v36  ;;  %v839_v35 = vadd.f32 %v838_v30, %v808_v53 }
 0x136   : > { %v840_v37 = vadd.f32 %v839_v35, %v809_v31  ;;  %v772_v38 = vadd.f32 %v771_v32, %v572_v45 }
 0x138   : > { %v773_v6 = vadd.f32 %v1486_v33, %v772_v38  ;;  %v841_v40 = vadd.f32 %v840_v37, %v810_v17 }
 0x13a   : > { %v774_v43 = vadd.f32 %v1488_v41, %v773_v6  ;;  %v842_v44 = vadd.f32 %v841_v40, %v811_v39 }
 0x13c   : > { %v775_v13 = vrot.slane %v774_v43, 4  ;;  %v843_v47 = vadd.f32 %v842_v44, %v812_v42 }
 0x13e   : > { %v776_v36 = vadd.f32 %v775_v13, %v774_v43  ;;  %v844_v49 = vrot.slane %v843_v47, 4 }
 0x140   : > { %v777_v50 = vrot.slane %v776_v36, 2  ;;  %v845_v51 = vadd.f32 %v844_v49, %v843_v47 }
 0x142   : > { %v778_v45 = vadd.f32 %v777_v50, %v776_v36  ;;  %v846_v52 = vrot.slane %v845_v51, 2 }
 0x144   : > { %v779_v54 = vrot.slane %v778_v45, 1  ;;  %v847_v55 = vadd.f32 %v846_v52, %v845_v51 }
 0x146   : > { %v848_v33 = vrot.slane %v847_v55, 1  ;;  %v780_v41 = vadd.f32 %v779_v54, %v778_v45 }
 0x148   : > { %v849_v56 = vadd.f32 %v848_v33, %v847_v55 }
 0x14a   : > { %v851_v58 = vsel %vm850_vm0, %v780_v41, %v849_v56 }
 0x14b   : > { %852 = vst [vmem:[%s229_s20] sm:$0x3] %v851_v58 }
 0x14c PF: > { %s14_s14 = sadd.s32 1, %s1338_s14   ;;  %s1556_s12 = smov %s1334_s13 }
 0x14d   : > { %p11_p6 = scmp.ge.s32.totalorder %s14_s14, 4   ;;  %s1557_s13 = smov %s1559_s15 }
 0x14f   :  { %13 = sbr.rel (!%p11_p6) target bundleno = 2 (0x2), region = 73 }

// kernel: _lambda_.6
= control target key start
LH: loop header
LB: loop body
LE: loop exit
PB: predicated region body
PF: predicated region fallthrough
CT: control target
= control target key end

     0   :  { %s865_s12 = smov 0   ;;  %s1059_s0 = inlined_call_operand.vmem [shape: bf16[512,128], index: 0, kind: input, shape index: {}]   ;;  %s1060_s1 = inlined_call_operand.vmem [shape: f32[2,128], index: 1, kind: input, shape index: {}]   ;;  %s1061_s2 = inlined_call_operand.vmem [shape: f32[2,128], index: 2, kind: input, shape index: {}]   ;;  %s1062_s3 = inlined_call_operand.vmem [shape: bf16[512,128], index: 3, kind: output, shape index: {}]  }
   0x1 LB: > { %s578_s13 = sadd.s32 4294967295, %s843_s12   ;;  %p582_p0 = scmp.ge.s32.totalorder %s843_s12, 1  ;;  %s843_s12 = sphi %s865_s12, %s13_s12  }
   0x2   : > { %p138_p1 = scmp.lt.s32.totalorder %s843_s12, 3 }
   0x4   : > { %p139_p2 = pnand %p582_p0, %p138_p1 }
   0x5   : > { %v174_v0 = vld [vmem:[%s1060_s1] sm:$0x3] (!%p139_p2)  ;;  %s583_s16 = sshll.u32 (!%p139_p2), %s578_s13, 5  ;;  %v258_v7 = vlaneseq (!%p139_p2) }
   0x6   : > { %142 = sbr.rel (%p139_p2) target bundleno = 69 (0x45), region = 32  ;;  %v176_v1 = vmul.f32 (!%p139_p2), 0.001953125, %v174_v0  ;;  %p163_p3 = scmp.lt.s32.totalorder (!%p139_p2), %s583_s16, 63  ;;  %v175_v30 = vld [vmem:[%s1061_s2] sm:$0x3] (!%p139_p2) }
   0x7   : > { %v886_v8 = vshrl.u32 (!%p139_p2), %v258_v7, 7 }
   0x8   : > { %v177_v2 = vmul.f32 (!%p139_p2), %v176_v1, %v176_v1 }
   0x9   : > { %v260_v13 = vsub.s32 (!%p139_p2), 0, %v886_v8  ;;  %v296_v14 = vsub.s32 (!%p139_p2), 1, %v886_v8 }
   0xa   : > { %v179_v3 = vrot.slane (!%p139_p2), %v177_v2, 7 }
   0xc   : > { %v181_v4 = vsub.f32 (!%p139_p2), %v176_v1, %v179_v3 }
   0xd   : > { %s1064_s16 = smov (!%p163_p3, %s583_s16), 63 }
   0xe   : > { %v182_v5 = vmax.f32 %v181_v4, 0.0  ;;  %s584_s17 = sshll.u32 %s1064_s16, 2 }
   0xf   : > { %s884_s20 = scalar_lea.vmem %s1059_s0, %s584_s17  ;;  %s981_s25 = scalar_lea.vmem %s1062_s3, %s584_s17 }
  0x10   : > { %v183_v6 = vadd.f32 1e-05, %v182_v5  ;;  %v654_v9 = vld [vmem:[%s884_s20] sm:$0xff]   ;;  %v797_v10 = vld [vmem:[%s884_s20 + $0x8] sm:$0xff]   ;;  %v798_v11 = vld [vmem:[%s884_s20 + $0x10] sm:$0xff]  }
  0x11   : > { %v892_v12 = vld [vmem:[%s884_s20 + $0x18] sm:$0xff]   ;;  %v800_v15 = vld [vmem:[%s884_s20 + $0x20] sm:$0xff]   ;;  %v898_v16 = vld [vmem:[%s884_s20 + $0x28] sm:$0xff]   ;;  %v655_v17 = vunpack.c.l.bf16 %v654_v9  ;;  %v656_v18 = vunpack.c.h.bf16 %v654_v9  ;;  %v659_v19 = vunpack.c.l.bf16 %v797_v10  ;;  %v660_v20 = vunpack.c.h.bf16 %v797_v10 }
  0x12   : > { %835 = vrsqrt.f32 %v183_v6  ;;  %v802_v21 = vld [vmem:[%s884_s20 + $0x30] sm:$0xff]   ;;  %v803_v22 = vld [vmem:[%s884_s20 + $0x38] sm:$0xff]   ;;  %v663_v23 = vunpack.c.l.bf16 %v798_v11  ;;  %v664_v24 = vunpack.c.h.bf16 %v798_v11  ;;  %v667_v25 = vunpack.c.l.bf16 %v892_v12  ;;  %v804_v27 = vld [vmem:[%s884_s20 + $0x40] sm:$0xff]  }
  0x13   : > { %v668_v26 = vunpack.c.h.bf16 %v892_v12  ;;  %v805_v28 = vld [vmem:[%s884_s20 + $0x48] sm:$0xff]   ;;  %v671_v31 = vunpack.c.l.bf16 %v800_v15  ;;  %v672_v32 = vunpack.c.h.bf16 %v800_v15  ;;  %v675_v33 = vunpack.c.l.bf16 %v898_v16  ;;  %v912_v35 = vld [vmem:[%s884_s20 + $0x50] sm:$0xff]   ;;  %v915_v40 = vld [vmem:[%s884_s20 + $0x58] sm:$0xff]  }
  0x14   : > { %v676_v34 = vunpack.c.h.bf16 %v898_v16  ;;  %v679_v37 = vunpack.c.l.bf16 %v802_v21  ;;  %v680_v38 = vunpack.c.h.bf16 %v802_v21  ;;  %v683_v39 = vunpack.c.l.bf16 %v803_v22  ;;  %v918_v41 = vld [vmem:[%s884_s20 + $0x60] sm:$0xff]   ;;  %v921_v46 = vld [vmem:[%s884_s20 + $0x68] sm:$0xff]   ;;  %v926_v51 = vld [vmem:[%s884_s20 + $0x70] sm:$0xff]  }
  0x15   : > { %v684_v42 = vunpack.c.h.bf16 %v803_v22  ;;  %v687_v43 = vunpack.c.l.bf16 %v804_v27  ;;  %v688_v44 = vunpack.c.h.bf16 %v804_v27  ;;  %v691_v45 = vunpack.c.l.bf16 %v805_v28  ;;  %v929_v52 = vld [vmem:[%s884_s20 + $0x78] sm:$0xff]  }
  0x16   : > { %v692_v48 = vunpack.c.h.bf16 %v805_v28  ;;  %v695_v49 = vunpack.c.l.bf16 %v912_v35  ;;  %v696_v50 = vunpack.c.h.bf16 %v912_v35  ;;  %v699_v53 = vunpack.c.l.bf16 %v915_v40 }
  0x17   : > { %v700_v54 = vunpack.c.h.bf16 %v915_v40  ;;  %v703_v55 = vunpack.c.l.bf16 %v918_v41  ;;  %v704_v56 = vunpack.c.h.bf16 %v918_v41  ;;  %v707_v59 = vunpack.c.l.bf16 %v921_v46 }
  0x18   : > { %v708_v60 = vunpack.c.h.bf16 %v921_v46  ;;  %v711_v61 = vunpack.c.l.bf16 %v926_v51  ;;  %v712_v62 = vunpack.c.h.bf16 %v926_v51  ;;  %v715_v63 = vunpack.c.l.bf16 %v929_v52 }
  0x19   : > { %v716_v0 = vunpack.c.h.bf16 %v929_v52 }
  0x1c   : > { %v836_v29 = vpop.eup %835 }
  0x1d   : > { %v186_v36 = vrot.slane %v836_v29, 1 }
  0x1f   : > { %v188_v47 = vmul.f32 %v186_v36, %v175_v30 }
  0x21   : > { %v189_v57 = vmul.f32 %v188_v47, %v176_v1  ;;  %v935_v58 = vrot.slane %v188_v47, %v260_v13 }
  0x23   : > { %v191_v2 = vrot.slane %v189_v57, 7  ;;  %v262_v3 = vmul.f32 %v655_v17, %v935_v58  ;;  %v263_v4 = vmul.f32 %v656_v18, %v935_v58  ;;  %v264_v1 = vmul.f32 %v659_v19, %v935_v58 }
  0x24   : > { %v265_v5 = vmul.f32 %v660_v20, %v935_v58  ;;  %v266_v6 = vmul.f32 %v663_v23, %v935_v58  ;;  %v267_v7 = vmul.f32 %v664_v24, %v935_v58  ;;  %v268_v9 = vmul.f32 %v667_v25, %v935_v58 }
  0x25   : > { %v193_v10 = vsub.f32 %v175_v30, %v191_v2  ;;  %v269_v11 = vmul.f32 %v668_v26, %v935_v58  ;;  %v270_v12 = vmul.f32 %v671_v31, %v935_v58  ;;  %v271_v13 = vmul.f32 %v672_v32, %v935_v58 }
  0x26   : > { %v272_v15 = vmul.f32 %v675_v33, %v935_v58  ;;  %v273_v16 = vmul.f32 %v676_v34, %v935_v58  ;;  %v274_v17 = vmul.f32 %v679_v37, %v935_v58  ;;  %v275_v18 = vmul.f32 %v680_v38, %v935_v58 }
  0x27   : > { %v959_v19 = vrot.slane %v193_v10, %v296_v14  ;;  %v276_v20 = vmul.f32 %v683_v39, %v935_v58  ;;  %v277_v21 = vmul.f32 %v684_v42, %v935_v58  ;;  %v278_v22 = vmul.f32 %v687_v43, %v935_v58 }
  0x28   : > { %v279_v23 = vmul.f32 %v688_v44, %v935_v58  ;;  %v280_v24 = vmul.f32 %v691_v45, %v935_v58  ;;  %v281_v25 = vmul.f32 %v692_v48, %v935_v58  ;;  %v282_v26 = vmul.f32 %v695_v49, %v935_v58 }
  0x29   : > { %v298_v27 = vadd.f32 %v959_v19, %v262_v3  ;;  %v299_v8 = vadd.f32 %v959_v19, %v263_v4  ;;  %v300_v14 = vadd.f32 %v959_v19, %v264_v1  ;;  %v301_v28 = vadd.f32 %v959_v19, %v265_v5 }
  0x2a   : > { %v302_v29 = vadd.f32 %v959_v19, %v266_v6  ;;  %v303_v30 = vadd.f32 %v959_v19, %v267_v7  ;;  %v304_v31 = vadd.f32 %v959_v19, %v268_v9  ;;  %v305_v32 = vadd.f32 %v959_v19, %v269_v11 }
  0x2b   : > { %v330_v33 = vmax.f32 %v298_v27, 0.0  ;;  %v331_v34 = vmax.f32 %v299_v8, 0.0  ;;  %v332_v36 = vmax.f32 %v300_v14, 0.0  ;;  %v333_v37 = vmax.f32 %v301_v28, 0.0 }
  0x2c   : > { %v334_v38 = vmax.f32 %v302_v29, 0.0  ;;  %v335_v39 = vmax.f32 %v303_v30, 0.0  ;;  %v336_v42 = vmax.f32 %v304_v31, 0.0  ;;  %v337_v43 = vmax.f32 %v305_v32, 0.0 }
  0x2d   : > { %v720_v44 = vpack.c.bf16 %v331_v34, %v330_v33  ;;  %v725_v45 = vpack.c.bf16 %v333_v37, %v332_v36  ;;  %v306_v47 = vadd.f32 %v959_v19, %v270_v12  ;;  %v307_v48 = vadd.f32 %v959_v19, %v271_v13 }
  0x2e   : > { %v730_v49 = vpack.c.bf16 %v335_v39, %v334_v38  ;;  %v735_v57 = vpack.c.bf16 %v337_v43, %v336_v42  ;;  %v308_v2 = vadd.f32 %v959_v19, %v272_v15  ;;  %v309_v3 = vadd.f32 %v959_v19, %v273_v16 }
  0x2f   : > { %721 = vst [vmem:[%s981_s25] sm:$0xff] %v720_v44   ;;  %812 = vst [vmem:[%s981_s25 + $0x8] sm:$0xff] %v725_v45   ;;  %v338_v4 = vmax.f32 %v306_v47, 0.0  ;;  %v339_v1 = vmax.f32 %v307_v48, 0.0  ;;  %v310_v5 = vadd.f32 %v959_v19, %v274_v17  ;;  %v311_v6 = vadd.f32 %v959_v19, %v275_v18 }
  0x30   : > { %813 = vst [vmem:[%s981_s25 + $0x10] sm:$0xff] %v730_v49   ;;  %814 = vst [vmem:[%s981_s25 + $0x18] sm:$0xff] %v735_v57   ;;  %v340_v7 = vmax.f32 %v308_v2, 0.0  ;;  %v341_v9 = vmax.f32 %v309_v3, 0.0  ;;  %v312_v10 = vadd.f32 %v959_v19, %v276_v20  ;;  %v313_v11 = vadd.f32 %v959_v19, %v277_v21 }
  0x31   : > { %v740_v12 = vpack.c.bf16 %v339_v1, %v338_v4  ;;  %v342_v13 = vmax.f32 %v310_v5, 0.0  ;;  %v343_v15 = vmax.f32 %v311_v6, 0.0  ;;  %v314_v16 = vadd.f32 %v959_v19, %v278_v22 }
  0x32   : > { %v745_v27 = vpack.c.bf16 %v341_v9, %v340_v7  ;;  %v344_v17 = vmax.f32 %v312_v10, 0.0  ;;  %v345_v8 = vmax.f32 %v313_v11, 0.0  ;;  %v315_v18 = vadd.f32 %v959_v19, %v279_v23 }
  0x33   : > { %815 = vst [vmem:[%s981_s25 + $0x20] sm:$0xff] %v740_v12   ;;  %v750_v14 = vpack.c.bf16 %v343_v15, %v342_v13  ;;  %v346_v28 = vmax.f32 %v314_v16, 0.0  ;;  %v316_v29 = vadd.f32 %v959_v19, %v280_v24  ;;  %v317_v20 = vadd.f32 %v959_v19, %v281_v25 }
  0x34   : > { %816 = vst [vmem:[%s981_s25 + $0x28] sm:$0xff] %v745_v27   ;;  %v755_v21 = vpack.c.bf16 %v345_v8, %v344_v17  ;;  %v347_v30 = vmax.f32 %v315_v18, 0.0  ;;  %v283_v22 = vmul.f32 %v696_v50, %v935_v58  ;;  %v318_v31 = vadd.f32 %v959_v19, %v282_v26 }
  0x35   : > { %817 = vst [vmem:[%s981_s25 + $0x30] sm:$0xff] %v750_v14   ;;  %v348_v23 = vmax.f32 %v316_v29, 0.0  ;;  %v349_v32 = vmax.f32 %v317_v20, 0.0  ;;  %v284_v33 = vmul.f32 %v699_v53, %v935_v58  ;;  %v285_v24 = vmul.f32 %v700_v54, %v935_v58 }
  0x36   : > { %818 = vst [vmem:[%s981_s25 + $0x38] sm:$0xff] %v755_v21   ;;  %v760_v25 = vpack.c.bf16 %v347_v30, %v346_v28  ;;  %v319_v35 = vadd.f32 %v959_v19, %v283_v22  ;;  %v350_v50 = vmax.f32 %v318_v31, 0.0  ;;  %v286_v26 = vmul.f32 %v703_v55, %v935_v58 }
  0x37   : > { %v765_v34 = vpack.c.bf16 %v349_v32, %v348_v23  ;;  %v320_v36 = vadd.f32 %v959_v19, %v284_v33  ;;  %v321_v37 = vadd.f32 %v959_v19, %v285_v24  ;;  %v287_v40 = vmul.f32 %v704_v56, %v935_v58 }
  0x38   : > { %819 = vst [vmem:[%s981_s25 + $0x40] sm:$0xff] %v760_v25   ;;  %v351_v53 = vmax.f32 %v319_v35, 0.0  ;;  %v322_v54 = vadd.f32 %v959_v19, %v286_v26  ;;  %v288_v38 = vmul.f32 %v707_v59, %v935_v58  ;;  %v289_v55 = vmul.f32 %v708_v60, %v935_v58 }
  0x39   : > { %820 = vst [vmem:[%s981_s25 + $0x48] sm:$0xff] %v765_v34   ;;  %v352_v39 = vmax.f32 %v320_v36, 0.0  ;;  %v353_v42 = vmax.f32 %v321_v37, 0.0  ;;  %v323_v41 = vadd.f32 %v959_v19, %v287_v40  ;;  %v290_v56 = vmul.f32 %v711_v61, %v935_v58 }
  0x3a   : > { %v770_v43 = vpack.c.bf16 %v351_v53, %v350_v50  ;;  %v354_v44 = vmax.f32 %v322_v54, 0.0  ;;  %v324_v45 = vadd.f32 %v959_v19, %v288_v38  ;;  %v325_v59 = vadd.f32 %v959_v19, %v289_v55 }
  0x3b   : > { %v775_v47 = vpack.c.bf16 %v353_v42, %v352_v39  ;;  %v355_v46 = vmax.f32 %v323_v41, 0.0  ;;  %v291_v60 = vmul.f32 %v712_v62, %v935_v58  ;;  %v326_v48 = vadd.f32 %v959_v19, %v290_v56 }
  0x3c   : > { %821 = vst [vmem:[%s981_s25 + $0x50] sm:$0xff] %v770_v43   ;;  %v356_v49 = vmax.f32 %v324_v45, 0.0  ;;  %v357_v57 = vmax.f32 %v325_v59, 0.0  ;;  %v292_v61 = vmul.f32 %v715_v63, %v935_v58  ;;  %v293_v2 = vmul.f32 %v716_v0, %v935_v58 }
  0x3d   : > { %822 = vst [vmem:[%s981_s25 + $0x58] sm:$0xff] %v775_v47   ;;  %v780_v3 = vpack.c.bf16 %v355_v46, %v354_v44  ;;  %v327_v51 = vadd.f32 %v959_v19, %v291_v60  ;;  %v358_v62 = vmax.f32 %v326_v48, 0.0 }
  0x3e   : > { %v785_v4 = vpack.c.bf16 %v357_v57, %v356_v49  ;;  %v328_v1 = vadd.f32 %v959_v19, %v292_v61  ;;  %v329_v5 = vadd.f32 %v959_v19, %v293_v2 }
  0x3f   : > { %823 = vst [vmem:[%s981_s25 + $0x60] sm:$0xff] %v780_v3   ;;  %v359_v6 = vmax.f32 %v327_v51, 0.0 }
  0x40   : > { %824 = vst [vmem:[%s981_s25 + $0x68] sm:$0xff] %v785_v4   ;;  %v360_v63 = vmax.f32 %v328_v1, 0.0  ;;  %v361_v7 = vmax.f32 %v329_v5, 0.0 }
  0x41   : > { %v790_v9 = vpack.c.bf16 %v359_v6, %v358_v62 }
  0x42   : > { %v795_v52 = vpack.c.bf16 %v361_v7, %v360_v63 }
  0x43   : > { %825 = vst [vmem:[%s981_s25 + $0x70] sm:$0xff] %v790_v9  }
  0x44   : > { %826 = vst [vmem:[%s981_s25 + $0x78] sm:$0xff] %v795_v52  }
  0x45 PF: > { %s13_s12 = sadd.s32 1, %s843_s12  }
  0x46   : > { %p10_p4 = scmp.ge.s32.totalorder %s13_s12, 4  }
  0x48   :  { %12 = sbr.rel (!%p10_p4) target bundleno = 1 (0x1), region = 62 }

// kernel: _lambda_.9
= control target key start
LH: loop header
LB: loop body
LE: loop exit
PB: predicated region body
PF: predicated region fallthrough
CT: control target
= control target key end

     0   :  { %11 = vsyncpa [#allocation3], 0  ;;  %s1699_s0 = inlined_call_operand.vmem [shape: bf16[512,128], index: 0, kind: input, shape index: {}]   ;;  %s1700_s1 = inlined_call_operand.vmem [shape: f32[2,128], index: 1, kind: input, shape index: {}]   ;;  %s1701_s2 = inlined_call_operand.vmem [shape: f32[2,128], index: 2, kind: input, shape index: {}, may-alias: {2,5}]   ;;  %s1702_s3 = inlined_call_operand.vmem [shape: bf16[512,128], index: 3, kind: input, shape index: {}]   ;;  %s1703_s4 = inlined_call_operand.vmem [shape: f32[2,128], index: 4, kind: input, shape index: {}]   ;;  %s1704_s5 = inlined_call_operand.vmem [shape: f32[2,128], index: 5, kind: input, shape index: {}, may-alias: {2,5}]   ;;  %s1705_s6 = inlined_call_operand.hbm [shape: f32[512,128], index: 6, kind: output, shape index: {}]  }
   0x1   :  { %13 = vsyncpa [#allocation3 + $0x1], 0  ;;  %s1091_s21 = smov 0   ;;  %s1093_s22 = smov 0  }
   0x2   :  { %s1095_s23 = smov 0   ;;  %s1097_s24 = smov 0  }
   0x3 LB: > { %s1112_s25 = sadd.s32 4294967295, %s1051_s24   ;;  %s771_s26 = sadd.s32 4294967294, %s1051_s24   ;;  %s1051_s24 = sphi %s1097_s24, %s1758_s24   ;;  %s1047_s23 = sphi %s1095_s23, %s1757_s23   ;;  %s1043_s22 = sphi %s1093_s22, %s1756_s22   ;;  %s1039_s21 = sphi %s1091_s21, %s1755_s21  }
   0x4   : > { %s1116_s27 = sadd.s32 1, %s1051_s24   ;;  %s162_s28 = sadd.s32 1, %s1047_s23 }
   0x5   : > { %s159_s29 = ssub.s32 %s1051_s24, %s1116_s27  ;;  %p172_p0 = scmp.ne.s32.totalorder %s1047_s23, %s1043_s22 }
   0x6   : > { %p160_p1 = scmp.eq.s32.totalorder %s159_s29, 0  ;;  %p173_p2 = scmp.eq.s32.totalorder %s1112_s25, 1 }
   0x7   : > { %p178_p3 = scmp.ne.s32.totalorder %s1043_s22, %s1039_s21  ;;  %p179_p4 = scmp.eq.s32.totalorder %s771_s26, 1 }
   0x8   : > { %s1127_s30 = scalar_select %p160_p1, %s1047_s23, %s162_s28  }
   0x9   : > { %p1129_p5 = por %p173_p2, %p172_p0  ;;  %p1133_p6 = por %p179_p4, %p178_p3 }
   0xa   : > { %p774_p7 = scmp.ge.s32.totalorder %s1051_s24, 1  ;;  %p227_p8 = scmp.lt.s32.totalorder %s1051_s24, 3 }
   0xc   : > { %p228_p9 = pnand %p774_p7, %p227_p8 }
   0xd   : > { %s776_s9 = sshll.u32 (!%p228_p9), %s1112_s25, 5  ;;  %v275_v0 = vld [vmem:[%s1700_s1] sm:$0x3] (!%p228_p9)  ;;  %v379_v4 = vlaneseq (!%p228_p9)  ;;  %s259_s10 = sand.u32 (!%p228_p9), 1, %s1043_s22  }
   0xe   : > { %231 = sbr.rel (%p228_p9) target bundleno = 124 (0x7c), region = 44  ;;  %p263_p10 = scmp.lt.s32.totalorder (!%p228_p9), %s776_s9, 63  ;;  %v1143_v1 = vmul.f32 (!%p228_p9), 0.001953125, %v275_v0  ;;  %v295_v2 = vld [vmem:[%s1703_s4] sm:$0x3] (!%p228_p9) }
   0xf   : > { %v1148_v3 = vmul.f32 (!%p228_p9), 0.001953125, %v295_v2  ;;  %v1164_v9 = vshrl.u32 (!%p228_p9), %v379_v4, 7  ;;  %v296_v55 = vld [vmem:[%s1704_s5] sm:$0x3] (!%p228_p9)  ;;  %s775_s11 = sshll.u32 (!%p228_p9), %s259_s10, 8  ;;  %s785_s13 = sshll.u32 (!%p228_p9), %s1112_s25, 12 }
  0x10   : > { %v278_v5 = vmul.f32 (!%p228_p9), %v1143_v1, %v1143_v1  ;;  %s1427_s12 = scalar_lea.vmem (!%p228_p9), [#allocation2], %s775_s11  ;;  %s1658_s25 = scalar_lea.sflag (!%p228_p9), [#allocation3], %s259_s10 }
  0x11   : > { %v298_v6 = vmul.f32 (!%p228_p9), %v1148_v3, %v1148_v3  ;;  %v381_v18 = vsub.s32 (!%p228_p9), 0, %v1164_v9  ;;  %v417_v19 = vsub.s32 (!%p228_p9), 1, %v1164_v9  ;;  %s1053_s19 = smov (!%p228_p9), [#allocation2]  }
  0x12   : > { %v280_v7 = vrot.slane (!%p228_p9), %v278_v5, 7 }
  0x13   : > { %v300_v8 = vrot.slane (!%p228_p9), %v298_v6, 7 }
  0x14   : > { %v282_v10 = vsub.f32 (!%p228_p9), %v1143_v1, %v280_v7 }
  0x15   : > { %s1760_s9 = smov (!%p263_p10, %s776_s9), 63  ;;  %v302_v11 = vsub.f32 %v1148_v3, %v300_v8 }
  0x16   : > { %s777_s14 = sshll.u32 %s1760_s9, 2  ;;  %v283_v14 = vmax.f32 %v282_v10, 0.0 }
  0x17   : > { %s1157_s17 = scalar_lea.vmem %s1699_s0, %s777_s14  ;;  %s1162_s20 = scalar_lea.vmem %s1702_s3, %s777_s14  ;;  %v303_v17 = vmax.f32 %v302_v11, 0.0  ;;  %v276_v11 = vld [vmem:[%s1701_s2] sm:$0x3] }
  0x18   : > { %v1169_v12 = vld [vmem:[%s1157_s17] sm:$0xff]   ;;  %v1175_v15 = vld [vmem:[%s1157_s17 + $0x8] sm:$0xff]   ;;  %v1183_v20 = vld [vmem:[%s1157_s17 + $0x10] sm:$0xff]   ;;  %v284_v21 = vadd.f32 1e-05, %v283_v14  ;;  %s697_s14 = sshll.u32 %s1427_s12, 4  ;;  %s1652_s14 = int_to_ptr.vmem [resolvable:$true] %s697_s14 }
  0x19   : > { %v1172_v13 = vld [vmem:[%s1162_s20] sm:$0xff]   ;;  %v1178_v16 = vld [vmem:[%s1162_s20 + $0x8] sm:$0xff]   ;;  %v788_v22 = vunpack.c.l.bf16 %v1169_v12  ;;  %v789_v24 = vunpack.c.h.bf16 %v1169_v12  ;;  %v1189_v25 = vld [vmem:[%s1162_s20 + $0x10] sm:$0xff]   ;;  %v304_v26 = vadd.f32 1e-05, %v303_v17  ;;  %v792_v28 = vunpack.c.l.bf16 %v1175_v15  ;;  %s989_s18 = scalar_lea.vmem %s1652_s14, 4096 }
  0x1a   : > { %v852_v23 = vunpack.c.l.bf16 %v1172_v13  ;;  %v853_v27 = vunpack.c.h.bf16 %v1172_v13  ;;  %v856_v29 = vunpack.c.l.bf16 %v1178_v16  ;;  %v1195_v30 = vld [vmem:[%s1157_s17 + $0x18] sm:$0xff]   ;;  %985 = vrsqrt.f32 %v284_v21  ;;  %v1204_v35 = vld [vmem:[%s1157_s17 + $0x20] sm:$0xff]   ;;  %v1213_v40 = vld [vmem:[%s1157_s17 + $0x28] sm:$0xff]   ;;  %p990_p11 = scmp.ne.s32.totalorder %s1652_s14, %s989_s18 }
  0x1b   : > { %v1198_v31 = vld [vmem:[%s1162_s20 + $0x18] sm:$0xff]   ;;  %v793_v32 = vunpack.c.h.bf16 %v1175_v15  ;;  %v857_v33 = vunpack.c.h.bf16 %v1178_v16  ;;  %v796_v34 = vunpack.c.l.bf16 %v1183_v20  ;;  %v1207_v36 = vld [vmem:[%s1162_s20 + $0x20] sm:$0xff]   ;;  %987 = vrsqrt.f32 %v304_v26  ;;  %v1216_v41 = vld [vmem:[%s1162_s20 + $0x28] sm:$0xff]  }
  0x1c   : > { %v860_v37 = vunpack.c.l.bf16 %v1189_v25  ;;  %v797_v38 = vunpack.c.h.bf16 %v1183_v20  ;;  %v861_v39 = vunpack.c.h.bf16 %v1189_v25  ;;  %v800_v42 = vunpack.c.l.bf16 %v1195_v30  ;;  %v1223_v46 = vld [vmem:[%s1157_s17 + $0x30] sm:$0xff]   ;;  %v1233_v52 = vld [vmem:[%s1157_s17 + $0x38] sm:$0xff]   ;;  %v1243_v58 = vld [vmem:[%s1157_s17 + $0x40] sm:$0xff]   ;;  %p991_p12 = pnand %p990_p11, %p1129_p5 }
  0x1d   : > { %v1226_v47 = vld [vmem:[%s1162_s20 + $0x30] sm:$0xff]   ;;  %v1236_v53 = vld [vmem:[%s1162_s20 + $0x38] sm:$0xff]   ;;  %v1246_v59 = vld [vmem:[%s1162_s20 + $0x40] sm:$0xff]   ;;  %v1709_v20 = vunpack.c.h.bf16 %v1195_v30 }
  0x1e   : > { %v1253_v0 = vld [vmem:[%s1157_s17 + $0x48] sm:$0xff]   ;;  %v1263_v8 = vld [vmem:[%s1157_s17 + $0x50] sm:$0xff]   ;;  %v1273_v26 = vld [vmem:[%s1157_s17 + $0x58] sm:$0xff]   ;;  %p992_p13 = pneg %p991_p12 }
  0x1f   : > { %v1256_v2 = vld [vmem:[%s1162_s20 + $0x48] sm:$0xff]   ;;  %v1266_v10 = vld [vmem:[%s1162_s20 + $0x50] sm:$0xff]   ;;  %v1276_v5 = vld [vmem:[%s1162_s20 + $0x58] sm:$0xff]  }
  0x20   : > { %v1283_v63 = vld [vmem:[%s1157_s17 + $0x60] sm:$0xff]   ;;  %v1293_v7 = vld [vmem:[%s1157_s17 + $0x68] sm:$0xff]   ;;  %v1306_v21 = vld [vmem:[%s1157_s17 + $0x70] sm:$0xff]  }
  0x21   : > { %v1286_v14 = vld [vmem:[%s1162_s20 + $0x60] sm:$0xff]   ;;  %v1296_v6 = vld [vmem:[%s1162_s20 + $0x68] sm:$0xff]   ;;  %v1315_v17 = vld [vmem:[%s1162_s20 + $0x70] sm:$0xff]   ;;  %v844_v51 = vunpack.c.l.bf16 %v1306_v21 }
  0x22   : > { %v1324_v48 = vld [vmem:[%s1162_s20 + $0x78] sm:$0xff]   ;;  %s993_s20 = sshll.u32 %s1053_s19, 4  ;;  %s994_s20 = int_to_ptr.vmem [resolvable:$false] %s993_s20 }
  0x23   : > { %v913_v61 = vunpack.c.h.bf16 %v1324_v48  ;;  %s995_s26 = scalar_lea.vmem %s994_s20, 8192  ;;  %p996_p0 = scmp.lt.s32.totalorder %s1652_s14, %s994_s20 }
  0x24   : > { %v986_v4 = vpop.eup %985  ;;  %p997_p1 = scmp.lt.s32.totalorder %s995_s26, %s989_s18 }
  0x25   : > { %v988_v57 = vpop.eup %987  ;;  %v287_v56 = vrot.slane %v986_v4, 1  ;;  %v1321_v4 = vld [vmem:[%s1157_s17 + $0x78] sm:$0xff]   ;;  %s1650_s17 = scalar_lea.hbm %s1705_s6, %s785_s13 }
  0x26   : > { %v307_v50 = vrot.slane %v988_v57, 1  ;;  %v849_v62 = vunpack.c.h.bf16 %v1321_v4  ;;  %p998_p2 = por %p997_p1, %p996_p0 }
  0x27   : > { %v289_v45 = vmul.f32 %v287_v56, %v276_v11  ;;  %v848_v56 = vunpack.c.l.bf16 %v1321_v4 }
  0x28   : > { %v309_v44 = vmul.f32 %v307_v50, %v296_v55  ;;  %p999_p3 = pnand %p998_p2, %p992_p13 }
  0x29   : > { %v290_v49 = vmul.f32 %v289_v45, %v1143_v1  ;;  %v1335_v43 = vrot.slane %v289_v45, %v381_v18 }
  0x2a   : > { %v310_v60 = vmul.f32 %v309_v44, %v1148_v3  ;;  %v1342_v50 = vrot.slane %v309_v44, %v381_v18 }
  0x2b   : > { %v292_v57 = vrot.slane %v290_v49, 7  ;;  %v383_v1 = vmul.f32 %v788_v22, %v1335_v43  ;;  %v384_v45 = vmul.f32 %v789_v24, %v1335_v43  ;;  %v385_v3 = vmul.f32 %v792_v28, %v1335_v43 }
  0x2c   : > { %v312_v54 = vrot.slane %v310_v60, 7  ;;  %v519_v18 = vmul.f32 %v852_v23, %v1342_v50  ;;  %v520_v44 = vmul.f32 %v853_v27, %v1342_v50  ;;  %v521_v22 = vmul.f32 %v856_v29, %v1342_v50 }
  0x2d   : > { %v294_v12 = vsub.f32 %v276_v11, %v292_v57  ;;  %v386_v24 = vmul.f32 %v793_v32, %v1335_v43  ;;  %v522_v28 = vmul.f32 %v857_v33, %v1342_v50  ;;  %v387_v23 = vmul.f32 %v796_v34, %v1335_v43 }
  0x2e   : > { %v314_v49 = vsub.f32 %v296_v55, %v312_v54  ;;  %v523_v13 = vmul.f32 %v860_v37, %v1342_v50  ;;  %v388_v27 = vmul.f32 %v797_v38, %v1335_v43  ;;  %v524_v15 = vmul.f32 %v861_v39, %v1342_v50 }
  0x2f   : > { %v1384_v16 = vrot.slane %v294_v12, %v417_v19  ;;  %v389_v29 = vmul.f32 %v800_v42, %v1335_v43  ;;  %v1708_v32 = vunpack.c.l.bf16 %v1198_v31  ;;  %v390_v34 = vmul.f32 %v1709_v20, %v1335_v43 }
  0x30   : > { %v1398_v25 = vrot.slane %v314_v49, %v417_v19  ;;  %v1710_v37 = vunpack.c.h.bf16 %v1198_v31  ;;  %v1711_v39 = vunpack.c.l.bf16 %v1204_v35  ;;  %v1712_v54 = vunpack.c.l.bf16 %v1207_v36 }
  0x31   : > { %v525_v33 = vmul.f32 %v1708_v32, %v1342_v50  ;;  %v419_v30 = vadd.f32 %v1384_v16, %v383_v1  ;;  %v420_v60 = vadd.f32 %v1384_v16, %v384_v45  ;;  %v421_v9 = vadd.f32 %v1384_v16, %v385_v3 }
  0x32   : > { %v526_v38 = vmul.f32 %v1710_v37, %v1342_v50  ;;  %v391_v42 = vmul.f32 %v1711_v39, %v1335_v43  ;;  %v527_v55 = vmul.f32 %v1712_v54, %v1342_v50  ;;  %v422_v19 = vadd.f32 %v1384_v16, %v386_v24 }
  0x33   : > { %v423_v11 = vadd.f32 %v1384_v16, %v387_v23  ;;  %v424_v31 = vadd.f32 %v1384_v16, %v388_v27  ;;  %v425_v57 = vadd.f32 %v1384_v16, %v389_v29  ;;  %v426_v12 = vadd.f32 %v1384_v16, %v390_v34 }
  0x34   : > { %v551_v49 = vadd.f32 %v519_v18, %v419_v30  ;;  %v552_v32 = vadd.f32 %v520_v44, %v420_v60  ;;  %v553_v20 = vadd.f32 %v521_v22, %v421_v9  ;;  %v554_v1 = vadd.f32 %v522_v28, %v422_v19 }
  0x35   : > { %v555_v37 = vadd.f32 %v523_v13, %v423_v11  ;;  %v556_v45 = vadd.f32 %v524_v15, %v424_v31  ;;  %v557_v39 = vadd.f32 %v525_v33, %v425_v57  ;;  %v558_v3 = vadd.f32 %v526_v38, %v426_v12 }
  0x36   : > { %v587_v24 = vadd.f32 %v1398_v25, %v551_v49  ;;  %v588_v23 = vadd.f32 %v1398_v25, %v552_v32  ;;  %v589_v27 = vadd.f32 %v1398_v25, %v553_v20  ;;  %v590_v29 = vadd.f32 %v1398_v25, %v554_v1 }
  0x37   : > { %v591_v34 = vadd.f32 %v1398_v25, %v555_v37  ;;  %v592_v54 = vadd.f32 %v1398_v25, %v556_v45  ;;  %v593_v18 = vadd.f32 %v1398_v25, %v557_v39  ;;  %v594_v44 = vadd.f32 %v1398_v25, %v558_v3 }
  0x38   : > { %v619_v22 = vmax.f32 %v587_v24, 0.0  ;;  %v620_v28 = vmax.f32 %v588_v23, 0.0  ;;  %v621_v13 = vmax.f32 %v589_v27, 0.0  ;;  %v622_v15 = vmax.f32 %v590_v29, 0.0 }
  0x39   : > { %v623_v33 = vmax.f32 %v591_v34, 0.0  ;;  %v624_v38 = vmax.f32 %v592_v54, 0.0  ;;  %v625_v30 = vmax.f32 %v593_v18, 0.0  ;;  %v626_v60 = vmax.f32 %v594_v44, 0.0 }
  0x3a   : > { %651 = vst [vmem:[%s1427_s12] sm:$0xff] %v619_v22  ;;  %652 = vst [vmem:[%s1427_s12 + $0x8] sm:$0xff] %v620_v28  ;;  %v427_v9 = vadd.f32 %v1384_v16, %v391_v42  ;;  %v1713_v19 = vunpack.c.h.bf16 %v1204_v35  ;;  %v1714_v31 = vunpack.c.h.bf16 %v1207_v36  ;;  %v1715_v12 = vunpack.c.l.bf16 %v1213_v40 }
  0x3b   : > { %653 = vst [vmem:[%s1427_s12 + $0x10] sm:$0xff] %v621_v13  ;;  %654 = vst [vmem:[%s1427_s12 + $0x18] sm:$0xff] %v622_v15  ;;  %v1716_v32 = vunpack.c.l.bf16 %v1216_v41  ;;  %v1717_v35 = vunpack.c.h.bf16 %v1213_v40  ;;  %v1718_v36 = vunpack.c.h.bf16 %v1216_v41  ;;  %v1719_v37 = vunpack.c.l.bf16 %v1223_v46 }
  0x3c   : > { %v392_v11 = vmul.f32 %v1713_v19, %v1335_v43  ;;  %v528_v57 = vmul.f32 %v1714_v31, %v1342_v50  ;;  %v393_v49 = vmul.f32 %v1715_v12, %v1335_v43  ;;  %655 = vst [vmem:[%s1427_s12 + $0x20] sm:$0xff] %v623_v33  ;;  %656 = vst [vmem:[%s1427_s12 + $0x28] sm:$0xff] %v624_v38  ;;  %v1720_v23 = vunpack.c.l.bf16 %v1226_v47 }
  0x3d   : > { %657 = vst [vmem:[%s1427_s12 + $0x30] sm:$0xff] %v625_v30  ;;  %658 = vst [vmem:[%s1427_s12 + $0x38] sm:$0xff] %v626_v60  ;;  %v529_v42 = vmul.f32 %v1716_v32, %v1342_v50  ;;  %v394_v20 = vmul.f32 %v1717_v35, %v1335_v43  ;;  %v530_v1 = vmul.f32 %v1718_v36, %v1342_v50  ;;  %v1721_v41 = vunpack.c.h.bf16 %v1223_v46 }
  0x3e   : > { %v395_v45 = vmul.f32 %v1719_v37, %v1335_v43  ;;  %v559_v39 = vadd.f32 %v527_v55, %v427_v9  ;;  %v428_v3 = vadd.f32 %v1384_v16, %v392_v11  ;;  %v429_v24 = vadd.f32 %v1384_v16, %v393_v49 }
  0x3f   : > { %v531_v27 = vmul.f32 %v1720_v23, %v1342_v50  ;;  %v430_v40 = vadd.f32 %v1384_v16, %v394_v20  ;;  %v396_v34 = vmul.f32 %v1721_v41, %v1335_v43  ;;  %v1722_v54 = vunpack.c.h.bf16 %v1226_v47 }
  0x40   : > { %v431_v29 = vadd.f32 %v1384_v16, %v395_v45  ;;  %v595_v18 = vadd.f32 %v1398_v25, %v559_v39  ;;  %v560_v44 = vadd.f32 %v528_v57, %v428_v3  ;;  %v561_v22 = vadd.f32 %v529_v42, %v429_v24 }
  0x41   : > { %v532_v55 = vmul.f32 %v1722_v54, %v1342_v50  ;;  %v1723_v28 = vunpack.c.l.bf16 %v1233_v52  ;;  %v562_v15 = vadd.f32 %v530_v1, %v430_v40  ;;  %v432_v38 = vadd.f32 %v1384_v16, %v396_v34 }
  0x42   : > { %v563_v33 = vadd.f32 %v531_v27, %v431_v29  ;;  %v1724_v46 = vunpack.c.l.bf16 %v1236_v53  ;;  %v627_v60 = vmax.f32 %v595_v18, 0.0  ;;  %v596_v47 = vadd.f32 %v1398_v25, %v560_v44 }
  0x43   : > { %v397_v13 = vmul.f32 %v1723_v28, %v1335_v43  ;;  %v597_v9 = vadd.f32 %v1398_v25, %v561_v22  ;;  %v598_v11 = vadd.f32 %v1398_v25, %v562_v15  ;;  %v564_v57 = vadd.f32 %v532_v55, %v432_v38 }
  0x44   : > { %v533_v30 = vmul.f32 %v1724_v46, %v1342_v50  ;;  %v599_v31 = vadd.f32 %v1398_v25, %v563_v33  ;;  %v1725_v12 = vunpack.c.h.bf16 %v1233_v52  ;;  %659 = vst [vmem:[%s1427_s12 + $0x40] sm:$0xff] %v627_v60  ;;  %v628_v32 = vmax.f32 %v596_v47, 0.0 }
  0x45   : > { %v433_v19 = vadd.f32 %v1384_v16, %v397_v13  ;;  %v629_v42 = vmax.f32 %v597_v9, 0.0  ;;  %v1726_v20 = vunpack.c.h.bf16 %v1236_v53  ;;  %v630_v1 = vmax.f32 %v598_v11, 0.0 }
  0x46   : > { %v398_v49 = vmul.f32 %v1725_v12, %v1335_v43  ;;  %v631_v37 = vmax.f32 %v599_v31, 0.0  ;;  %v600_v45 = vadd.f32 %v1398_v25, %v564_v57  ;;  %660 = vst [vmem:[%s1427_s12 + $0x48] sm:$0xff] %v628_v32  ;;  %v1727_v3 = vunpack.c.l.bf16 %v1243_v58 }
  0x47   : > { %v565_v35 = vadd.f32 %v533_v30, %v433_v19  ;;  %v534_v36 = vmul.f32 %v1726_v20, %v1342_v50  ;;  %661 = vst [vmem:[%s1427_s12 + $0x50] sm:$0xff] %v629_v42  ;;  %v1728_v23 = vunpack.c.l.bf16 %v1246_v59  ;;  %v1729_v27 = vunpack.c.h.bf16 %v1243_v58  ;;  %662 = vst [vmem:[%s1427_s12 + $0x58] sm:$0xff] %v630_v1 }
  0x48   : > { %v434_v39 = vadd.f32 %v1384_v16, %v398_v49  ;;  %v399_v24 = vmul.f32 %v1727_v3, %v1335_v43  ;;  %663 = vst [vmem:[%s1427_s12 + $0x60] sm:$0xff] %v631_v37  ;;  %v632_v29 = vmax.f32 %v600_v45, 0.0  ;;  %v1730_v34 = vunpack.c.h.bf16 %v1246_v59 }
  0x49   : > { %v601_v52 = vadd.f32 %v1398_v25, %v565_v35  ;;  %v535_v53 = vmul.f32 %v1728_v23, %v1342_v50  ;;  %v400_v40 = vmul.f32 %v1729_v27, %v1335_v43  ;;  %v1731_v55 = vunpack.c.l.bf16 %v1253_v0 }
  0x4a   : > { %v566_v41 = vadd.f32 %v534_v36, %v434_v39  ;;  %v536_v54 = vmul.f32 %v1730_v34, %v1342_v50  ;;  %v435_v22 = vadd.f32 %v1384_v16, %v399_v24  ;;  %v1732_v58 = vunpack.c.l.bf16 %v1256_v2  ;;  %664 = vst [vmem:[%s1427_s12 + $0x68] sm:$0xff] %v632_v29 }
  0x4b   : > { %v401_v18 = vmul.f32 %v1731_v55, %v1335_v43  ;;  %v633_v44 = vmax.f32 %v601_v52, 0.0  ;;  %v436_v28 = vadd.f32 %v1384_v16, %v400_v40  ;;  %v1733_v59 = vunpack.c.h.bf16 %v1253_v0 }
  0x4c   : > { %v537_v13 = vmul.f32 %v1732_v58, %v1342_v50  ;;  %v602_v15 = vadd.f32 %v1398_v25, %v566_v41  ;;  %v1734_v46 = vunpack.c.h.bf16 %v1256_v2  ;;  %v567_v60 = vadd.f32 %v535_v53, %v435_v22 }
  0x4d   : > { %v437_v33 = vadd.f32 %v1384_v16, %v401_v18  ;;  %v402_v38 = vmul.f32 %v1733_v59, %v1335_v43  ;;  %665 = vst [vmem:[%s1427_s12 + $0x70] sm:$0xff] %v633_v44  ;;  %v568_v47 = vadd.f32 %v536_v54, %v436_v28  ;;  %v1735_v9 = vunpack.c.l.bf16 %v1263_v8 }
  0x4e   : > { %v538_v30 = vmul.f32 %v1734_v46, %v1342_v50  ;;  %v1736_v11 = vunpack.c.l.bf16 %v1266_v10  ;;  %v634_v57 = vmax.f32 %v602_v15, 0.0  ;;  %v1737_v49 = vunpack.c.h.bf16 %v1263_v8 }
  0x4f   : > { %v403_v19 = vmul.f32 %v1735_v9, %v1335_v43  ;;  %v569_v12 = vadd.f32 %v537_v13, %v437_v33  ;;  %v438_v0 = vadd.f32 %v1384_v16, %v402_v38  ;;  %v603_v32 = vadd.f32 %v1398_v25, %v567_v60 }
  0x50   : > { %v539_v31 = vmul.f32 %v1736_v11, %v1342_v50  ;;  %v404_v2 = vmul.f32 %v1737_v49, %v1335_v43  ;;  %v604_v42 = vadd.f32 %v1398_v25, %v568_v47  ;;  %v1738_v20 = vunpack.c.h.bf16 %v1266_v10  ;;  %666 = vst [vmem:[%s1427_s12 + $0x78] sm:$0xff] %v634_v57 }
  0x51   : > { %v439_v35 = vadd.f32 %v1384_v16, %v403_v19  ;;  %v605_v1 = vadd.f32 %v1398_v25, %v569_v12  ;;  %v570_v37 = vadd.f32 %v538_v30, %v438_v0  ;;  %v1739_v8 = vunpack.c.l.bf16 %v1273_v26 }
  0x52   : > { %v540_v36 = vmul.f32 %v1738_v20, %v1342_v50  ;;  %v440_v45 = vadd.f32 %v1384_v16, %v404_v2  ;;  %v635_v52 = vmax.f32 %v603_v32, 0.0  ;;  %v636_v3 = vmax.f32 %v604_v42, 0.0 }
  0x53   : > { %v405_v39 = vmul.f32 %v1739_v8, %v1335_v43  ;;  %v571_v24 = vadd.f32 %v539_v31, %v439_v35  ;;  %v1740_v23 = vunpack.c.l.bf16 %v1276_v5  ;;  %v637_v53 = vmax.f32 %v605_v1, 0.0 }
  0x54   : > { %v606_v27 = vadd.f32 %v1398_v25, %v570_v37  ;;  %v572_v40 = vadd.f32 %v540_v36, %v440_v45  ;;  %667 = vst [vmem:[%s1427_s12 + $0x80] sm:$0xff] %v635_v52  ;;  %668 = vst [vmem:[%s1427_s12 + $0x88] sm:$0xff] %v636_v3  ;;  %v1741_v34 = vunpack.c.h.bf16 %v1273_v26  ;;  %v1742_v55 = vunpack.c.h.bf16 %v1276_v5 }
  0x55   : > { %v541_v10 = vmul.f32 %v1740_v23, %v1342_v50  ;;  %v441_v29 = vadd.f32 %v1384_v16, %v405_v39  ;;  %v607_v41 = vadd.f32 %v1398_v25, %v571_v24  ;;  %v1743_v44 = vunpack.c.l.bf16 %v1283_v63  ;;  %669 = vst [vmem:[%s1427_s12 + $0x90] sm:$0xff] %v637_v53 }
  0x56   : > { %v406_v54 = vmul.f32 %v1741_v34, %v1335_v43  ;;  %v542_v18 = vmul.f32 %v1742_v55, %v1342_v50  ;;  %v638_v28 = vmax.f32 %v606_v27, 0.0  ;;  %v608_v58 = vadd.f32 %v1398_v25, %v572_v40 }
  0x57   : > { %v407_v22 = vmul.f32 %v1743_v44, %v1335_v43  ;;  %v573_v13 = vadd.f32 %v541_v10, %v441_v29  ;;  %v1744_v15 = vunpack.c.l.bf16 %v1286_v14  ;;  %v639_v33 = vmax.f32 %v607_v41, 0.0 }
  0x58   : > { %v442_v59 = vadd.f32 %v1384_v16, %v406_v54  ;;  %v1745_v38 = vunpack.c.h.bf16 %v1283_v63  ;;  %670 = vst [vmem:[%s1427_s12 + $0x98] sm:$0xff] %v638_v28  ;;  %v640_v30 = vmax.f32 %v608_v58, 0.0  ;;  %v1746_v47 = vunpack.c.h.bf16 %v1286_v14 }
  0x59   : > { %v543_v26 = vmul.f32 %v1744_v15, %v1342_v50  ;;  %v443_v5 = vadd.f32 %v1384_v16, %v407_v22  ;;  %v609_v60 = vadd.f32 %v1398_v25, %v573_v13  ;;  %v1747_v19 = vunpack.c.l.bf16 %v1293_v7  ;;  %671 = vst [vmem:[%s1427_s12 + $0xa0] sm:$0xff] %v639_v33 }
  0x5a   : > { %v408_v46 = vmul.f32 %v1745_v38, %v1335_v43  ;;  %v544_v9 = vmul.f32 %v1746_v47, %v1342_v50  ;;  %v574_v31 = vadd.f32 %v542_v18, %v442_v59  ;;  %v1748_v63 = vunpack.c.l.bf16 %v1296_v6  ;;  %672 = vst [vmem:[%s1427_s12 + $0xa8] sm:$0xff] %v640_v30 }
  0x5b   : > { %v409_v11 = vmul.f32 %v1747_v19, %v1335_v43  ;;  %v575_v57 = vadd.f32 %v543_v26, %v443_v5  ;;  %v641_v49 = vmax.f32 %v609_v60, 0.0  ;;  %v1749_v14 = vunpack.c.h.bf16 %v1293_v7 }
  0x5c   : > { %v444_v12 = vadd.f32 %v1384_v16, %v408_v46  ;;  %v545_v0 = vmul.f32 %v1748_v63, %v1342_v50  ;;  %v1750_v42 = vunpack.c.h.bf16 %v1296_v6  ;;  %v610_v20 = vadd.f32 %v1398_v25, %v574_v31 }
  0x5d   : > { %v445_v2 = vadd.f32 %v1384_v16, %v409_v11  ;;  %v410_v32 = vmul.f32 %v1749_v14, %v1335_v43  ;;  %v611_v36 = vadd.f32 %v1398_v25, %v575_v57  ;;  %v411_v37 = vmul.f32 %v844_v51, %v1335_v43  ;;  %673 = vst [vmem:[%s1427_s12 + $0xb0] sm:$0xff] %v641_v49 }
  0x5e   : > { %v546_v35 = vmul.f32 %v1750_v42, %v1342_v50  ;;  %v576_v1 = vadd.f32 %v544_v9, %v444_v12  ;;  %v1751_v8 = vunpack.c.l.bf16 %v1315_v17  ;;  %v1752_v39 = vunpack.c.h.bf16 %v1306_v21 }
  0x5f   : > { %v577_v45 = vadd.f32 %v545_v0, %v445_v2  ;;  %v446_v7 = vadd.f32 %v1384_v16, %v410_v32  ;;  %v642_v3 = vmax.f32 %v610_v20, 0.0  ;;  %v643_v24 = vmax.f32 %v611_v36, 0.0 }
  0x60   : > { %v547_v6 = vmul.f32 %v1751_v8, %v1342_v50  ;;  %v412_v52 = vmul.f32 %v1752_v39, %v1335_v43  ;;  %v612_v23 = vadd.f32 %v1398_v25, %v576_v1  ;;  %v447_v10 = vadd.f32 %v1384_v16, %v411_v37 }
  0x61   : > { %v613_v51 = vadd.f32 %v1398_v25, %v577_v45  ;;  %v578_v53 = vadd.f32 %v546_v35, %v446_v7  ;;  %v1753_v40 = vunpack.c.h.bf16 %v1315_v17  ;;  %674 = vst [vmem:[%s1427_s12 + $0xb8] sm:$0xff] %v642_v3  ;;  %675 = vst [vmem:[%s1427_s12 + $0xc0] sm:$0xff] %v643_v24  ;;  %v413_v34 = vmul.f32 %v848_v56, %v1335_v43 }
  0x62   : > { %v448_v27 = vadd.f32 %v1384_v16, %v412_v52  ;;  %v644_v21 = vmax.f32 %v612_v23, 0.0  ;;  %v579_v41 = vadd.f32 %v547_v6, %v447_v10  ;;  %v1754_v54 = vunpack.c.l.bf16 %v1324_v48 }
  0x63   : > { %v548_v29 = vmul.f32 %v1753_v40, %v1342_v50  ;;  %v645_v18 = vmax.f32 %v613_v51, 0.0  ;;  %v614_v44 = vadd.f32 %v1398_v25, %v578_v53  ;;  %v414_v22 = vmul.f32 %v849_v62, %v1335_v43 }
  0x64   : > { %v549_v55 = vmul.f32 %v1754_v54, %v1342_v50  ;;  %676 = vst [vmem:[%s1427_s12 + $0xc8] sm:$0xff] %v644_v21  ;;  %v615_v28 = vadd.f32 %v1398_v25, %v579_v41  ;;  %v449_v56 = vadd.f32 %v1384_v16, %v413_v34  ;;  %v550_v58 = vmul.f32 %v913_v61, %v1342_v50 }
  0x65   : > { %v580_v17 = vadd.f32 %v548_v29, %v448_v27  ;;  %677 = vst [vmem:[%s1427_s12 + $0xd0] sm:$0xff] %v645_v18  ;;  %v646_v13 = vmax.f32 %v614_v44, 0.0  ;;  %v450_v26 = vadd.f32 %v1384_v16, %v414_v22 }
  0x66   : > { %v647_v4 = vmax.f32 %v615_v28, 0.0  ;;  %v581_v43 = vadd.f32 %v549_v55, %v449_v56 }
  0x67   : > { %v616_v15 = vadd.f32 %v1398_v25, %v580_v17  ;;  %678 = vst [vmem:[%s1427_s12 + $0xd8] sm:$0xff] %v646_v13  ;;  %v582_v33 = vadd.f32 %v550_v58, %v450_v26 }
  0x68   : > { %679 = vst [vmem:[%s1427_s12 + $0xe0] sm:$0xff] %v647_v4  ;;  %v617_v48 = vadd.f32 %v1398_v25, %v581_v43 }
  0x69   : > { %v648_v62 = vmax.f32 %v616_v15, 0.0  ;;  %v618_v61 = vadd.f32 %v1398_v25, %v582_v33 }
  0x6a   : > { %v649_v50 = vmax.f32 %v617_v48, 0.0 }
  0x6b   : > { %680 = vst [vmem:[%s1427_s12 + $0xe8] sm:$0xff] %v648_v62  ;;  %v650_v16 = vmax.f32 %v618_v61, 0.0 }
  0x6c   : > { %681 = vst [vmem:[%s1427_s12 + $0xf0] sm:$0xff] %v649_v50 }
  0x6d   : > { %682 = vst [vmem:[%s1427_s12 + $0xf8] sm:$0xff] %v650_v16 }
  0x6e   : > { %1002 = shalt.err (!%p999_p3)
}
  0x6f   : > { %s1003_s28 = scalar_lea.hbm %s1650_s17, 4096  ;;  %s1007_s10 = scalar_lea.hbm %s1705_s6, 8192 }
  0x70   : > { %p1004_p4 = scmp.ne.s32.totalorder %s1650_s17, %s1003_s28  ;;  %p1008_p9 = scmp.lt.u32.totalorder %s1650_s17, %s1705_s6 }
  0x71   : > { %p1009_p10 = scmp.lt.u32.totalorder %s1007_s10, %s1003_s28  ;;  %p1011_p12 = scmp.lt.u32.totalorder %s1003_s28, %s1650_s17 }
  0x72   : > { %p1005_p7 = pnand %p1004_p4, %p1129_p5 }
  0x73   : > { %p1010_p11 = por %p1009_p10, %p1008_p9 }
  0x74   : > { %p1006_p8 = pneg %p1005_p7 }
  0x75   : > { %p1012_p13 = por %p1011_p12, %p1010_p11 }
  0x77   : > { %p1013_p0 = pnand %p1012_p13, %p1006_p8 }
  0x79   : > { %1016 = shalt.err (!%p1013_p0)
}
  0x7a   : > { %s1054_s13 = smov 128   ;;  %s1055_s15 = smov 8  }
  0x7b   : > { %944 = dma.vmem_to_hbm [thread:$0]  (%p1129_p5), %s1652_s14, 4096, %s1650_s17, %s1658_s25, %s1054_s13, %s1054_s13, %s1055_s15  }
  0x7c PF: > { %p950_p1 = scmp.ge.s32.totalorder %s1051_s24, 2  ;;  %s712_s16 = sand.u32 1, %s1039_s21  }
  0x7d   : > { %s713_s18 = scalar_lea.sflag [#allocation3], %s712_s16 }
  0x7e   : > { %p947_p2 = pnand %p950_p1, %p1133_p6 }
  0x80   : > { %1034 = dma.done.wait (!%p947_p2), %s713_s18, 4096  }
  0x81   : > { %1036 = vsyncadd (!%p947_p2), %s713_s18, 4294963200  ;;  %p16_p3 = scmp.ge.s32.totalorder %s1116_s27, 4   ;;  %s1755_s21 = smov %s1043_s22 }
  0x82   : > { %s1756_s22 = smov %s1047_s23  ;;  %s1757_s23 = smov %s1127_s30 }
  0x83   : > { %s1758_s24 = smov %s1116_s27  ;;  %18 = sbr.rel (!%p16_p3) target bundleno = 3 (0x3), region = 82 }
  0x8a   :  { %718 = vsyncpa [#allocation3], 1 }
  0x8b   :  { %720 = vsyncpa [#allocation3 + $0x1], 1 }

// kernel: _lambda_.5
= control target key start
LH: loop header
LB: loop body
LE: loop exit
PB: predicated region body
PF: predicated region fallthrough
CT: control target
= control target key end

     0   :  { %s8225_s12 = smov 0   ;;  %s8227_s13 = smov 0   ;;  %s9371_s0 = inlined_call_operand.vmem [shape: bf16[2,18,18,128], index: 0, kind: input, shape index: {}]   ;;  %s9372_s1 = inlined_call_operand.vmem [shape: bf16[3,3,128,128], index: 1, kind: input, shape index: {}]   ;;  %s9373_s2 = inlined_call_operand.vmem [shape: bf16[2,16,16,128], index: 2, kind: output, shape index: {0}]   ;;  %s9374_s3 = inlined_call_operand.vmem [shape: f32[2,2,128], index: 3, kind: output, shape index: {1}]  }
   0x1   :  { %s8229_s14 = smov 0  }
   0x2 LB: > { %s26_s15 = sadd.s32 1, %s8199_s13  ;;  %p6293_p0 = scmp.ge.s32.totalorder %s8203_s14, 1  ;;  %s8203_s14 = sphi %s8229_s14, %s14_s14   ;;  %s8199_s13 = sphi %s8227_s13, %s9380_s13   ;;  %s8195_s12 = sphi %s8225_s12, %s9379_s12  }
   0x3   : > { %p28_p1 = scmp.ge.s32.totalorder %s26_s15, 2  ;;  %p165_p2 = scmp.lt.s32.totalorder %s8203_s14, 3 }
   0x5   : > { %s9382_s15 = smov (%p28_p1, %s26_s15), 0  ;;  %p166_p3 = pnand %p6293_p0, %p165_p2 }
   0x6   : > { %v8053_v0 = vld [vmem:[%s9372_s1] sm:$0xff] (!%p166_p3)   ;;  %v8055_v2 = vld [vmem:[%s9372_s1 + $0x8] sm:$0xff] (!%p166_p3)   ;;  %p203_p4 = scmp.lt.s32.totalorder (!%p166_p3), %s8195_s12, 1  ;;  %v8057_v4 = vld [vmem:[%s9372_s1 + $0x10] sm:$0xff] (!%p166_p3)   ;;  %vm757_vm0 = vsmask.f32 (!%p166_p3), 3328 }
   0x7   : > { %169 = sbr.rel (%p166_p3) target bundleno = 573 (0x23d), region = 28  ;;  %v8054_v1 = vld [vmem:[%s9372_s1 + $0x100] sm:$0xff] (!%p166_p3)   ;;  %7324 = vmatprep.subr.bf16.mxu1 (!%p166_p3), %v8053_v0  ;;  %v8056_v3 = vld [vmem:[%s9372_s1 + $0x108] sm:$0xff] (!%p166_p3)   ;;  %v8058_v5 = vld [vmem:[%s9372_s1 + $0x110] sm:$0xff] (!%p166_p3)   ;;  %vm758_vm1 = vsmask.f32 (!%p166_p3), 7440 }
   0x8   : > { %7516 = vmatprep.subr.bf16.mxu0 (!%p166_p3), %v8054_v1  ;;  %7325 = vmatpush3.bf16.msra.mxu1 (!%p166_p3), %v8053_v0  ;;  %v8059_v6 = vld [vmem:[%s9372_s1 + $0x18] sm:$0xff] (!%p166_p3)   ;;  %v8061_v8 = vld [vmem:[%s9372_s1 + $0x20] sm:$0xff] (!%p166_p3)   ;;  %v8063_v10 = vld [vmem:[%s9372_s1 + $0x28] sm:$0xff] (!%p166_p3)   ;;  %vm1626_vm3 = vcmask (!%p166_p3), 1042432   ;;  %vm1627_vm4 = vcmask (!%p166_p3), 1046532   ;;  %vm6151_vm6 = vcmask (!%p166_p3), 1040384  }
   0x9   : > { %7517 = vmatpush3.bf16.msra.mxu0 (!%p166_p3), %v8054_v1  ;;  %7326 = vmatprep.subr.bf16.mxu1 (!%p166_p3), %v8055_v2  ;;  %v8060_v7 = vld [vmem:[%s9372_s1 + $0x118] sm:$0xff] (!%p166_p3)   ;;  %v8062_v9 = vld [vmem:[%s9372_s1 + $0x120] sm:$0xff] (!%p166_p3)   ;;  %v8064_v11 = vld [vmem:[%s9372_s1 + $0x128] sm:$0xff] (!%p166_p3)  }
   0xa   : > { %7518 = vmatprep.subr.bf16.mxu0 (!%p166_p3), %v8056_v3  ;;  %v8065_v18 = vld [vmem:[%s9372_s1 + $0x30] sm:$0xff] (!%p166_p3)   ;;  %v8067_v32 = vld [vmem:[%s9372_s1 + $0x38] sm:$0xff] (!%p166_p3)   ;;  %vm8305_vm2 = vmor (!%p166_p3), %vm757_vm0, %vm758_vm1 }
   0xb   : > { %v8066_v24 = vld [vmem:[%s9372_s1 + $0x130] sm:$0xff] (!%p166_p3)   ;;  %v8068_v38 = vld [vmem:[%s9372_s1 + $0x138] sm:$0xff] (!%p166_p3)   ;;  %v8071_v47 = vld [vmem:[%s9372_s1 + $0x40] sm:$0xff] (!%p166_p3)  }
   0xc   : > { %7327 = vmatpush3.bf16.msra.mxu1 (!%p166_p3), %v8055_v2  ;;  %v8072_v52 = vld [vmem:[%s9372_s1 + $0x140] sm:$0xff] (!%p166_p3)   ;;  %vm8405_vm5 = vmor (!%p166_p3), %vm1626_vm3, %vm1627_vm4 }
   0xd   : > { %7519 = vmatpush3.bf16.msra.mxu0 (!%p166_p3), %v8056_v3  ;;  %7328 = vmatprep.subr.bf16.mxu1 (!%p166_p3), %v8057_v4 }
   0xe   : > { %s9384_s12 = smov (!%p203_p4, %s8195_s12), 1  ;;  %7520 = vmatprep.subr.bf16.mxu0 %v8058_v5 }
   0xf   : > { %s8028_s5 = smul.u32 216, %s9384_s12  ;;  %s6297_s28 = sshll.u32 %s9384_s12, 1 }
  0x10   : > { %7329 = vmatpush3.bf16.msra.mxu1 %v8057_v4  ;;  %s226_s4 = scalar_lea.vmem %s9374_s3, %s6297_s28 }
  0x11   : > { %7521 = vmatpush3.bf16.msra.mxu0 %v8058_v5  ;;  %7330 = vmatprep.subr.bf16.mxu1 %v8059_v6  ;;  %s8282_s18 = scalar_lea.vmem %s9371_s0, %s8028_s5 }
  0x12   : > { %7522 = vmatprep.subr.bf16.mxu0 %v8060_v7  ;;  %v8069_v12 = vld [vmem:[%s8282_s18] sm:$0xff]   ;;  %v6490_v13 = vld [vmem:[%s8282_s18 + $0xc] sm:$0xf]  ;;  %v6491_v14 = vld [vmem:[%s8282_s18 + $0x10] sm:$0xf] }
  0x13   : > { %7340 = vmatprep.mubr.bf16.mxu1 %v8069_v12  ;;  %v6492_v15 = vld [vmem:[%s8282_s18 + $0x14] sm:$0x1]  ;;  %v2627_v16 = vshrl.u32 %v6490_v13, 16  ;;  %v2630_v17 = vshll.u32 %v6490_v13, 16  ;;  %v2636_v19 = vshll.u32 %v6491_v14, 16  ;;  %v2640_v20 = vshrl.u32 %v6491_v14, 16 }
  0x14   : > { %7331 = vmatpush3.bf16.msra.mxu1 %v8059_v6  ;;  %v2646_v21 = vshll.u32 %v6492_v15, 16  ;;  %v6493_v29 = vld [vmem:[%s8282_s18 + $0x18] sm:$0xf]  ;;  %v6494_v30 = vld [vmem:[%s8282_s18 + $0x1c] sm:$0xf]  ;;  %v8070_v55 = vld [vmem:[%s8282_s18 + $0xc] sm:$0xff]  }
  0x15   : > { %7523 = vmatpush3.bf16.msra.mxu0 %v8060_v7  ;;  %7332 = vmatprep.subr.bf16.mxu1 %v8061_v8  ;;  %v2629_v22 = vrot.slane %v2627_v16, 4  ;;  %v2632_v23 = vrot.slane %v2630_v17, 5  ;;  %v2638_v25 = vrot.slane %v2636_v19, 5  ;;  %v2642_v26 = vrot.slane %v2640_v20, 4  ;;  %v6495_v31 = vld [vmem:[%s8282_s18 + $0x20] sm:$0x1] }
  0x16   : > { %7524 = vmatprep.subr.bf16.mxu0 %v8062_v9  ;;  %v2648_v27 = vrot.slane %v2646_v21, 5  ;;  %v2651_v35 = vshrl.u32 %v6493_v29, 16  ;;  %v2654_v36 = vshll.u32 %v6493_v29, 16  ;;  %v2660_v37 = vshll.u32 %v6494_v30, 16  ;;  %v6496_v53 = vld [vmem:[%s8282_s18 + $0x24] sm:$0xf] }
  0x17   : > { %v2633_v28 = vor.u32 %v2632_v23, %v2629_v22  ;;  %v2643_v34 = vor.u32 %v2642_v26, %v2638_v25  ;;  %v2664_v40 = vshrl.u32 %v6494_v30, 16  ;;  %v2670_v41 = vshll.u32 %v6495_v31, 16  ;;  %v6497_v57 = vld [vmem:[%s8282_s18 + $0x28] sm:$0xf]  ;;  %v6498_v58 = vld [vmem:[%s8282_s18 + $0x2c] sm:$0x1] }
  0x18   : > { %7333 = vmatpush3.bf16.msra.mxu1 %v8061_v8  ;;  %v2653_v43 = vrot.slane %v2651_v35, 4  ;;  %v2656_v44 = vrot.slane %v2654_v36, 5  ;;  %v2662_v45 = vrot.slane %v2660_v37, 5  ;;  %v2675_v59 = vshrl.u32 %v6496_v53, 16  ;;  %v8074_v2 = vld [vmem:[%s8282_s18 + $0x18] sm:$0xff]   ;;  %v8073_v6 = vld [vmem:[%s9372_s1 + $0x148] sm:$0xff]  }
  0x19   : > { %7525 = vmatpush3.bf16.msra.mxu0 %v8062_v9  ;;  %7334 = vmatprep.subr.bf16.mxu1 %v8063_v10  ;;  %v2634_v39 = vrot.slane %v2633_v28, 4  ;;  %v2644_v42 = vrot.slane %v2643_v34, 4  ;;  %v2666_v48 = vrot.slane %v2664_v40, 4  ;;  %v2672_v51 = vrot.slane %v2670_v41, 5  ;;  %v6499_v13 = vld [vmem:[%s8282_s18 + $0x30] sm:$0xf] }
  0x1a   : > { %7526 = vmatprep.subr.bf16.mxu0 %v8064_v11  ;;  %v2657_v50 = vor.u32 %v2656_v44, %v2653_v43  ;;  %v2678_v60 = vshll.u32 %v6496_v53, 16  ;;  %v2684_v62 = vshll.u32 %v6497_v57, 16  ;;  %v2688_v63 = vshrl.u32 %v6497_v57, 16  ;;  %v6500_v14 = vld [vmem:[%s8282_s18 + $0x34] sm:$0xf]  ;;  %v8075_v28 = vld [vmem:[%s8282_s18 + $0x24] sm:$0xff]  }
  0x1b   : > { %v2639_v46 = vsel %vm8305_vm2, %v2634_v39, %v2638_v25  ;;  %v2649_v49 = vsel %vm8305_vm2, %v2644_v42, %v2648_v27  ;;  %v2667_v56 = vor.u32 %v2666_v48, %v2662_v45  ;;  %v2694_v0 = vshll.u32 %v6498_v58, 16  ;;  %v6501_v17 = vld [vmem:[%s8282_s18 + $0x38] sm:$0x1]  ;;  %v8077_v31 = vld [vmem:[%s9372_s1 + $0x150] sm:$0xff]   ;;  %v6502_v39 = vld [vmem:[%s8282_s18 + $0x3c] sm:$0xf] }
  0x1c   : > { %7335 = vmatpush3.bf16.msra.mxu1 %v8063_v10  ;;  %v6554_v54 = vcombine.low %v2639_v46, %v2649_v49  ;;  %v2658_v61 = vrot.slane %v2657_v50, 4  ;;  %v2677_v3 = vrot.slane %v2675_v59, 4  ;;  %v2680_v4 = vrot.slane %v2678_v60, 5  ;;  %v8076_v10 = vld [vmem:[%s9372_s1 + $0x48] sm:$0xff]   ;;  %v8079_v36 = vld [vmem:[%s8282_s18 + $0x30] sm:$0xff]  }
  0x1d   : > { %7527 = vmatpush3.bf16.msra.mxu0 %v8064_v11  ;;  %7336 = vmatprep.subr.bf16.mxu1 %v8065_v18  ;;  %v2668_v1 = vrot.slane %v2667_v56, 4  ;;  %v2686_v7 = vrot.slane %v2684_v62, 5  ;;  %v2690_v8 = vrot.slane %v2688_v63, 4  ;;  %v2696_v9 = vrot.slane %v2694_v0, 5  ;;  %v6503_v40 = vld [vmem:[%s8282_s18 + $0x40] sm:$0xf] }
  0x1e   : > { %7528 = vmatprep.subr.bf16.mxu0 %v8066_v24  ;;  %7532 = vmatprep.mubr.bf16.mxu0 %v6554_v54  ;;  %v2663_v5 = vsel %vm8305_vm2, %v2658_v61, %v2662_v45  ;;  %v2681_v12 = vor.u32 %v2680_v4, %v2677_v3  ;;  %v2702_v19 = vshll.u32 %v6499_v13, 16  ;;  %v2708_v21 = vshll.u32 %v6500_v14, 16  ;;  %v6504_v41 = vld [vmem:[%s8282_s18 + $0x44] sm:$0x1]  ;;  %v8081_v54 = vld [vmem:[%s9372_s1 + $0x50] sm:$0xff]  }
  0x1f   : > { %v2673_v11 = vsel %vm8305_vm2, %v2668_v1, %v2672_v51  ;;  %v2691_v16 = vor.u32 %v2690_v8, %v2686_v7  ;;  %v2712_v22 = vshrl.u32 %v6500_v14, 16  ;;  %v2718_v23 = vshll.u32 %v6501_v17, 16  ;;  %v6505_v58 = vld [vmem:[%s8282_s18 + $0x48] sm:$0xf]  ;;  %v6506_v61 = vld [vmem:[%s8282_s18 + $0x4c] sm:$0xf] }
  0x20   : > { %7337 = vmatpush3.bf16.msra.mxu1 %v8065_v18  ;;  %v6555_v15 = vcombine.low %v2663_v5, %v2673_v11  ;;  %v2699_v18 = vshrl.u32 %v6499_v13, 16  ;;  %v2682_v20 = vrot.slane %v2681_v12, 4  ;;  %v2704_v26 = vrot.slane %v2702_v19, 5  ;;  %v6507_v62 = vld [vmem:[%s8282_s18 + $0x50] sm:$0x1]  ;;  %v8082_v8 = vld [vmem:[%s9372_s1 + $0x160] sm:$0xff]  }
  0x21   : > { %7529 = vmatpush3.bf16.msra.mxu0 %v8066_v24  ;;  %7338 = vmatprep.subr.bf16.mxu1 %v8067_v32  ;;  %v2692_v24 = vrot.slane %v2691_v16, 4  ;;  %v2710_v29 = vrot.slane %v2708_v21, 5  ;;  %v2714_v30 = vrot.slane %v2712_v22, 4  ;;  %v2720_v35 = vrot.slane %v2718_v23, 5  ;;  %v6508_v19 = vld [vmem:[%s8282_s18 + $0x54] sm:$0xf] }
  0x22   : > { %7530 = vmatprep.subr.bf16.mxu0 %v8068_v38  ;;  %v2701_v25 = vrot.slane %v2699_v18, 4  ;;  %v2687_v27 = vsel %vm8305_vm2, %v2682_v20, %v2686_v7  ;;  %v2723_v43 = vshrl.u32 %v6502_v39, 16  ;;  %v2726_v44 = vshll.u32 %v6502_v39, 16  ;;  %v8084_v18 = vld [vmem:[%s8282_s18 + $0x48] sm:$0xff]   ;;  %v6509_v20 = vld [vmem:[%s8282_s18 + $0x58] sm:$0xf] }
  0x23   : > { %v2732_v45 = vshll.u32 %v6503_v40, 16  ;;  %v2736_v48 = vshrl.u32 %v6503_v40, 16  ;;  %v2742_v49 = vshll.u32 %v6504_v41, 16  ;;  %v2747_v63 = vshrl.u32 %v6505_v58, 16  ;;  %v8083_v23 = vld [vmem:[%s9372_s1 + $0x168] sm:$0xff]   ;;  %v8085_v39 = vld [vmem:[%s8282_s18 + $0x54] sm:$0xff]  }
  0x24   : > { %7339 = vmatpush3.bf16.msra.mxu1 %v8067_v32  ;;  %v2697_v32 = vsel %vm8305_vm2, %v2692_v24, %v2696_v9  ;;  %v2705_v34 = vor.u32 %v2704_v26, %v2701_v25  ;;  %v2725_v51 = vrot.slane %v2723_v43, 4  ;;  %v2750_v0 = vshll.u32 %v6505_v58, 16  ;;  %v6510_v24 = vld [vmem:[%s8282_s18 + $0x5c] sm:$0x1]  ;;  %v6511_v43 = vld [vmem:[%s8282_s18 + $0x60] sm:$0xf] }
  0x25   : > { %7531 = vmatpush3.bf16.msra.mxu0 %v8068_v38  ;;  %7372 = vmatprep.subr.bf16.mxu1 %v8071_v47  ;;  %v6556_v37 = vcombine.low %v2687_v27, %v2697_v32  ;;  %v2715_v38 = vor.u32 %v2714_v30, %v2710_v29  ;;  %v2734_v53 = vrot.slane %v2732_v45, 5  ;;  %v2738_v56 = vrot.slane %v2736_v48, 4  ;;  %v8086_v40 = vld [vmem:[%s9372_s1 + $0x58] sm:$0xff]   ;;  %v6513_v45 = vld [vmem:[%s8282_s18 + $0x68] sm:$0x1] }
  0x26   : > { %7564 = vmatprep.subr.bf16.mxu0 %v8072_v52  ;;  %v2706_v42 = vrot.slane %v2705_v34, 4  ;;  %v2744_v57 = vrot.slane %v2742_v49, 5  ;;  %v2760_v3 = vshrl.u32 %v6506_v61, 16  ;;  %v2766_v4 = vshll.u32 %v6507_v62, 16 }
  0x27   : > { %7341 = vmatmul.mubr.bf16.vlgmr.msra.gmra.mrb[0].mxu1 %v8070_v55  ;;  %v2716_v46 = vrot.slane %v2715_v38, 4  ;;  %v2739_v1 = vor.u32 %v2738_v56, %v2734_v53  ;;  %v2752_v7 = vrot.slane %v2750_v0, 5  ;;  %v2771_v25 = vshrl.u32 %v6508_v19, 16  ;;  %v6578_v0 = vld [vmem:[%s8282_s18 + $0xc] sm:$0xe] }
  0x28   : > { %7533 = vmatmul.mubr.bf16.vlgmr.msra.gmra.mrb[0].mxu0 %v6555_v15  ;;  %7373 = vmatpush3.bf16.msra.mxu1 %v8071_v47  ;;  %v8078_v47 = vld [vmem:[%s9372_s1 + $0x158] sm:$0xff]   ;;  %v2711_v50 = vsel %vm8305_vm2, %v2706_v42, %v2710_v29  ;;  %v2762_v12 = vrot.slane %v2760_v3, 4  ;;  %v2768_v17 = vrot.slane %v2766_v4, 5  ;;  %v2774_v26 = vshll.u32 %v6508_v19, 16 }
  0x29   : > { %7565 = vmatpush3.bf16.msra.mxu0 %v8072_v52  ;;  %7344 = vmatprep.mubr.bf16.mxu1 %v8074_v2  ;;  %v2728_v52 = vrot.slane %v2726_v44, 5  ;;  %v2721_v55 = vsel %vm8305_vm2, %v2716_v46, %v2720_v35  ;;  %v2756_v2 = vshll.u32 %v6506_v61, 16  ;;  %v2740_v9 = vrot.slane %v2739_v1, 4  ;;  %v6512_v44 = vld [vmem:[%s8282_s18 + $0x64] sm:$0xf] }
  0x2a   : > { %7566 = vmatprep.subr.bf16.mxu0 %v8073_v6  ;;  %7374 = vmatprep.subr.bf16.mxu1 %v8076_v10  ;;  %v6557_v59 = vcombine.low %v2711_v50, %v2721_v55  ;;  %v2784_v29 = vshrl.u32 %v6509_v20, 16  ;;  %v2790_v30 = vshll.u32 %v6510_v24, 16  ;;  %v2773_v32 = vrot.slane %v2771_v25, 4  ;;  %v8087_v50 = vld [vmem:[%s9372_s1 + $0x170] sm:$0xff]  }
  0x2b   : > { %7536 = vmatprep.mubr.bf16.mxu0 %v6556_v37  ;;  %v2729_v60 = vor.u32 %v2728_v52, %v2725_v51  ;;  %v2758_v11 = vrot.slane %v2756_v2, 5  ;;  %v2745_v15 = vsel %vm8305_vm2, %v2740_v9, %v2744_v57  ;;  %v2776_v34 = vrot.slane %v2774_v26, 5 }
  0x2c   : > { %7375 = vmatpush3.bf16.msra.mxu1 %v8076_v10  ;;  %v8080_v10 = vld [vmem:[%s8282_s18 + $0x3c] sm:$0xff]   ;;  %v2786_v37 = vrot.slane %v2784_v29, 4  ;;  %v2792_v38 = vrot.slane %v2790_v30, 5  ;;  %v2798_v48 = vshll.u32 %v6511_v43, 16  ;;  %v2804_v49 = vshll.u32 %v6512_v44, 16 }
  0x2d   : > { %7567 = vmatpush3.bf16.msra.mxu0 %v8073_v6  ;;  %7376 = vmatprep.subr.bf16.mxu1 %v8081_v54  ;;  %v2730_v5 = vrot.slane %v2729_v60, 4  ;;  %v2749_v6 = vrot.slane %v2747_v63, 4  ;;  %v2763_v16 = vor.u32 %v2762_v12, %v2758_v11  ;;  %v2777_v42 = vor.u32 %v2776_v34, %v2773_v32  ;;  %v8088_v60 = vld [vmem:[%s9372_s1 + $0x178] sm:$0xff]   ;;  %v8089_v63 = vld [vmem:[%s8282_s18 + $0x60] sm:$0xff]   ;;  %v6586_v32 = vld [vmem:[%s8282_s18 + $0x2c] sm:$0x1] }
  0x2e   : > { %7568 = vmatprep.subr.bf16.mxu0 %v8077_v31  ;;  %v2808_v52 = vshrl.u32 %v6512_v44, 16  ;;  %v2800_v56 = vrot.slane %v2798_v48, 5  ;;  %v2806_v57 = vrot.slane %v2804_v49, 5  ;;  %v6584_v29 = vld [vmem:[%s8282_s18 + $0x24] sm:$0xe]  ;;  %v8096_v48 = vld [vmem:[%s9372_s1 + $0x188] sm:$0xff]  }
  0x2f   : > { %7345 = vmatmul.mubr.bf16.gmra.mrb[4].mxu1 %v8075_v28  ;;  %v2735_v13 = vsel %vm8305_vm2, %v2730_v5, %v2734_v53  ;;  %v2753_v14 = vor.u32 %v2752_v7, %v2749_v6  ;;  %v2764_v27 = vrot.slane %v2763_v16, 4  ;;  %v2780_v28 = vshll.u32 %v6509_v20, 16  ;;  %v6579_v5 = vld [vmem:[%s8282_s18 + $0x10] sm:$0xf]  ;;  %v6580_v6 = vld [vmem:[%s8282_s18 + $0x14] sm:$0x1] }
  0x30   : > { %7348 = vmatprep.mubr.bf16.mxu1 %v8079_v36  ;;  %7377 = vmatpush3.bf16.msra.mxu1 %v8081_v54  ;;  %v6558_v21 = vcombine.low %v2735_v13, %v2745_v15  ;;  %v2778_v51 = vrot.slane %v2777_v42, 4  ;;  %v2814_v53 = vshll.u32 %v6513_v45, 16  ;;  %v6626_v7 = vrot.slane %v6578_v0, 9  ;;  %v8092_v13 = vld [vmem:[%s9372_s1 + $0x180] sm:$0xff]   ;;  %v6582_v20 = vld [vmem:[%s8282_s18 + $0x1c] sm:$0xf] }
  0x31   : > { %7569 = vmatpush3.bf16.msra.mxu0 %v8077_v31  ;;  %v2754_v22 = vrot.slane %v2753_v14, 4  ;;  %v2769_v35 = vsel %vm8305_vm2, %v2764_v27, %v2768_v17  ;;  %v2782_v36 = vrot.slane %v2780_v28, 5  ;;  %7378 = vmatprep.subr.bf16.mxu1 %v8086_v40  ;;  %v3494_v9 = vrot.slane %v6579_v5, 5  ;;  %v8090_v17 = vld [vmem:[%s8282_s18 + $0x6c] sm:$0xff]   ;;  %v8094_v42 = vld [vmem:[%s8282_s18 + $0x84] sm:$0xff]  }
  0x32   : > { %7537 = vmatmul.mubr.bf16.gmra.mrb[4].mxu0 %v6557_v59  ;;  %7570 = vmatprep.subr.bf16.mxu0 %v8078_v47  ;;  %v2810_v59 = vrot.slane %v2808_v52, 4  ;;  %v2816_v3 = vrot.slane %v2814_v53, 5  ;;  %v3501_v26 = vrot.slane %v6582_v20, 5  ;;  %v6628_v34 = vrot.slane %v6584_v29, 9  ;;  %v6588_v44 = vld [vmem:[%s8282_s18 + $0x34] sm:$0xf] }
  0x33   : > { %7540 = vmatprep.mubr.bf16.mxu0 %v6558_v21  ;;  %v2759_v31 = vsel %vm8305_vm2, %v2754_v22, %v2758_v11  ;;  %v2787_v46 = vor.u32 %v2786_v37, %v2782_v36  ;;  %v2783_v58 = vsel %vm8305_vm2, %v2778_v51, %v2782_v36  ;;  %v8091_v11 = vld [vmem:[%s9372_s1 + $0x60] sm:$0xff]   ;;  %v3495_v15 = vsel %vm8405_vm5, %v6626_v7, %v3494_v9  ;;  %v6593_v0 = vld [vmem:[%s8282_s18 + $0x48] sm:$0xe]  ;;  %v6594_v5 = vld [vmem:[%s8282_s18 + $0x4c] sm:$0xf] }
  0x34   : > { %v6559_v41 = vcombine.low %v2759_v31, %v2769_v35  ;;  %7379 = vmatpush3.bf16.msra.mxu1 %v8086_v40  ;;  %v2811_v2 = vor.u32 %v2810_v59, %v2806_v57  ;;  %v3496_v16 = vrot.slane %v3494_v9, 4  ;;  %v6583_v21 = vld [vmem:[%s8282_s18 + $0x20] sm:$0x1]  ;;  %v3503_v30 = vrot.slane %v3501_v26, 4  ;;  %v6585_v31 = vld [vmem:[%s8282_s18 + $0x28] sm:$0xf] }
  0x35   : > { %7571 = vmatpush3.bf16.msra.mxu0 %v8078_v47  ;;  %v2795_v47 = vshrl.u32 %v6511_v43, 16  ;;  %v2788_v54 = vrot.slane %v2787_v46, 4  ;;  %7380 = vmatprep.subr.bf16.mxu1 %v8091_v11  ;;  %v3504_v27 = vrot.slane %v6583_v21, 5  ;;  %v3508_v36 = vrot.slane %v6585_v31, 5  ;;  %v6587_v43 = vld [vmem:[%s8282_s18 + $0x30] sm:$0xe] }
  0x36   : > { %7572 = vmatprep.subr.bf16.mxu0 %v8082_v8  ;;  %v2812_v12 = vrot.slane %v2811_v2, 4  ;;  %v3511_v37 = vrot.slane %v6586_v32, 5  ;;  %v6589_v46 = vld [vmem:[%s8282_s18 + $0x38] sm:$0x1]  ;;  %v8099_v59 = vld [vmem:[%s9372_s1 + $0x70] sm:$0xff]   ;;  %v6631_v7 = vrot.slane %v6593_v0, 9 }
  0x37   : > { %7349 = vmatmul.mubr.bf16.gmra.mrb[8].mxu1 %v8080_v10  ;;  %v2797_v55 = vrot.slane %v2795_v47, 4  ;;  %v2793_v61 = vsel %vm8305_vm2, %v2788_v54, %v2792_v38  ;;  %v3497_v10 = vrot.slane %v6580_v6, 5  ;;  %v3505_v38 = vsel %vm8405_vm5, %v3503_v30, %v3504_v27  ;;  %v8097_v54 = vld [vmem:[%s8282_s18 + $0x90] sm:$0xff]   ;;  %v6599_v27 = vld [vmem:[%s8282_s18 + $0x60] sm:$0xe]  ;;  %v8104_v31 = vld [vmem:[%s9372_s1 + $0x198] sm:$0xff]  }
  0x38   : > { %7352 = vmatprep.mubr.bf16.mxu1 %v8084_v18  ;;  %v6560_v1 = vcombine.low %v2783_v58, %v2793_v61  ;;  %v6581_v18 = vld [vmem:[%s8282_s18 + $0x18] sm:$0xe]  ;;  %v2817_v19 = vsel %vm8305_vm2, %v2812_v12, %v2816_v3  ;;  %7381 = vmatpush3.bf16.msra.mxu1 %v8091_v11  ;;  %v3509_v40 = vsel %vm8405_vm5, %v6628_v34, %v3508_v36  ;;  %v3515_v47 = vrot.slane %v6588_v44, 5  ;;  %v8098_v3 = vld [vmem:[%s8282_s18 + $0x9c] sm:$0xff]   ;;  %v6595_v6 = vld [vmem:[%s8282_s18 + $0x50] sm:$0x1] }
  0x39   : > { %7573 = vmatpush3.bf16.msra.mxu0 %v8082_v8  ;;  %v2801_v62 = vor.u32 %v2800_v56, %v2797_v55  ;;  %v6627_v22 = vrot.slane %v6581_v18, 9  ;;  %v3498_v25 = vsel %vm8405_vm5, %v3496_v16, %v3497_v10  ;;  %v3518_v51 = vrot.slane %v6589_v46, 5  ;;  %v6590_v55 = vld [vmem:[%s8282_s18 + $0x3c] sm:$0xe]  ;;  %v6591_v56 = vld [vmem:[%s8282_s18 + $0x40] sm:$0xf] }
  0x3a   : > { %7574 = vmatprep.subr.bf16.mxu0 %v8083_v23  ;;  %7541 = vmatmul.mubr.bf16.gmra.mrb[8].mxu0 %v6559_v41  ;;  %v6658_v28 = vcombine.low %v3495_v15, %v3498_v25  ;;  %v3510_v41 = vrot.slane %v3508_v36, 4  ;;  %v3517_v53 = vrot.slane %v3515_v47, 4  ;;  %v6630_v58 = vrot.slane %v6590_v55, 9  ;;  %v8100_v12 = vld [vmem:[%s9372_s1 + $0x190] sm:$0xff]   ;;  %v8101_v15 = vld [vmem:[%s8282_s18 + $0xa8] sm:$0xff]  }
  0x3b   : > { %v2802_v8 = vrot.slane %v2801_v62, 4  ;;  %7544 = vmatprep.mubr.bf16.mxu0 %v6560_v1  ;;  %v3502_v35 = vsel %vm8405_vm5, %v6627_v22, %v3501_v26  ;;  %v3532_v11 = vrot.slane %v6595_v6, 5  ;;  %v6596_v16 = vld [vmem:[%s8282_s18 + $0x54] sm:$0xe]  ;;  %v6598_v18 = vld [vmem:[%s8282_s18 + $0x5c] sm:$0x1] }
  0x3c   : > { %v6659_v45 = vcombine.low %v3502_v35, %v3505_v38  ;;  %v3512_v49 = vsel %vm8405_vm5, %v3510_v41, %v3511_v37  ;;  %v3539_v21 = vrot.slane %v6598_v18, 5  ;;  %v8103_v26 = vld [vmem:[%s9372_s1 + $0x78] sm:$0xff]   ;;  %v6601_v29 = vld [vmem:[%s8282_s18 + $0x68] sm:$0x1]  ;;  %v6633_v30 = vrot.slane %v6599_v27, 9 }
  0x3d   : > { %7575 = vmatpush3.bf16.msra.mxu0 %v8083_v23  ;;  %v2807_v14 = vsel %vm8305_vm2, %v2802_v8, %v2806_v57  ;;  %v8093_v23 = vld [vmem:[%s8282_s18 + $0x78] sm:$0xff]   ;;  %v6660_v52 = vcombine.low %v3509_v40, %v3512_v49  ;;  %v6592_v57 = vld [vmem:[%s8282_s18 + $0x44] sm:$0x1]  ;;  %v3529_v8 = vrot.slane %v6594_v5, 5  ;;  %v3546_v36 = vrot.slane %v6601_v29, 5 }
  0x3e   : > { %7576 = vmatprep.subr.bf16.mxu0 %v8087_v50  ;;  %v6561_v24 = vcombine.low %v2807_v14, %v2817_v19  ;;  %v3525_v61 = vrot.slane %v6592_v57, 5  ;;  %v6632_v19 = vrot.slane %v6596_v16, 9  ;;  %v8102_v34 = vld [vmem:[%s8282_s18 + $0xb4] sm:$0xff]   ;;  %v710_v40 = vld [vmem:[%s8282_s18 + $0x4] sm:$0xf] }
  0x3f   : > { %7353 = vmatmul.mubr.bf16.gmra.mrb[12].mxu1 %v8085_v39  ;;  %v8095_v39 = vld [vmem:[%s9372_s1 + $0x68] sm:$0xff]   ;;  %v3531_v14 = vrot.slane %v3529_v8, 4  ;;  %v3530_v22 = vsel %vm8405_vm5, %v6631_v7, %v3529_v8  ;;  %v774_v49 = vshrl.u32 %v710_v40, 16  ;;  %v713_v5 = vld [vmem:[%s8282_s18 + $0x10] sm:$0xf] }
  0x40   : > { %7356 = vmatprep.mubr.bf16.mxu1 %v8089_v63  ;;  %7382 = vmatprep.subr.bf16.mxu1 %v8095_v39  ;;  %v3519_v63 = vsel %vm8405_vm5, %v3517_v53, %v3518_v51  ;;  %v711_v41 = vld [vmem:[%s8282_s18 + $0x8] sm:$0x1]  ;;  %v6602_v46 = vld [vmem:[%s8282_s18 + $0x6c] sm:$0xe]  ;;  %v6603_v51 = vld [vmem:[%s8282_s18 + $0x70] sm:$0xf] }
  0x41   : > { %7577 = vmatpush3.bf16.msra.mxu0 %v8087_v50  ;;  %v6629_v50 = vrot.slane %v6587_v43, 9  ;;  %7383 = vmatpush3.bf16.msra.mxu1 %v8095_v39  ;;  %v709_v39 = vld [vmem:[%s8282_s18] sm:$0xf]  ;;  %v3550_v57 = vrot.slane %v6603_v51, 5  ;;  %v714_v6 = vld [vmem:[%s8282_s18 + $0x14] sm:$0x1] }
  0x42   : > { %7578 = vmatprep.subr.bf16.mxu0 %v8088_v60  ;;  %7545 = vmatmul.mubr.bf16.gmra.mrb[12].mxu0 %v6561_v24  ;;  %v761_v44 = vshrl.u32 %v709_v39, 16  ;;  %v6607_v29 = vld [vmem:[%s8282_s18 + $0x80] sm:$0x1] }
  0x43   : > { %7580 = vmatprep.mubr.bf16.mxu0 %v6658_v28  ;;  %v3516_v62 = vsel %vm8405_vm5, %v6629_v50, %v3515_v47  ;;  %7384 = vmatprep.subr.bf16.mxu1 %v8099_v59  ;;  %v6600_v28 = vld [vmem:[%s8282_s18 + $0x64] sm:$0xf]  ;;  %v780_v50 = vshll.u32 %v711_v41, 16  ;;  %v716_v41 = vld [vmem:[%s8282_s18 + $0x1c] sm:$0xf] }
  0x44   : > { %v6661_v9 = vcombine.low %v3516_v62, %v3519_v63  ;;  %v3543_v35 = vrot.slane %v6600_v28, 5  ;;  %v8506_v47 = vld [vmem:[%s9372_s1 + $0x80] sm:$0xff]   ;;  %v712_v63 = vld [vmem:[%s8282_s18 + $0xc] sm:$0xf]  ;;  %v822_v51 = vshrl.u32 %v716_v41, 16 }
  0x45   : > { %7579 = vmatpush3.bf16.msra.mxu0 %v8088_v60  ;;  %v3522_v60 = vrot.slane %v6591_v56, 5  ;;  %7385 = vmatpush3.bf16.msra.mxu1 %v8099_v59  ;;  %v6604_v56 = vld [vmem:[%s8282_s18 + $0x74] sm:$0x1]  ;;  %v782_v62 = vrot.slane %v780_v50, 5  ;;  %v785_v8 = vshrl.u32 %v712_v63, 16 }
  0x46   : > { %7612 = vmatprep.subr.bf16.mxu0 %v8092_v13  ;;  %7386 = vmatprep.subr.bf16.mxu1 %v8103_v26  ;;  %v3545_v43 = vrot.slane %v3543_v35, 4 }
  0x47   : > { %7357 = vmatmul.mubr.bf16.gmra.mrb[16].mxu1 %v8090_v17  ;;  %v3523_v1 = vsel %vm8405_vm5, %v6630_v58, %v3522_v60  ;;  %v3524_v2 = vrot.slane %v3522_v60, 4  ;;  %v6597_v17 = vld [vmem:[%s8282_s18 + $0x58] sm:$0xf]  ;;  %v8106_v58 = vld [vmem:[%s9372_s1 + $0x1a0] sm:$0xff]   ;;  %v787_v18 = vrot.slane %v785_v8, 4 }
  0x48   : > { %7360 = vmatprep.mubr.bf16.mxu1 %v8093_v23  ;;  %v3536_v20 = vrot.slane %v6597_v17, 5  ;;  %v3533_v23 = vsel %vm8405_vm5, %v3531_v14, %v3532_v11  ;;  %v3547_v53 = vsel %vm8405_vm5, %v3545_v43, %v3546_v36  ;;  %v8108_v11 = vld [vmem:[%s9372_s1 + $0x1a8] sm:$0xff]   ;;  %v798_v14 = vshrl.u32 %v713_v5, 16  ;;  %v715_v36 = vld [vmem:[%s8282_s18 + $0x18] sm:$0xf] }
  0x49   : > { %v3526_v10 = vsel %vm8405_vm5, %v3524_v2, %v3525_v61  ;;  %v6663_v37 = vcombine.low %v3530_v22, %v3533_v23  ;;  %7387 = vmatpush3.bf16.msra.mxu1 %v8103_v26  ;;  %v776_v61 = vrot.slane %v774_v49, 4  ;;  %v3552_v2 = vrot.slane %v3550_v57, 4  ;;  %v6606_v26 = vld [vmem:[%s8282_s18 + $0x7c] sm:$0xf] }
  0x4a   : > { %7581 = vmatmul.mubr.bf16.vlgmr.msra.gmra.mrb[0].mxu0 %v6659_v45  ;;  %v3537_v24 = vsel %vm8405_vm5, %v6632_v19, %v3536_v20  ;;  %v3538_v25 = vrot.slane %v3536_v20, 4  ;;  %v764_v45 = vshll.u32 %v709_v39, 16  ;;  %7420 = vmatprep.subr.bf16.mxu1 %v8506_v47  ;;  %v6605_v20 = vld [vmem:[%s8282_s18 + $0x78] sm:$0xe] }
  0x4b   : > { %7613 = vmatpush3.bf16.msra.mxu0 %v8092_v13  ;;  %7584 = vmatprep.mubr.bf16.mxu0 %v6660_v52  ;;  %v6662_v13 = vcombine.low %v3523_v1, %v3526_v10  ;;  %v6634_v52 = vrot.slane %v6602_v46, 9  ;;  %v794_v10 = vshll.u32 %v713_v5, 16  ;;  %v818_v46 = vshll.u32 %v716_v41, 16 }
  0x4c   : > { %7614 = vmatprep.subr.bf16.mxu0 %v8096_v48  ;;  %v3540_v32 = vsel %vm8405_vm5, %v3538_v25, %v3539_v21  ;;  %v766_v55 = vrot.slane %v764_v45, 5  ;;  %v8110_v21 = vld [vmem:[%s9372_s1 + $0x1b0] sm:$0xff]   ;;  %v812_v45 = vshll.u32 %v715_v36, 16 }
  0x4d   : > { %v6664_v38 = vcombine.low %v3537_v24, %v3540_v32  ;;  %v3551_v1 = vsel %vm8405_vm5, %v6634_v52, %v3550_v57  ;;  %v796_v23 = vrot.slane %v794_v10, 5  ;;  %v800_v24 = vrot.slane %v798_v14, 4 }
  0x4f   : > { %7361 = vmatmul.mubr.bf16.gmra.mrb[20].mxu1 %v8094_v42  ;;  %7615 = vmatpush3.bf16.msra.mxu0 %v8096_v48  ;;  %v8500_v42 = vsel %vm8405_vm5, %v6633_v30, %v3543_v35  ;;  %v770_v48 = vshll.u32 %v710_v40, 16  ;;  %v6635_v30 = vrot.slane %v6605_v20, 9  ;;  %v3560_v35 = vrot.slane %v6607_v29, 5 }
  0x50   : > { %7364 = vmatprep.mubr.bf16.mxu1 %v8097_v54  ;;  %7616 = vmatprep.subr.bf16.mxu0 %v8100_v12  ;;  %v763_v54 = vrot.slane %v761_v44, 4  ;;  %v6665_v59 = vcombine.low %v8500_v42, %v3547_v53  ;;  %v717_v42 = vld [vmem:[%s8282_s18 + $0x20] sm:$0x1]  ;;  %v809_v44 = vshrl.u32 %v715_v36, 16  ;;  %v6609_v53 = vld [vmem:[%s8282_s18 + $0x88] sm:$0xf] }
  0x51   : > { %v772_v60 = vrot.slane %v770_v48, 5  ;;  %v6608_v48 = vld [vmem:[%s8282_s18 + $0x84] sm:$0xe]  ;;  %v828_v52 = vshll.u32 %v717_v42, 16 }
  0x52   : > { %7585 = vmatmul.mubr.bf16.gmra.mrb[4].mxu0 %v6661_v9  ;;  %v767_v0 = vor.u32 %v766_v55, %v763_v54  ;;  %v788_v9 = vshll.u32 %v712_v63, 16  ;;  %v6610_v54 = vld [vmem:[%s8282_s18 + $0x8c] sm:$0x1]  ;;  %v811_v57 = vrot.slane %v809_v44, 4  ;;  %v824_v63 = vrot.slane %v822_v51, 4 }
  0x53   : > { %7588 = vmatprep.mubr.bf16.mxu0 %v6662_v13  ;;  %7617 = vmatpush3.bf16.msra.mxu0 %v8100_v12  ;;  %v777_v7 = vor.u32 %v776_v61, %v772_v60  ;;  %v6636_v5 = vrot.slane %v6608_v48, 9  ;;  %v6615_v51 = vld [vmem:[%s8282_s18 + $0xa0] sm:$0xf] }
  0x54   : > { %7618 = vmatprep.subr.bf16.mxu0 %v8104_v31  ;;  %v768_v12 = vrot.slane %v767_v0, 4  ;;  %v790_v19 = vrot.slane %v788_v9, 5  ;;  %v830_v0 = vrot.slane %v828_v52, 5 }
  0x55   : > { %v778_v16 = vrot.slane %v777_v7, 4  ;;  %v3567_v7 = vrot.slane %v6610_v54, 5 }
  0x56   : > { %v773_v22 = vsel %vm8305_vm2, %v768_v12, %v772_v60  ;;  %v791_v28 = vor.u32 %v790_v19, %v787_v18  ;;  %v719_v60 = vld [vmem:[%s8282_s18 + $0x28] sm:$0xf]  ;;  %v8109_v12 = vld [vmem:[%s9372_s1 + $0x90] sm:$0xff]   ;;  %v8570_v18 = vld [vmem:[%s9372_s1 + $0x1c0] sm:$0xff]  }
  0x57   : > { %7365 = vmatmul.mubr.bf16.gmra.mrb[24].mxu1 %v8098_v3  ;;  %7619 = vmatpush3.bf16.msra.mxu0 %v8104_v31  ;;  %v3553_v3 = vrot.slane %v6604_v56, 5  ;;  %v783_v27 = vsel %vm8305_vm2, %v778_v16, %v782_v62  ;;  %v3557_v31 = vrot.slane %v6606_v26, 5  ;;  %v820_v62 = vrot.slane %v818_v46, 5 }
  0x58   : > { %7368 = vmatprep.mubr.bf16.mxu1 %v8101_v15  ;;  %7620 = vmatprep.subr.bf16.mxu0 %v8106_v58  ;;  %v804_v15 = vshll.u32 %v714_v6, 16  ;;  %v6338_v32 = vcombine.low %v773_v22, %v783_v27  ;;  %v3564_v6 = vrot.slane %v6609_v53, 5  ;;  %v846_v16 = vshrl.u32 %v719_v60, 16  ;;  %v6613_v27 = vld [vmem:[%s8282_s18 + $0x98] sm:$0x1] }
  0x59   : > { %v3554_v13 = vsel %vm8405_vm5, %v3552_v2, %v3553_v3  ;;  %v3558_v39 = vsel %vm8405_vm5, %v6635_v30, %v3557_v31  ;;  %v3559_v40 = vrot.slane %v3557_v31, 4  ;;  %v8107_v2 = vld [vmem:[%s9372_s1 + $0x88] sm:$0xff]   ;;  %v825_v8 = vor.u32 %v824_v63, %v820_v62 }
  0x5a   : > { %7589 = vmatmul.mubr.bf16.gmra.mrb[8].mxu0 %v6663_v37  ;;  %v6666_v17 = vcombine.low %v3551_v1, %v3554_v13  ;;  %v806_v25 = vrot.slane %v804_v15, 5  ;;  %v8112_v37 = vld [vmem:[%s9372_s1 + $0x1b8] sm:$0xff]   ;;  %v720_v1 = vld [vmem:[%s8282_s18 + $0x2c] sm:$0x1]  ;;  %v3565_v14 = vsel %vm8405_vm5, %v6636_v5, %v3564_v6  ;;  %v3566_v15 = vrot.slane %v3564_v6, 4  ;;  %v8114_v5 = vld [vmem:[%s9372_s1 + $0xa0] sm:$0xff]  }
  0x5b   : > { %7592 = vmatprep.mubr.bf16.mxu0 %v6664_v38  ;;  %7621 = vmatpush3.bf16.msra.mxu0 %v8106_v58  ;;  %v792_v38 = vrot.slane %v791_v28, 4  ;;  %v3561_v50 = vsel %vm8405_vm5, %v3559_v40, %v3560_v35  ;;  %v814_v58 = vrot.slane %v812_v45, 5  ;;  %v826_v19 = vrot.slane %v825_v8, 4  ;;  %v723_v40 = vld [vmem:[%s8282_s18 + $0x38] sm:$0x1] }
  0x5c   : > { %7622 = vmatprep.subr.bf16.mxu0 %v8108_v11  ;;  %v6667_v56 = vcombine.low %v3558_v39, %v3561_v50  ;;  %v852_v26 = vshll.u32 %v720_v1, 16  ;;  %v722_v39 = vld [vmem:[%s8282_s18 + $0x34] sm:$0xf]  ;;  %v3574_v42 = vrot.slane %v6613_v27, 5  ;;  %v6614_v45 = vld [vmem:[%s8282_s18 + $0x9c] sm:$0xe] }
  0x5d   : > { %v797_v49 = vsel %vm8305_vm2, %v792_v38, %v796_v23  ;;  %v815_v3 = vor.u32 %v814_v58, %v811_v57  ;;  %v831_v28 = vsel %vm8305_vm2, %v826_v19, %v830_v0  ;;  %v866_v50 = vshll.u32 %v722_v39, 16 }
  0x5e   : > { %v3578_v8 = vrot.slane %v6615_v51, 5 }
  0x5f   : > { %7369 = vmatmul.mubr.bf16.gmra.mrb[28].mxu1 %v8102_v34  ;;  %v801_v34 = vor.u32 %v800_v24, %v796_v23  ;;  %7623 = vmatpush3.bf16.msra.mxu0 %v8108_v11  ;;  %v842_v11 = vshll.u32 %v719_v60, 16  ;;  %v816_v13 = vrot.slane %v815_v3, 4  ;;  %v3568_v24 = vsel %vm8405_vm5, %v3566_v15, %v3567_v7  ;;  %v726_v3 = vld [vmem:[%s8282_s18 + $0x44] sm:$0x1] }
  0x60   : > { %7624 = vmatprep.subr.bf16.mxu0 %v8110_v21  ;;  %7388 = vmatprep.mubr.bf16.mxu1 %v6338_v32  ;;  %v6668_v29 = vcombine.low %v3565_v14, %v3568_v24  ;;  %v721_v32 = vld [vmem:[%s8282_s18 + $0x30] sm:$0xf]  ;;  %v876_v60 = vshll.u32 %v723_v40, 16  ;;  %v6638_v7 = vrot.slane %v6614_v45, 9  ;;  %v6617_v14 = vld [vmem:[%s8282_s18 + $0xa8] sm:$0xe] }
  0x61   : > { %v802_v43 = vrot.slane %v801_v34, 4  ;;  %v844_v22 = vrot.slane %v842_v11, 5  ;;  %v821_v23 = vsel %vm8305_vm2, %v816_v13, %v820_v62  ;;  %v8111_v34 = vld [vmem:[%s9372_s1 + $0x98] sm:$0xff]   ;;  %v860_v44 = vshll.u32 %v721_v32, 16  ;;  %v725_v62 = vld [vmem:[%s8282_s18 + $0x40] sm:$0xf] }
  0x62   : > { %7593 = vmatmul.mubr.bf16.gmra.mrb[12].mxu0 %v6665_v59  ;;  %v718_v59 = vld [vmem:[%s8282_s18 + $0x24] sm:$0xf]  ;;  %v6340_v35 = vcombine.low %v821_v23, %v831_v28  ;;  %v878_v6 = vrot.slane %v876_v60, 5  ;;  %v3579_v15 = vsel %vm8405_vm5, %v6638_v7, %v3578_v8  ;;  %v894_v19 = vshrl.u32 %v725_v62, 16  ;;  %v6619_v24 = vld [vmem:[%s8282_s18 + $0xb0] sm:$0x1] }
  0x63   : > { %7596 = vmatprep.mubr.bf16.mxu0 %v6666_v17  ;;  %v807_v55 = vsel %vm8305_vm2, %v802_v43, %v806_v25  ;;  %7625 = vmatpush3.bf16.msra.mxu0 %v8110_v21  ;;  %v833_v9 = vshrl.u32 %v718_v59, 16  ;;  %v836_v10 = vshll.u32 %v718_v59, 16  ;;  %v6611_v17 = vld [vmem:[%s8282_s18 + $0x90] sm:$0xe]  ;;  %v848_v25 = vrot.slane %v846_v16, 4  ;;  %v8126_v7 = vld [vmem:[%s9372_s1 + $0xb8] sm:$0xff]  }
  0x64   : > { %v6339_v61 = vcombine.low %v797_v49, %v807_v55  ;;  %7626 = vmatprep.subr.bf16.mxu0 %v8112_v37  ;;  %v6637_v31 = vrot.slane %v6611_v17, 9  ;;  %v857_v43 = vshrl.u32 %v721_v32, 16  ;;  %v862_v54 = vrot.slane %v860_v44, 5 }
  0x65   : > { %v835_v20 = vrot.slane %v833_v9, 4  ;;  %v838_v21 = vrot.slane %v836_v10, 5  ;;  %v849_v36 = vor.u32 %v848_v25, %v844_v22  ;;  %v870_v55 = vshrl.u32 %v722_v39, 16  ;;  %v8118_v25 = vld [vmem:[%s9372_s1 + $0xa8] sm:$0xff]  }
  0x66   : > { %v859_v53 = vrot.slane %v857_v43, 4  ;;  %v868_v59 = vrot.slane %v866_v50, 5  ;;  %v3580_v16 = vrot.slane %v3578_v8, 4  ;;  %v890_v17 = vshll.u32 %v725_v62, 16 }
  0x67   : > { %7389 = vmatmul.mubr.bf16.vlgmr.msra.gmra.mrb[0].mxu1 %v6339_v61  ;;  %7627 = vmatpush3.bf16.msra.mxu0 %v8112_v37  ;;  %v839_v30 = vor.u32 %v838_v21, %v835_v20  ;;  %v854_v37 = vrot.slane %v852_v26, 5  ;;  %v850_v46 = vrot.slane %v849_v36, 4  ;;  %v724_v61 = vld [vmem:[%s8282_s18 + $0x3c] sm:$0xf]  ;;  %v6618_v20 = vld [vmem:[%s8282_s18 + $0xac] sm:$0xf] }
  0x68   : > { %7421 = vmatpush3.bf16.msra.mxu1 %v8506_v47  ;;  %v6612_v47 = vld [vmem:[%s8282_s18 + $0x94] sm:$0xf]  ;;  %7660 = vmatprep.subr.bf16.mxu0 %v8570_v18  ;;  %v863_v1 = vor.u32 %v862_v54, %v859_v53  ;;  %v884_v13 = vshll.u32 %v724_v61, 16  ;;  %v892_v27 = vrot.slane %v890_v17, 5  ;;  %v896_v28 = vrot.slane %v894_v19, 4 }
  0x69   : > { %7422 = vmatprep.subr.bf16.mxu1 %v8107_v2  ;;  %v3571_v38 = vrot.slane %v6612_v47, 5  ;;  %v840_v41 = vrot.slane %v839_v30, 4  ;;  %7392 = vmatprep.mubr.bf16.mxu1 %v6340_v35  ;;  %v855_v57 = vsel %vm8305_vm2, %v850_v46, %v854_v37  ;;  %v727_v35 = vld [vmem:[%s8282_s18 + $0x48] sm:$0xf]  ;;  %v8122_v36 = vld [vmem:[%s9372_s1 + $0xb0] sm:$0xff]   ;;  %v3585_v40 = vrot.slane %v6618_v20, 5 }
  0x6a   : > { %7597 = vmatmul.mubr.bf16.gmra.mrb[16].mxu0 %v6667_v56  ;;  %v6616_v56 = vld [vmem:[%s8282_s18 + $0xa4] sm:$0x1]  ;;  %v864_v10 = vrot.slane %v863_v1, 4  ;;  %v886_v23 = vrot.slane %v884_v13, 5  ;;  %v3588_v44 = vrot.slane %v6619_v24, 5  ;;  %v905_v45 = vshrl.u32 %v727_v35, 16 }
  0x6b   : > { %7600 = vmatprep.mubr.bf16.mxu0 %v6668_v29  ;;  %v3572_v48 = vsel %vm8405_vm5, %v6637_v31, %v3571_v38  ;;  %v3573_v49 = vrot.slane %v3571_v38, 4  ;;  %v845_v52 = vsel %vm8305_vm2, %v840_v41, %v844_v22  ;;  %v3581_v9 = vrot.slane %v6616_v56, 5  ;;  %v728_v41 = vld [vmem:[%s8282_s18 + $0x4c] sm:$0xf]  ;;  %v6621_v53 = vld [vmem:[%s8282_s18 + $0xb8] sm:$0xf] }
  0x6c   : > { %7423 = vmatpush3.bf16.msra.mxu1 %v8107_v2  ;;  %v6341_v63 = vcombine.low %v845_v52, %v855_v57  ;;  %v872_v2 = vrot.slane %v870_v55, 4  ;;  %v869_v21 = vsel %vm8305_vm2, %v864_v10, %v868_v59  ;;  %v900_v29 = vshll.u32 %v726_v3, 16 }
  0x6d   : > { %7424 = vmatprep.subr.bf16.mxu1 %v8109_v12  ;;  %v3575_v58 = vsel %vm8405_vm5, %v3573_v49, %v3574_v42  ;;  %v3582_v26 = vsel %vm8405_vm5, %v3580_v16, %v3581_v9  ;;  %v897_v38 = vor.u32 %v896_v28, %v892_v27  ;;  %v729_v42 = vld [vmem:[%s8282_s18 + $0x50] sm:$0x1]  ;;  %v908_v46 = vshll.u32 %v727_v35, 16  ;;  %v6623_v16 = vld [vmem:[%s8282_s18 + $0xc0] sm:$0xe] }
  0x6e   : > { %v6669_v0 = vcombine.low %v3572_v48, %v3575_v58  ;;  %v873_v11 = vor.u32 %v872_v2, %v868_v59  ;;  %v6670_v31 = vcombine.low %v3579_v15, %v3582_v26  ;;  %v902_v39 = vrot.slane %v900_v29, 5  ;;  %v6620_v48 = vld [vmem:[%s8282_s18 + $0xb4] sm:$0xe]  ;;  %v6622_v58 = vld [vmem:[%s8282_s18 + $0xbc] sm:$0x1] }
  0x6f   : > { %7393 = vmatmul.mubr.bf16.gmra.mrb[4].mxu1 %v6341_v63  ;;  %v898_v49 = vrot.slane %v897_v38, 4  ;;  %v3587_v51 = vrot.slane %v3585_v40, 4  ;;  %v914_v52 = vshll.u32 %v728_v41, 16  ;;  %v907_v55 = vrot.slane %v905_v45, 4  ;;  %v730_v63 = vld [vmem:[%s8282_s18 + $0x54] sm:$0xf] }
  0x70   : > { %7425 = vmatpush3.bf16.msra.mxu1 %v8109_v12  ;;  %v881_v12 = vshrl.u32 %v724_v61, 16  ;;  %v874_v22 = vrot.slane %v873_v11, 4  ;;  %v910_v56 = vrot.slane %v908_v46, 5  ;;  %v918_v57 = vshrl.u32 %v728_v41, 16  ;;  %v6625_v26 = vld [vmem:[%s8282_s18 + $0xc8] sm:$0x1] }
  0x71   : > { %7426 = vmatprep.subr.bf16.mxu1 %v8111_v34  ;;  %v903_v59 = vsel %vm8305_vm2, %v898_v49, %v902_v39  ;;  %v3589_v60 = vsel %vm8405_vm5, %v3587_v51, %v3588_v44  ;;  %v916_v61 = vrot.slane %v914_v52, 5  ;;  %v924_v62 = vshll.u32 %v729_v42, 16  ;;  %v734_v42 = vld [vmem:[%s8282_s18 + $0x64] sm:$0xf] }
  0x72   : > { %7601 = vmatmul.mubr.bf16.gmra.mrb[20].mxu0 %v6669_v0  ;;  %v883_v47 = vrot.slane %v881_v12, 4  ;;  %v879_v30 = vsel %vm8305_vm2, %v874_v22, %v878_v6  ;;  %v731_v0 = vld [vmem:[%s8282_s18 + $0x58] sm:$0xf]  ;;  %v911_v3 = vor.u32 %v910_v56, %v907_v55  ;;  %v732_v6 = vld [vmem:[%s8282_s18 + $0x5c] sm:$0x1]  ;;  %v6640_v9 = vrot.slane %v6620_v48, 9 }
  0x73   : > { %v6342_v37 = vcombine.low %v869_v21, %v879_v30  ;;  %7604 = vmatprep.mubr.bf16.mxu0 %v6670_v31  ;;  %v926_v8 = vrot.slane %v924_v62, 5  ;;  %v3592_v10 = vrot.slane %v6621_v53, 5  ;;  %v3595_v11 = vrot.slane %v6622_v58, 5  ;;  %v6624_v22 = vld [vmem:[%s8282_s18 + $0xc4] sm:$0xf] }
  0x74   : > { %7427 = vmatpush3.bf16.msra.mxu1 %v8111_v34  ;;  %v887_v32 = vor.u32 %v886_v23, %v883_v47  ;;  %v6639_v34 = vrot.slane %v6617_v14, 9  ;;  %v912_v12 = vrot.slane %v911_v3, 4  ;;  %v929_v14 = vshrl.u32 %v730_v63, 16  ;;  %v736_v58 = vld [vmem:[%s8282_s18 + $0x6c] sm:$0xf] }
  0x75   : > { %7428 = vmatprep.subr.bf16.mxu1 %v8114_v5  ;;  %7396 = vmatprep.mubr.bf16.mxu1 %v6342_v37  ;;  %v932_v15 = vshll.u32 %v730_v63, 16  ;;  %v3593_v17 = vsel %vm8405_vm5, %v6640_v9, %v3592_v10  ;;  %v3594_v19 = vrot.slane %v3592_v10, 4  ;;  %v938_v20 = vshll.u32 %v731_v0, 16  ;;  %v733_v37 = vld [vmem:[%s8282_s18 + $0x60] sm:$0xf] }
  0x76   : > { %v888_v43 = vrot.slane %v887_v32, 4  ;;  %v3586_v50 = vsel %vm8405_vm5, %v6639_v34, %v3585_v40  ;;  %v942_v21 = vshrl.u32 %v731_v0, 16  ;;  %v917_v47 = vsel %vm8305_vm2, %v912_v12, %v916_v61  ;;  %v737_v63 = vld [vmem:[%s8282_s18 + $0x70] sm:$0xf]  ;;  %v738_v0 = vld [vmem:[%s8282_s18 + $0x74] sm:$0x1] }
  0x77   : > { %v6671_v2 = vcombine.low %v3586_v50, %v3589_v60  ;;  %v931_v24 = vrot.slane %v929_v14, 4  ;;  %v3596_v28 = vsel %vm8405_vm5, %v3594_v19, %v3595_v11  ;;  %v940_v29 = vrot.slane %v938_v20, 5 }
  0x78   : > { %7429 = vmatpush3.bf16.msra.mxu1 %v8114_v5  ;;  %v893_v54 = vsel %vm8305_vm2, %v888_v43, %v892_v27  ;;  %v920_v5 = vrot.slane %v918_v57, 4  ;;  %v8651_v27 = vld [vmem:[%s9372_s1 + $0xc0] sm:$0xff]   ;;  %v944_v30 = vrot.slane %v942_v21, 4  ;;  %v948_v31 = vshll.u32 %v732_v6, 16  ;;  %v735_v43 = vld [vmem:[%s8282_s18 + $0x68] sm:$0x1] }
  0x79   : > { %7430 = vmatprep.subr.bf16.mxu1 %v8118_v25  ;;  %v6343_v1 = vcombine.low %v893_v54, %v903_v59  ;;  %v6672_v34 = vcombine.low %v3593_v17, %v3596_v28  ;;  %v3599_v41 = vrot.slane %v6624_v22, 5  ;;  %v3602_v45 = vrot.slane %v6625_v26, 5  ;;  %v8113_v57 = vld [vmem:[%s8282_s18 + $0x18] sm:$0xff]   ;;  %v8115_v22 = vld [vmem:[%s8282_s18 + $0x24] sm:$0xff]   ;;  %v8117_v26 = vld [vmem:[%s8282_s18 + $0x30] sm:$0xff]  }
  0x7a   : > { %7605 = vmatmul.mubr.bf16.gmra.mrb[24].mxu0 %v6671_v2  ;;  %v921_v13 = vor.u32 %v920_v5, %v916_v61  ;;  %v945_v39 = vor.u32 %v944_v30, %v940_v29  ;;  %v950_v40 = vrot.slane %v948_v31, 5  ;;  %v953_v46 = vshrl.u32 %v733_v37, 16 }
  0x7b   : > { %7397 = vmatmul.mubr.bf16.gmra.mrb[8].mxu1 %v6343_v1  ;;  %7608 = vmatprep.mubr.bf16.mxu0 %v6672_v34  ;;  %v956_v48 = vshll.u32 %v733_v37, 16  ;;  %v3601_v51 = vrot.slane %v3599_v41, 4  ;;  %v962_v52 = vshll.u32 %v734_v42, 16  ;;  %v966_v56 = vshrl.u32 %v734_v42, 16  ;;  %v742_v37 = vld [vmem:[%s8282_s18 + $0x84] sm:$0xf] }
  0x7c   : > { %7431 = vmatpush3.bf16.msra.mxu1 %v8118_v25  ;;  %v922_v23 = vrot.slane %v921_v13, 4  ;;  %v934_v25 = vrot.slane %v932_v15, 5  ;;  %v946_v49 = vrot.slane %v945_v39, 4  ;;  %v955_v54 = vrot.slane %v953_v46, 4 }
  0x7d   : > { %7432 = vmatprep.subr.bf16.mxu1 %v8122_v36  ;;  %v958_v55 = vrot.slane %v956_v48, 5  ;;  %v3603_v60 = vsel %vm8405_vm5, %v3601_v51, %v3602_v45  ;;  %v964_v61 = vrot.slane %v962_v52, 5  ;;  %v972_v62 = vshll.u32 %v735_v43, 16  ;;  %v743_v43 = vld [vmem:[%s8282_s18 + $0x88] sm:$0xf] }
  0x7e   : > { %v927_v32 = vsel %vm8305_vm2, %v922_v23, %v926_v8  ;;  %v935_v35 = vor.u32 %v934_v25, %v931_v24  ;;  %v951_v59 = vsel %vm8305_vm2, %v946_v49, %v950_v40  ;;  %v968_v5 = vrot.slane %v966_v56, 4  ;;  %v739_v23 = vld [vmem:[%s8282_s18 + $0x78] sm:$0xf]  ;;  %v740_v24 = vld [vmem:[%s8282_s18 + $0x7c] sm:$0xf] }
  0x7f   : > { %v6344_v38 = vcombine.low %v917_v47, %v927_v32  ;;  %v959_v3 = vor.u32 %v958_v55, %v955_v54  ;;  %v974_v6 = vrot.slane %v972_v62, 5  ;;  %v980_v8 = vshll.u32 %v736_v58, 16  ;;  %v741_v25 = vld [vmem:[%s8282_s18 + $0x80] sm:$0x1]  ;;  %v744_v48 = vld [vmem:[%s8282_s18 + $0x8c] sm:$0x1] }
  0x80   : > { %7433 = vmatpush3.bf16.msra.mxu1 %v8122_v36  ;;  %v6641_v36 = vrot.slane %v6623_v16, 9  ;;  %v936_v44 = vrot.slane %v935_v35, 4  ;;  %v986_v9 = vshll.u32 %v737_v63, 16  ;;  %v969_v11 = vor.u32 %v968_v5, %v964_v61  ;;  %v8124_v54 = vld [vmem:[%s9372_s1 + $0x1d0] sm:$0xff]  }
  0x81   : > { %7434 = vmatprep.subr.bf16.mxu1 %v8126_v7  ;;  %7400 = vmatprep.mubr.bf16.mxu1 %v6344_v38  ;;  %v960_v10 = vrot.slane %v959_v3, 4  ;;  %v990_v12 = vshrl.u32 %v737_v63, 16  ;;  %v996_v13 = vshll.u32 %v738_v0, 16  ;;  %v982_v15 = vrot.slane %v980_v8, 5  ;;  %v8120_v38 = vld [vmem:[%s9372_s1 + $0x1c8] sm:$0xff]   ;;  %v8119_v63 = vld [vmem:[%s8282_s18 + $0x3c] sm:$0xff]  }
  0x82   : > { %v3600_v50 = vsel %vm8405_vm5, %v6641_v36, %v3599_v41  ;;  %v941_v53 = vsel %vm8305_vm2, %v936_v44, %v940_v29  ;;  %v988_v16 = vrot.slane %v986_v9, 5  ;;  %v970_v19 = vrot.slane %v969_v11, 4  ;;  %v8121_v3 = vld [vmem:[%s8282_s18 + $0x48] sm:$0xff]   ;;  %v746_v8 = vld [vmem:[%s8282_s18 + $0x94] sm:$0xf] }
  0x83   : > { %v6345_v1 = vcombine.low %v941_v53, %v951_v59  ;;  %v6673_v2 = vcombine.low %v3600_v50, %v3603_v60  ;;  %v965_v17 = vsel %vm8305_vm2, %v960_v10, %v964_v61  ;;  %v992_v20 = vrot.slane %v990_v12, 4  ;;  %v747_v9 = vld [vmem:[%s8282_s18 + $0x98] sm:$0x1] }
  0x84   : > { %7435 = vmatpush3.bf16.msra.mxu1 %v8126_v7  ;;  %v977_v7 = vshrl.u32 %v736_v58, 16  ;;  %v998_v21 = vrot.slane %v996_v13, 5  ;;  %v975_v28 = vsel %vm8305_vm2, %v970_v19, %v974_v6  ;;  %v1001_v30 = vshrl.u32 %v739_v23, 16 }
  0x85   : > { %7468 = vmatprep.subr.bf16.mxu1 %v8651_v27  ;;  %7401 = vmatmul.mubr.bf16.gmra.mrb[12].mxu1 %v6345_v1  ;;  %v993_v29 = vor.u32 %v992_v20, %v988_v16  ;;  %v1004_v31 = vshll.u32 %v739_v23, 16  ;;  %v6346_v32 = vcombine.low %v965_v17, %v975_v28  ;;  %v1010_v35 = vshll.u32 %v740_v24, 16  ;;  %v748_v20 = vld [vmem:[%s8282_s18 + $0x9c] sm:$0xf] }
  0x86   : > { %7609 = vmatmul.mubr.bf16.gmra.mrb[28].mxu0 %v6673_v2  ;;  %v979_v14 = vrot.slane %v977_v7, 4  ;;  %v1014_v36 = vshrl.u32 %v740_v24, 16  ;;  %v1003_v40 = vrot.slane %v1001_v30, 4  ;;  %v1020_v42 = vshll.u32 %v741_v25, 16  ;;  %v745_v2 = vld [vmem:[%s8282_s18 + $0x90] sm:$0xf] }
  0x87   : > { %7628 = vmatprep.mubr.bf16.mxu0 %v8113_v57  ;;  %v994_v39 = vrot.slane %v993_v29, 4  ;;  %v1006_v41 = vrot.slane %v1004_v31, 5  ;;  %7404 = vmatprep.mubr.bf16.mxu1 %v6346_v32  ;;  %v1012_v45 = vrot.slane %v1010_v35, 5  ;;  %v1025_v49 = vshrl.u32 %v742_v37, 16  ;;  %v749_v24 = vld [vmem:[%s8282_s18 + $0xa0] sm:$0xf] }
  0x88   : > { %v983_v47 = vor.u32 %v982_v15, %v979_v14  ;;  %v1016_v46 = vrot.slane %v1014_v36, 4  ;;  %v1022_v52 = vrot.slane %v1020_v42, 5  ;;  %v1028_v53 = vshll.u32 %v742_v37, 16  ;;  %v8128_v14 = vld [vmem:[%s9372_s1 + $0x1d8] sm:$0xff]   ;;  %v750_v29 = vld [vmem:[%s8282_s18 + $0xa4] sm:$0x1] }
  0x89   : > { %v999_v50 = vsel %vm8305_vm2, %v994_v39, %v998_v21  ;;  %v1007_v51 = vor.u32 %v1006_v41, %v1003_v40  ;;  %v1027_v57 = vrot.slane %v1025_v49, 4  ;;  %v1034_v58 = vshll.u32 %v743_v43, 16  ;;  %v8132_v36 = vld [vmem:[%s9372_s1 + $0x1e0] sm:$0xff]  }
  0x8a   : > { %v984_v34 = vrot.slane %v983_v47, 4  ;;  %v1017_v56 = vor.u32 %v1016_v46, %v1012_v45  ;;  %v1030_v60 = vrot.slane %v1028_v53, 5  ;;  %v1038_v61 = vshrl.u32 %v743_v43, 16  ;;  %v751_v53 = vld [vmem:[%s8282_s18 + $0xa8] sm:$0xf] }
  0x8b   : > { %v1008_v59 = vrot.slane %v1007_v51, 4  ;;  %v1044_v62 = vshll.u32 %v744_v48, 16  ;;  %v1036_v1 = vrot.slane %v1034_v58, 5  ;;  %v1049_v11 = vshrl.u32 %v745_v2, 16  ;;  %v753_v58 = vld [vmem:[%s8282_s18 + $0xb0] sm:$0x1] }
  0x8c   : > { %v989_v44 = vsel %vm8305_vm2, %v984_v34, %v988_v16  ;;  %v1018_v0 = vrot.slane %v1017_v56, 4  ;;  %v1031_v5 = vor.u32 %v1030_v60, %v1027_v57  ;;  %v1040_v6 = vrot.slane %v1038_v61, 4 }
  0x8d   : > { %v6347_v55 = vcombine.low %v989_v44, %v999_v50  ;;  %v1046_v7 = vrot.slane %v1044_v62, 5  ;;  %v1052_v12 = vshll.u32 %v745_v2, 16  ;;  %v1058_v13 = vshll.u32 %v746_v8, 16  ;;  %v8125_v50 = vld [vmem:[%s8282_s18 + $0x60] sm:$0xff]  }
  0x8e   : > { %7629 = vmatmul.mubr.bf16.vlgmr.msra.gmra.mrb[0].mxu0 %v8115_v22  ;;  %v1023_v10 = vsel %vm8305_vm2, %v1018_v0, %v1022_v52  ;;  %v1032_v16 = vrot.slane %v1031_v5, 4  ;;  %v1041_v17 = vor.u32 %v1040_v6, %v1036_v1  ;;  %v1062_v19 = vshrl.u32 %v746_v8, 16  ;;  %v8136_v0 = vld [vmem:[%s9372_s1 + $0x1e8] sm:$0xff]   ;;  %v754_v5 = vld [vmem:[%s8282_s18 + $0xb4] sm:$0xf] }
  0x8f   : > { %7661 = vmatpush3.bf16.msra.mxu0 %v8570_v18  ;;  %7632 = vmatprep.mubr.bf16.mxu0 %v8117_v26  ;;  %v1013_v18 = vsel %vm8305_vm2, %v1008_v59, %v1012_v45  ;;  %v1051_v21 = vrot.slane %v1049_v11, 4  ;;  %v1054_v22 = vrot.slane %v1052_v12, 5  ;;  %v1060_v47 = vrot.slane %v1058_v13, 5  ;;  %v8123_v45 = vld [vmem:[%s8282_s18 + $0x54] sm:$0xff]  }
  0x90   : > { %7662 = vmatprep.subr.bf16.mxu0 %v8120_v38  ;;  %7405 = vmatmul.mubr.bf16.gmra.mrb[16].mxu1 %v6347_v55  ;;  %v6348_v15 = vcombine.low %v1013_v18, %v1023_v10  ;;  %v1068_v23 = vshll.u32 %v747_v9, 16  ;;  %v1037_v25 = vsel %vm8305_vm2, %v1032_v16, %v1036_v1  ;;  %v1042_v26 = vrot.slane %v1041_v17, 4  ;;  %v755_v9 = vld [vmem:[%s8282_s18 + $0xb8] sm:$0xf]  ;;  %v756_v10 = vld [vmem:[%s8282_s18 + $0xbc] sm:$0x1] }
  0x91   : > { %v1064_v28 = vrot.slane %v1062_v19, 4  ;;  %v1073_v30 = vshrl.u32 %v748_v20, 16  ;;  %v1055_v31 = vor.u32 %v1054_v22, %v1051_v21  ;;  %v1076_v34 = vshll.u32 %v748_v20, 16 }
  0x92   : > { %7408 = vmatprep.mubr.bf16.mxu1 %v6348_v15  ;;  %v1070_v32 = vrot.slane %v1068_v23, 5  ;;  %v1082_v35 = vshll.u32 %v749_v24, 16  ;;  %v1047_v37 = vsel %vm8305_vm2, %v1042_v26, %v1046_v7  ;;  %v1086_v40 = vshrl.u32 %v749_v24, 16  ;;  %v8140_v15 = vld [vmem:[%s9372_s1 + $0x1f0] sm:$0xff]  }
  0x93   : > { %7663 = vmatpush3.bf16.msra.mxu0 %v8120_v38  ;;  %v1065_v38 = vor.u32 %v1064_v28, %v1060_v47  ;;  %v1075_v39 = vrot.slane %v1073_v30, 4  ;;  %v6349_v41 = vcombine.low %v1037_v25, %v1047_v37  ;;  %v1056_v42 = vrot.slane %v1055_v31, 4  ;;  %v8127_v24 = vld [vmem:[%s8282_s18 + $0x6c] sm:$0xff]   ;;  %v1530_v37 = vld [vmem:[%s8282_s18] sm:$0xe] }
  0x94   : > { %7664 = vmatprep.subr.bf16.mxu0 %v8124_v54  ;;  %v1078_v43 = vrot.slane %v1076_v34, 5  ;;  %v1084_v44 = vrot.slane %v1082_v35, 5  ;;  %v1088_v48 = vrot.slane %v1086_v40, 4  ;;  %v1092_v49 = vshll.u32 %v750_v29, 16  ;;  %v8129_v29 = vld [vmem:[%s8282_s18 + $0x78] sm:$0xff]  }
  0x95   : > { %v1066_v46 = vrot.slane %v1065_v38, 4  ;;  %v1061_v51 = vsel %vm8305_vm2, %v1056_v42, %v1060_v47  ;;  %v1097_v59 = vshrl.u32 %v751_v53, 16  ;;  %v1100_v62 = vshll.u32 %v751_v53, 16  ;;  %v8144_v34 = vld [vmem:[%s9372_s1 + $0x1f8] sm:$0xff]   ;;  %v1531_v38 = vld [vmem:[%s8282_s18 + $0x4] sm:$0xf] }
  0x96   : > { %7633 = vmatmul.mubr.bf16.gmra.mrb[4].mxu0 %v8119_v63  ;;  %v1079_v52 = vor.u32 %v1078_v43, %v1075_v39  ;;  %v1089_v56 = vor.u32 %v1088_v48, %v1084_v44  ;;  %v1094_v57 = vrot.slane %v1092_v49, 5  ;;  %v1116_v18 = vshll.u32 %v753_v58, 16  ;;  %v1532_v39 = vld [vmem:[%s8282_s18 + $0x8] sm:$0x1]  ;;  %v1533_v48 = vld [vmem:[%s8282_s18 + $0xc] sm:$0xe] }
  0x97   : > { %7636 = vmatprep.mubr.bf16.mxu0 %v8121_v3  ;;  %7665 = vmatpush3.bf16.msra.mxu0 %v8124_v54  ;;  %v752_v54 = vld [vmem:[%s8282_s18 + $0xac] sm:$0xf]  ;;  %v1071_v55 = vsel %vm8305_vm2, %v1066_v46, %v1070_v32  ;;  %v1099_v2 = vrot.slane %v1097_v59, 4  ;;  %v1102_v7 = vrot.slane %v1100_v62, 5  ;;  %v1124_v19 = vshll.u32 %v754_v5, 16 }
  0x98   : > { %7666 = vmatprep.subr.bf16.mxu0 %v8128_v14  ;;  %7409 = vmatmul.mubr.bf16.gmra.mrb[20].mxu1 %v6349_v41  ;;  %v6350_v60 = vcombine.low %v1061_v51, %v1071_v55  ;;  %v1080_v61 = vrot.slane %v1079_v52, 4  ;;  %v1106_v63 = vshll.u32 %v752_v54, 16  ;;  %v1090_v1 = vrot.slane %v1089_v56, 4  ;;  %v1534_v49 = vld [vmem:[%s8282_s18 + $0x10] sm:$0xf]  ;;  %v8131_v55 = vld [vmem:[%s8282_s18 + $0x84] sm:$0xff]  }
  0x99   : > { %v1110_v3 = vshrl.u32 %v752_v54, 16  ;;  %v1118_v13 = vrot.slane %v1116_v18, 5  ;;  %v1103_v17 = vor.u32 %v1102_v7, %v1099_v2  ;;  %v1130_v20 = vshll.u32 %v755_v9, 16  ;;  %v1535_v53 = vld [vmem:[%s8282_s18 + $0x14] sm:$0x1]  ;;  %v8761_v56 = vld [vmem:[%s9372_s1 + $0x200] sm:$0xff]  }
  0x9a   : > { %7412 = vmatprep.mubr.bf16.mxu1 %v6350_v60  ;;  %v1085_v6 = vsel %vm8305_vm2, %v1080_v61, %v1084_v44  ;;  %v1108_v8 = vrot.slane %v1106_v63, 5  ;;  %v1095_v11 = vsel %vm8305_vm2, %v1090_v1, %v1094_v57  ;;  %v1134_v47 = vshrl.u32 %v755_v9, 16  ;;  %v1536_v1 = vld [vmem:[%s8282_s18 + $0x18] sm:$0xe]  ;;  %v8133_v2 = vld [vmem:[%s8282_s18 + $0x90] sm:$0xff]  }
  0x9b   : > { %7667 = vmatpush3.bf16.msra.mxu0 %v8128_v14  ;;  %v1112_v12 = vrot.slane %v1110_v3, 4  ;;  %v1121_v14 = vshrl.u32 %v754_v5, 16  ;;  %v6351_v16 = vcombine.low %v1085_v6, %v1095_v11  ;;  %v1140_v23 = vshll.u32 %v756_v10, 16  ;;  %v1537_v3 = vld [vmem:[%s8282_s18 + $0x1c] sm:$0xf] }
  0x9c   : > { %7668 = vmatprep.subr.bf16.mxu0 %v8132_v36  ;;  %v1104_v25 = vrot.slane %v1103_v17, 4  ;;  %v1126_v26 = vrot.slane %v1124_v19, 5  ;;  %v1132_v28 = vrot.slane %v1130_v20, 5  ;;  %v1136_v31 = vrot.slane %v1134_v47, 4  ;;  %v1538_v18 = vld [vmem:[%s8282_s18 + $0x20] sm:$0x1] }
  0x9d   : > { %v1113_v21 = vor.u32 %v1112_v12, %v1108_v8  ;;  %v1123_v22 = vrot.slane %v1121_v14, 4  ;;  %v1142_v32 = vrot.slane %v1140_v23, 5  ;;  %v6362_v42 = vrot.slane %v1530_v37, 9  ;;  %v1539_v10 = vld [vmem:[%s8282_s18 + $0x24] sm:$0xe]  ;;  %v8135_v47 = vld [vmem:[%s8282_s18 + $0x9c] sm:$0xff]  }
  0x9e   : > { %7637 = vmatmul.mubr.bf16.gmra.mrb[8].mxu0 %v8123_v45  ;;  %v1109_v35 = vsel %vm8305_vm2, %v1104_v25, %v1108_v8  ;;  %v1137_v41 = vor.u32 %v1136_v31, %v1132_v28  ;;  %v1631_v43 = vrot.slane %v1531_v38, 5  ;;  %v1634_v46 = vrot.slane %v1532_v39, 5  ;;  %v1540_v11 = vld [vmem:[%s8282_s18 + $0x28] sm:$0xf]  ;;  %v1541_v12 = vld [vmem:[%s8282_s18 + $0x2c] sm:$0x1] }
  0x9f   : > { %7640 = vmatprep.mubr.bf16.mxu0 %v8125_v50  ;;  %7669 = vmatpush3.bf16.msra.mxu0 %v8132_v36  ;;  %v1114_v30 = vrot.slane %v1113_v21, 4  ;;  %v1127_v36 = vor.u32 %v1126_v26, %v1123_v22  ;;  %v6363_v54 = vrot.slane %v1533_v48, 9  ;;  %v1638_v58 = vrot.slane %v1534_v49, 5  ;;  %v8134_v22 = vld [vmem:[%s9372_s1 + $0xc8] sm:$0xff]   ;;  %v1543_v25 = vld [vmem:[%s8282_s18 + $0x34] sm:$0xf] }
  0xa0   : > { %7670 = vmatprep.subr.bf16.mxu0 %v8136_v0  ;;  %7413 = vmatmul.mubr.bf16.gmra.mrb[24].mxu1 %v6351_v16  ;;  %v1138_v50 = vrot.slane %v1137_v41, 4  ;;  %v1632_v51 = vsel %vm8405_vm5, %v6362_v42, %v1631_v43  ;;  %v1633_v52 = vrot.slane %v1631_v43, 4  ;;  %v1641_v59 = vrot.slane %v1535_v53, 5  ;;  %v1544_v26 = vld [vmem:[%s8282_s18 + $0x38] sm:$0x1]  ;;  %v8137_v31 = vld [vmem:[%s8282_s18 + $0xa8] sm:$0xff]  }
  0xa1   : > { %v1119_v40 = vsel %vm8305_vm2, %v1114_v30, %v1118_v13  ;;  %v1128_v45 = vrot.slane %v1127_v36, 4  ;;  %v6364_v5 = vrot.slane %v1536_v1, 9  ;;  %v1645_v6 = vrot.slane %v1537_v3, 5  ;;  %v1547_v36 = vld [vmem:[%s8282_s18 + $0x44] sm:$0x1]  ;;  %v8139_v48 = vld [vmem:[%s8282_s18 + $0xb4] sm:$0xff]  }
  0xa2   : > { %v6352_v44 = vcombine.low %v1109_v35, %v1119_v40  ;;  %v1143_v60 = vsel %vm8305_vm2, %v1138_v50, %v1142_v32  ;;  %v1635_v61 = vsel %vm8405_vm5, %v1633_v52, %v1634_v46  ;;  %v1648_v7 = vrot.slane %v1538_v18, 5  ;;  %v1545_v32 = vld [vmem:[%s8282_s18 + $0x3c] sm:$0xe]  ;;  %v1546_v35 = vld [vmem:[%s8282_s18 + $0x40] sm:$0xf]  ;;  %v8138_v40 = vld [vmem:[%s9372_s1 + $0xd0] sm:$0xff]  }
  0xa3   : > { %7671 = vmatpush3.bf16.msra.mxu0 %v8136_v0  ;;  %v1133_v57 = vsel %vm8305_vm2, %v1128_v45, %v1132_v28  ;;  %v6394_v63 = vcombine.low %v1632_v51, %v1635_v61  ;;  %v1640_v0 = vrot.slane %v1638_v58, 4  ;;  %v1639_v8 = vsel %vm8405_vm5, %v6363_v54, %v1638_v58  ;;  %v1549_v49 = vld [vmem:[%s8282_s18 + $0x4c] sm:$0xf]  ;;  %v1550_v50 = vld [vmem:[%s8282_s18 + $0x50] sm:$0x1]  ;;  %v8142_v52 = vld [vmem:[%s9372_s1 + $0xd8] sm:$0xff]  }
  0xa4   : > { %7672 = vmatprep.subr.bf16.mxu0 %v8140_v15  ;;  %7416 = vmatprep.mubr.bf16.mxu1 %v6352_v44  ;;  %v6353_v62 = vcombine.low %v1133_v57, %v1143_v60  ;;  %v1646_v13 = vsel %vm8405_vm5, %v6364_v5, %v1645_v6  ;;  %v1647_v14 = vrot.slane %v1645_v6, 4  ;;  %v6365_v16 = vrot.slane %v1539_v10, 9  ;;  %v1548_v44 = vld [vmem:[%s8282_s18 + $0x48] sm:$0xe]  ;;  %v1551_v57 = vld [vmem:[%s8282_s18 + $0x54] sm:$0xe] }
  0xa5   : > { %v1642_v9 = vsel %vm8405_vm5, %v1640_v0, %v1641_v59  ;;  %v1655_v21 = vrot.slane %v1541_v12, 5  ;;  %v1662_v30 = vrot.slane %v1544_v26, 5  ;;  %v1666_v39 = vrot.slane %v1546_v35, 5  ;;  %v1552_v58 = vld [vmem:[%s8282_s18 + $0x58] sm:$0xf]  ;;  %v8141_v61 = vld [vmem:[%s8282_s18 + $0xc0] sm:$0xff]  }
  0xa6   : > { %7641 = vmatmul.mubr.bf16.gmra.mrb[12].mxu0 %v8127_v24  ;;  %v6395_v17 = vcombine.low %v1639_v8, %v1642_v9  ;;  %v1649_v19 = vsel %vm8405_vm5, %v1647_v14, %v1648_v7  ;;  %v1542_v24 = vld [vmem:[%s8282_s18 + $0x30] sm:$0xe]  ;;  %v6367_v42 = vrot.slane %v1545_v32, 9  ;;  %v1669_v43 = vrot.slane %v1547_v36, 5  ;;  %v1553_v59 = vld [vmem:[%s8282_s18 + $0x5c] sm:$0x1] }
  0xa7   : > { %7644 = vmatprep.mubr.bf16.mxu0 %v8129_v29  ;;  %7673 = vmatpush3.bf16.msra.mxu0 %v8140_v15  ;;  %v1652_v15 = vrot.slane %v1540_v11, 5  ;;  %v6396_v23 = vcombine.low %v1646_v13, %v1649_v19  ;;  %v6366_v28 = vrot.slane %v1542_v24, 9  ;;  %v1659_v29 = vrot.slane %v1543_v25, 5  ;;  %v8145_v6 = vld [vmem:[%s9372_s1 + $0xe0] sm:$0xff]   ;;  %v1556_v11 = vld [vmem:[%s8282_s18 + $0x68] sm:$0x1] }
  0xa8   : > { %7674 = vmatprep.subr.bf16.mxu0 %v8144_v34  ;;  %7417 = vmatmul.mubr.bf16.gmra.mrb[28].mxu1 %v6353_v62  ;;  %v1668_v46 = vrot.slane %v1666_v39, 4  ;;  %v6368_v51 = vrot.slane %v1548_v44, 9  ;;  %v1673_v54 = vrot.slane %v1549_v49, 5  ;;  %v6369_v62 = vrot.slane %v1551_v57, 9  ;;  %v1554_v7 = vld [vmem:[%s8282_s18 + $0x60] sm:$0xe] }
  0xa9   : > { %7436 = vmatprep.mubr.bf16.mxu1 %v6394_v63  ;;  %v1654_v20 = vrot.slane %v1652_v15, 4  ;;  %v1653_v37 = vsel %vm8405_vm5, %v6365_v16, %v1652_v15  ;;  %v1680_v63 = vrot.slane %v1552_v58, 5  ;;  %v1667_v0 = vsel %vm8405_vm5, %v6367_v42, %v1666_v39  ;;  %v1555_v8 = vld [vmem:[%s8282_s18 + $0x64] sm:$0xf]  ;;  %v6754_v13 = vld [vmem:[%s8282_s18 + $0x18] sm:$0xf] }
  0xaa   : > { %v1675_v60 = vrot.slane %v1673_v54, 4  ;;  %v1670_v1 = vsel %vm8405_vm5, %v1668_v46, %v1669_v43  ;;  %v1674_v3 = vsel %vm8405_vm5, %v6368_v51, %v1673_v54  ;;  %v1687_v12 = vrot.slane %v1555_v8, 5  ;;  %v8143_v16 = vld [vmem:[%s8282_s18 + $0xcc] sm:$0xff]   ;;  %v6755_v19 = vld [vmem:[%s8282_s18 + $0x1c] sm:$0xf] }
  0xab   : > { %7675 = vmatpush3.bf16.msra.mxu0 %v8144_v34  ;;  %v1661_v34 = vrot.slane %v1659_v29, 4  ;;  %v1656_v38 = vsel %vm8405_vm5, %v1654_v20, %v1655_v21  ;;  %v1682_v5 = vrot.slane %v1680_v63, 4  ;;  %v6399_v9 = vcombine.low %v1667_v0, %v1670_v1  ;;  %v6756_v20 = vld [vmem:[%s8282_s18 + $0x20] sm:$0x1]  ;;  %v1557_v26 = vld [vmem:[%s8282_s18 + $0x6c] sm:$0xe] }
  0xac   : > { %7708 = vmatprep.subr.bf16.mxu0 %v8761_v56  ;;  %v6397_v45 = vcombine.low %v1653_v37, %v1656_v38  ;;  %v8834_v10 = vsel %vm8405_vm5, %v6369_v62, %v1680_v63  ;;  %v4490_v21 = vshrl.u32 %v6754_v13, 16  ;;  %v4493_v24 = vshll.u32 %v6754_v13, 16  ;;  %v1559_v36 = vld [vmem:[%s8282_s18 + $0x74] sm:$0x1]  ;;  %v6757_v46 = vld [vmem:[%s8282_s18 + $0x24] sm:$0xf] }
  0xad   : > { %v1663_v41 = vsel %vm8405_vm5, %v1661_v34, %v1662_v30  ;;  %v4499_v25 = vshll.u32 %v6755_v19, 16  ;;  %v4509_v30 = vshll.u32 %v6756_v20, 16  ;;  %v6371_v32 = vrot.slane %v1557_v26, 9  ;;  %v6759_v51 = vld [vmem:[%s8282_s18 + $0x2c] sm:$0x1] }
  0xae   : > { %7645 = vmatmul.mubr.bf16.gmra.mrb[16].mxu0 %v8131_v55  ;;  %v1676_v55 = vrot.slane %v1550_v50, 5  ;;  %v4495_v34 = vrot.slane %v4493_v24, 5  ;;  %v6758_v50 = vld [vmem:[%s8282_s18 + $0x28] sm:$0xf]  ;;  %v1562_v8 = vld [vmem:[%s8282_s18 + $0x80] sm:$0x1] }
  0xaf   : > { %7648 = vmatprep.mubr.bf16.mxu0 %v8133_v2  ;;  %v1683_v2 = vrot.slane %v1553_v59, 5  ;;  %v4501_v35 = vrot.slane %v4499_v25, 5  ;;  %v4511_v44 = vrot.slane %v4509_v30, 5  ;;  %v4523_v57 = vshll.u32 %v6758_v50, 16  ;;  %v6762_v20 = vld [vmem:[%s8282_s18 + $0x38] sm:$0x1] }
  0xb0   : > { %7437 = vmatmul.mubr.bf16.vlgmr.msra.gmra.mrb[0].mxu1 %v6395_v17  ;;  %v1677_v18 = vsel %vm8405_vm5, %v1675_v60, %v1676_v55  ;;  %v6370_v17 = vrot.slane %v1554_v7, 9  ;;  %v4527_v58 = vshrl.u32 %v6758_v50, 16  ;;  %v1561_v7 = vld [vmem:[%s8282_s18 + $0x7c] sm:$0xf]  ;;  %v1563_v26 = vld [vmem:[%s8282_s18 + $0x84] sm:$0xe] }
  0xb1   : > { %7469 = vmatpush3.bf16.msra.mxu1 %v8651_v27  ;;  %7440 = vmatprep.mubr.bf16.mxu1 %v6396_v23  ;;  %v1660_v27 = vsel %vm8405_vm5, %v6366_v28, %v1659_v29  ;;  %v6400_v14 = vcombine.low %v1674_v3, %v1677_v18  ;;  %v8840_v15 = vsel %vm8405_vm5, %v1682_v5, %v1683_v2  ;;  %v1690_v23 = vrot.slane %v1556_v11, 5  ;;  %v1560_v3 = vld [vmem:[%s8282_s18 + $0x78] sm:$0xe] }
  0xb2   : > { %7470 = vmatprep.subr.bf16.mxu1 %v8134_v22  ;;  %v6398_v53 = vcombine.low %v1660_v27, %v1663_v41  ;;  %v4492_v28 = vrot.slane %v4490_v21, 4  ;;  %v4503_v29 = vshrl.u32 %v6755_v19, 16  ;;  %v6401_v38 = vcombine.low %v8834_v10, %v8840_v15  ;;  %v8149_v41 = vld [vmem:[%s9372_s1 + $0xf0] sm:$0xff]   ;;  %v8151_v10 = vld [vmem:[%s9372_s1 + $0xf8] sm:$0xff]  }
  0xb3   : > { %v1688_v39 = vsel %vm8405_vm5, %v6370_v17, %v1687_v12  ;;  %v1697_v27 = vrot.slane %v1559_v36, 5  ;;  %v4525_v0 = vrot.slane %v4523_v57, 5  ;;  %v4529_v1 = vrot.slane %v4527_v58, 4  ;;  %v6760_v15 = vld [vmem:[%s8282_s18 + $0x30] sm:$0xf] }
  0xb4   : > { %v4496_v43 = vor.u32 %v4495_v34, %v4492_v28  ;;  %v4533_v2 = vshll.u32 %v6759_v51, 16  ;;  %v1704_v19 = vrot.slane %v1562_v8, 5  ;;  %v4538_v21 = vshrl.u32 %v6760_v15, 16 }
  0xb5   : > { %7471 = vmatpush3.bf16.msra.mxu1 %v8134_v22  ;;  %v8147_v22 = vld [vmem:[%s9372_s1 + $0xe8] sm:$0xff]  }
  0xb6   : > { %7649 = vmatmul.mubr.bf16.gmra.mrb[20].mxu0 %v8135_v47  ;;  %7472 = vmatprep.subr.bf16.mxu1 %v8138_v40  ;;  %v1689_v47 = vrot.slane %v1687_v12, 4  ;;  %v4497_v54 = vrot.slane %v4496_v43, 4  ;;  %v4530_v12 = vor.u32 %v4529_v1, %v4525_v0  ;;  %v4535_v13 = vrot.slane %v4533_v2, 5  ;;  %v6763_v43 = vld [vmem:[%s8282_s18 + $0x3c] sm:$0xf] }
  0xb7   : > { %7652 = vmatprep.mubr.bf16.mxu0 %v8137_v31  ;;  %v1558_v31 = vld [vmem:[%s8282_s18 + $0x70] sm:$0xf] }
  0xb8   : > { %7441 = vmatmul.mubr.bf16.gmra.mrb[4].mxu1 %v6397_v45  ;;  %v1694_v37 = vrot.slane %v1558_v31, 5  ;;  %v1691_v42 = vsel %vm8405_vm5, %v1689_v47, %v1690_v23  ;;  %v4502_v63 = vsel %vm8305_vm2, %v4497_v54, %v4501_v35  ;;  %v4531_v47 = vrot.slane %v4530_v12, 4  ;;  %v8152_v12 = vld [vmem:[%s9372_s1 + $0x218] sm:$0xff]  }
  0xb9   : > { %7444 = vmatprep.mubr.bf16.mxu1 %v6398_v53  ;;  %7473 = vmatpush3.bf16.msra.mxu1 %v8138_v40  ;;  %v4505_v40 = vrot.slane %v4503_v29, 4  ;;  %v4517_v53 = vshll.u32 %v6757_v46, 16  ;;  %v6402_v59 = vcombine.low %v1688_v39, %v1691_v42  ;;  %v4540_v29 = vrot.slane %v4538_v21, 4 }
  0xba   : > { %7474 = vmatprep.subr.bf16.mxu1 %v8142_v52  ;;  %v1696_v45 = vrot.slane %v1694_v37, 4  ;;  %v8863_v49 = vsel %vm8405_vm5, %v6371_v32, %v1694_v37  ;;  %v1564_v32 = vld [vmem:[%s8282_s18 + $0x88] sm:$0xf]  ;;  %v4536_v34 = vsel %vm8305_vm2, %v4531_v47, %v4535_v13  ;;  %v4557_v37 = vshll.u32 %v6762_v20, 16 }
  0xbb   : > { %v4519_v62 = vrot.slane %v4517_v53, 5  ;;  %v4562_v53 = vshrl.u32 %v6763_v43, 16  ;;  %v4565_v54 = vshll.u32 %v6763_v43, 16 }
  0xbc   : > { %v8869_v55 = vsel %vm8405_vm5, %v1696_v45, %v1697_v27  ;;  %v6373_v45 = vrot.slane %v1563_v26, 9 }
  0xbd   : > { %7475 = vmatpush3.bf16.msra.mxu1 %v8142_v52  ;;  %v4514_v52 = vshrl.u32 %v6757_v46, 16  ;;  %v6403_v5 = vcombine.low %v8863_v49, %v8869_v55  ;;  %v1708_v46 = vrot.slane %v1564_v32, 5  ;;  %v6764_v49 = vld [vmem:[%s8282_s18 + $0x40] sm:$0xf] }
  0xbe   : > { %7653 = vmatmul.mubr.bf16.gmra.mrb[24].mxu0 %v8139_v48  ;;  %7476 = vmatprep.subr.bf16.mxu1 %v8145_v6  ;;  %v4506_v48 = vor.u32 %v4505_v40, %v4501_v35  ;;  %v4571_v58 = vshll.u32 %v6764_v49, 16 }
  0xbf   : > { %7656 = vmatprep.mubr.bf16.mxu0 %v8141_v61  ;;  %v4516_v61 = vrot.slane %v4514_v52, 4  ;;  %v6765_v52 = vld [vmem:[%s8282_s18 + $0x44] sm:$0x1]  ;;  %v1709_v55 = vsel %vm8405_vm5, %v6373_v45, %v1708_v46  ;;  %v1710_v57 = vrot.slane %v1708_v46, 4 }
  0xc0   : > { %7445 = vmatmul.mubr.bf16.gmra.mrb[8].mxu1 %v6399_v9  ;;  %v4507_v60 = vrot.slane %v4506_v48, 4  ;;  %v6372_v9 = vrot.slane %v1560_v3, 9  ;;  %v4573_v2 = vrot.slane %v4571_v58, 5  ;;  %v8155_v45 = vld [vmem:[%s9372_s1 + $0x220] sm:$0xff]  }
  0xc1   : > { %7448 = vmatprep.mubr.bf16.mxu1 %v6400_v14  ;;  %7477 = vmatpush3.bf16.msra.mxu1 %v8145_v6  ;;  %v4520_v6 = vor.u32 %v4519_v62, %v4516_v61  ;;  %v1701_v14 = vrot.slane %v1561_v7, 5  ;;  %v4564_v62 = vrot.slane %v4562_v53, 4 }
  0xc2   : > { %7478 = vmatprep.subr.bf16.mxu1 %v8147_v22  ;;  %v4512_v18 = vsel %vm8305_vm2, %v4507_v60, %v4511_v44  ;;  %v4559_v44 = vrot.slane %v4557_v37, 5  ;;  %v8909_v60 = vld [vmem:[%s9372_s1 + $0x100] sm:$0xff]  }
  0xc3   : > { %v6818_v11 = vcombine.low %v4502_v63, %v4512_v18  ;;  %v4521_v17 = vrot.slane %v4520_v6, 4  ;;  %v1702_v23 = vsel %vm8405_vm5, %v6372_v9, %v1701_v14  ;;  %v1703_v24 = vrot.slane %v1701_v14, 4  ;;  %v1567_v9 = vld [vmem:[%s8282_s18 + $0x94] sm:$0xf] }
  0xc4   : > { %v4567_v63 = vrot.slane %v4565_v54, 5  ;;  %v4581_v18 = vshll.u32 %v6765_v52, 16  ;;  %v6771_v54 = vld [vmem:[%s8282_s18 + $0x5c] sm:$0x1] }
  0xc5   : > { %7479 = vmatpush3.bf16.msra.mxu1 %v8147_v22  ;;  %v4541_v22 = vshll.u32 %v6760_v15, 16  ;;  %v4526_v28 = vsel %vm8305_vm2, %v4521_v17, %v4525_v0  ;;  %v1705_v35 = vsel %vm8405_vm5, %v1703_v24, %v1704_v19  ;;  %v8150_v0 = vld [vmem:[%s9372_s1 + $0x210] sm:$0xff]   ;;  %v6766_v17 = vld [vmem:[%s8282_s18 + $0x48] sm:$0xf]  ;;  %v6767_v19 = vld [vmem:[%s8282_s18 + $0x4c] sm:$0xf] }
  0xc6   : > { %7657 = vmatmul.mubr.bf16.gmra.mrb[28].mxu0 %v8143_v16  ;;  %7480 = vmatprep.subr.bf16.mxu1 %v8149_v41  ;;  %v6761_v16 = vld [vmem:[%s8282_s18 + $0x34] sm:$0xf]  ;;  %v6819_v39 = vcombine.low %v4526_v28, %v4536_v34  ;;  %v6404_v40 = vcombine.low %v1702_v23, %v1705_v35  ;;  %v4568_v8 = vor.u32 %v4567_v63, %v4564_v62  ;;  %v4583_v15 = vrot.slane %v4581_v18, 5  ;;  %v1570_v35 = vld [vmem:[%s8282_s18 + $0xa0] sm:$0xf] }
  0xc7   : > { %7676 = vmatprep.mubr.bf16.mxu0 %v6818_v11  ;;  %v4547_v25 = vshll.u32 %v6761_v16, 16  ;;  %v4543_v30 = vrot.slane %v4541_v22, 5  ;;  %v4551_v31 = vshrl.u32 %v6761_v16, 16  ;;  %v1715_v16 = vrot.slane %v1567_v9, 5  ;;  %v6768_v22 = vld [vmem:[%s8282_s18 + $0x50] sm:$0x1] }
  0xc8   : > { %7449 = vmatmul.mubr.bf16.gmra.mrb[12].mxu1 %v6401_v38  ;;  %v1565_v38 = vld [vmem:[%s8282_s18 + $0x8c] sm:$0x1]  ;;  %v4569_v20 = vrot.slane %v4568_v8, 4  ;;  %v4586_v47 = vshrl.u32 %v6766_v17, 16  ;;  %v4589_v23 = vshll.u32 %v6766_v17, 16  ;;  %v4595_v28 = vshll.u32 %v6767_v19, 16 }
  0xc9   : > { %7452 = vmatprep.mubr.bf16.mxu1 %v6402_v59  ;;  %7481 = vmatpush3.bf16.msra.mxu1 %v8149_v41  ;;  %v4549_v36 = vrot.slane %v4547_v25, 5  ;;  %v4544_v27 = vor.u32 %v4543_v30, %v4540_v29  ;;  %v4553_v42 = vrot.slane %v4551_v31, 4  ;;  %v8148_v41 = vld [vmem:[%s9372_s1 + $0x208] sm:$0xff]   ;;  %v1711_v48 = vrot.slane %v1565_v38, 5  ;;  %v1569_v29 = vld [vmem:[%s8282_s18 + $0x9c] sm:$0xe] }
  0xca   : > { %7482 = vmatprep.subr.bf16.mxu1 %v8151_v10  ;;  %v4575_v59 = vshrl.u32 %v6764_v49, 16  ;;  %v1717_v26 = vrot.slane %v1715_v16, 4  ;;  %v4574_v30 = vsel %vm8305_vm2, %v4569_v20, %v4573_v2  ;;  %v4588_v31 = vrot.slane %v4586_v47, 4  ;;  %v6772_v20 = vld [vmem:[%s8282_s18 + $0x60] sm:$0xf] }
  0xcb   : > { %v4545_v50 = vrot.slane %v4544_v27, 4  ;;  %v4554_v51 = vor.u32 %v4553_v42, %v4549_v36  ;;  %v1712_v1 = vsel %vm8405_vm5, %v1710_v57, %v1711_v48  ;;  %v4591_v32 = vrot.slane %v4589_v23, 5  ;;  %v6774_v23 = vld [vmem:[%s8282_s18 + $0x68] sm:$0x1] }
  0xcc   : > { %v4577_v3 = vrot.slane %v4575_v59, 4  ;;  %v6405_v7 = vcombine.low %v1709_v55, %v1712_v1  ;;  %v4599_v34 = vshrl.u32 %v6767_v19, 16  ;;  %v4597_v38 = vrot.slane %v4595_v28, 5 }
  0xcd   : > { %7483 = vmatpush3.bf16.msra.mxu1 %v8151_v10  ;;  %v4550_v61 = vsel %vm8305_vm2, %v4545_v50, %v4549_v36  ;;  %v1568_v10 = vld [vmem:[%s8282_s18 + $0x98] sm:$0x1]  ;;  %v4592_v43 = vor.u32 %v4591_v32, %v4588_v31  ;;  %v6375_v48 = vrot.slane %v1569_v29, 9  ;;  %v1722_v49 = vrot.slane %v1570_v35, 5  ;;  %v1575_v31 = vld [vmem:[%s8282_s18 + $0xb4] sm:$0xe] }
  0xce   : > { %7677 = vmatmul.mubr.bf16.vlgmr.msra.gmra.mrb[0].mxu0 %v6819_v39  ;;  %7756 = vmatprep.subr.bf16.mxu1 %v8909_v60  ;;  %v4578_v14 = vor.u32 %v4577_v3, %v4573_v2  ;;  %v1718_v21 = vrot.slane %v1568_v10, 5  ;;  %v4605_v39 = vshll.u32 %v6768_v22, 16  ;;  %v8158_v2 = vld [vmem:[%s9372_s1 + $0x228] sm:$0xff]  }
  0xcf   : > { %7709 = vmatpush3.bf16.msra.mxu0 %v8761_v56  ;;  %v4555_v56 = vrot.slane %v4554_v51, 4  ;;  %v6770_v51 = vld [vmem:[%s8282_s18 + $0x58] sm:$0xf]  ;;  %v4593_v52 = vrot.slane %v4592_v43, 4  ;;  %v1723_v58 = vsel %vm8405_vm5, %v6375_v48, %v1722_v49  ;;  %v1724_v59 = vrot.slane %v1722_v49, 4 }
  0xd0   : > { %7453 = vmatmul.mubr.bf16.gmra.mrb[16].mxu1 %v6403_v5  ;;  %7710 = vmatprep.subr.bf16.mxu0 %v8148_v41  ;;  %v1566_v5 = vld [vmem:[%s8282_s18 + $0x90] sm:$0xe]  ;;  %v4579_v24 = vrot.slane %v4578_v14, 4  ;;  %v1719_v37 = vsel %vm8405_vm5, %v1717_v26, %v1718_v21  ;;  %v4607_v46 = vrot.slane %v4605_v39, 5  ;;  %v6773_v21 = vld [vmem:[%s8282_s18 + $0x64] sm:$0xf] }
  0xd1   : > { %7456 = vmatprep.mubr.bf16.mxu1 %v6404_v40  ;;  %v4560_v6 = vsel %vm8305_vm2, %v4555_v56, %v4559_v44  ;;  %v6374_v11 = vrot.slane %v1566_v5, 9  ;;  %v1571_v40 = vld [vmem:[%s8282_s18 + $0xa4] sm:$0x1]  ;;  %v6769_v44 = vld [vmem:[%s8282_s18 + $0x54] sm:$0xf]  ;;  %v4623_v56 = vshrl.u32 %v6770_v51, 16  ;;  %v4598_v62 = vsel %vm8305_vm2, %v4593_v52, %v4597_v38 }
  0xd2   : > { %v6820_v13 = vcombine.low %v4550_v61, %v4560_v6  ;;  %v4584_v36 = vsel %vm8305_vm2, %v4579_v24, %v4583_v15  ;;  %v1725_v50 = vrot.slane %v1571_v40, 5  ;;  %v4610_v55 = vshrl.u32 %v6769_v44, 16  ;;  %v8161_v14 = vld [vmem:[%s9372_s1 + $0x230] sm:$0xff]   ;;  %v8164_v48 = vld [vmem:[%s9372_s1 + $0x238] sm:$0xff]  }
  0xd3   : > { %7711 = vmatpush3.bf16.msra.mxu0 %v8148_v41  ;;  %v1716_v25 = vsel %vm8405_vm5, %v6374_v11, %v1715_v16  ;;  %v6821_v27 = vcombine.low %v4574_v30, %v4584_v36  ;;  %v4601_v41 = vrot.slane %v4599_v34, 4  ;;  %v4613_v57 = vshll.u32 %v6769_v44, 16  ;;  %v1573_v11 = vld [vmem:[%s8282_s18 + $0xac] sm:$0xf] }
  0xd4   : > { %7712 = vmatprep.subr.bf16.mxu0 %v8150_v0  ;;  %7680 = vmatprep.mubr.bf16.mxu0 %v6820_v13  ;;  %v6406_v42 = vcombine.low %v1716_v25, %v1719_v37  ;;  %v4619_v61 = vshll.u32 %v6770_v51, 16  ;;  %v1726_v3 = vsel %vm8405_vm5, %v1724_v59, %v1725_v50  ;;  %v4625_v5 = vrot.slane %v4623_v56, 4  ;;  %v1576_v37 = vld [vmem:[%s8282_s18 + $0xb8] sm:$0xf] }
  0xd5   : > { %v4602_v53 = vor.u32 %v4601_v41, %v4597_v38  ;;  %v4615_v1 = vrot.slane %v4613_v57, 5  ;;  %v4629_v6 = vshll.u32 %v6771_v54, 16  ;;  %v6407_v9 = vcombine.low %v1723_v58, %v1726_v3  ;;  %v6777_v57 = vld [vmem:[%s8282_s18 + $0x74] sm:$0x1] }
  0xd6   : > { %7681 = vmatmul.mubr.bf16.gmra.mrb[4].mxu0 %v6821_v27  ;;  %v4621_v18 = vrot.slane %v4619_v61, 5  ;;  %v1729_v19 = vrot.slane %v1573_v11, 5  ;;  %v4634_v24 = vshrl.u32 %v6772_v20, 16  ;;  %v4637_v25 = vshll.u32 %v6772_v20, 16 }
  0xd7   : > { %7713 = vmatpush3.bf16.msra.mxu0 %v8150_v0  ;;  %v4603_v63 = vrot.slane %v4602_v53, 4  ;;  %v4612_v0 = vrot.slane %v4610_v55, 4  ;;  %v4631_v17 = vrot.slane %v4629_v6, 5  ;;  %v4643_v30 = vshll.u32 %v6773_v21, 16  ;;  %v6776_v53 = vld [vmem:[%s8282_s18 + $0x70] sm:$0xf] }
  0xd8   : > { %7457 = vmatmul.mubr.bf16.gmra.mrb[20].mxu1 %v6405_v7  ;;  %7714 = vmatprep.subr.bf16.mxu0 %v8152_v12  ;;  %v1572_v7 = vld [vmem:[%s8282_s18 + $0xa8] sm:$0xe]  ;;  %v4626_v16 = vor.u32 %v4625_v5, %v4621_v18  ;;  %v1731_v29 = vrot.slane %v1729_v19, 4  ;;  %v4636_v34 = vrot.slane %v4634_v24, 4  ;;  %v4639_v35 = vrot.slane %v4637_v25, 5 }
  0xd9   : > { %7460 = vmatprep.mubr.bf16.mxu1 %v6406_v42  ;;  %v4608_v8 = vsel %vm8305_vm2, %v4603_v63, %v4607_v46  ;;  %v4616_v10 = vor.u32 %v4615_v1, %v4612_v0  ;;  %v6376_v13 = vrot.slane %v1572_v7, 9  ;;  %v4647_v36 = vshrl.u32 %v6773_v21, 16  ;;  %v1577_v42 = vld [vmem:[%s8282_s18 + $0xbc] sm:$0x1]  ;;  %v6775_v46 = vld [vmem:[%s8282_s18 + $0x6c] sm:$0xf] }
  0xda   : > { %v6822_v15 = vcombine.low %v4598_v62, %v4608_v8  ;;  %v4627_v26 = vrot.slane %v4626_v16, 4  ;;  %v4645_v40 = vrot.slane %v4643_v30, 5  ;;  %v4653_v27 = vshll.u32 %v6774_v23, 16  ;;  %v8153_v8 = vld [vmem:[%s8282_s18 + $0xc] sm:$0xff]  }
  0xdb   : > { %7715 = vmatpush3.bf16.msra.mxu0 %v8152_v12  ;;  %v1574_v12 = vld [vmem:[%s8282_s18 + $0xb0] sm:$0x1]  ;;  %v4617_v22 = vrot.slane %v4616_v10, 4  ;;  %v1730_v28 = vsel %vm8405_vm5, %v6376_v13, %v1729_v19  ;;  %v4640_v44 = vor.u32 %v4639_v35, %v4636_v34  ;;  %v6377_v50 = vrot.slane %v1575_v31, 9  ;;  %v6779_v13 = vld [vmem:[%s8282_s18 + $0x7c] sm:$0xf] }
  0xdc   : > { %7716 = vmatprep.subr.bf16.mxu0 %v8155_v45  ;;  %v1732_v47 = vrot.slane %v1574_v12, 5  ;;  %7684 = vmatprep.mubr.bf16.mxu0 %v6822_v15  ;;  %v4632_v38 = vsel %vm8305_vm2, %v4627_v26, %v4631_v17  ;;  %v4655_v49 = vrot.slane %v4653_v27, 5  ;;  %v1736_v51 = vrot.slane %v1576_v37, 5  ;;  %v6778_v12 = vld [vmem:[%s8282_s18 + $0x78] sm:$0xf] }
  0xdd   : > { %v4622_v32 = vsel %vm8305_vm2, %v4617_v22, %v4621_v18  ;;  %v1739_v52 = vrot.slane %v1577_v42, 5  ;;  %v4641_v54 = vrot.slane %v4640_v44, 4  ;;  %v4658_v58 = vshrl.u32 %v6775_v46, 16  ;;  %v6780_v17 = vld [vmem:[%s8282_s18 + $0x80] sm:$0x1] }
  0xde   : > { %v1733_v39 = vsel %vm8405_vm5, %v1731_v29, %v1732_v47  ;;  %v6823_v43 = vcombine.low %v4622_v32, %v4632_v38  ;;  %v4661_v59 = vshll.u32 %v6775_v46, 16  ;;  %v1737_v61 = vsel %vm8405_vm5, %v6377_v50, %v1736_v51  ;;  %v6781_v26 = vld [vmem:[%s8282_s18 + $0x84] sm:$0xf]  ;;  %v6782_v32 = vld [vmem:[%s8282_s18 + $0x88] sm:$0xf] }
  0xdf   : > { %7717 = vmatpush3.bf16.msra.mxu0 %v8155_v45  ;;  %v6408_v41 = vcombine.low %v1730_v28, %v1733_v39  ;;  %v4649_v45 = vrot.slane %v4647_v36, 4  ;;  %v1738_v56 = vrot.slane %v1736_v51, 4  ;;  %v4667_v62 = vshll.u32 %v6776_v53, 16  ;;  %v8154_v36 = vld [vmem:[%s8282_s18 + $0x18] sm:$0xff]   ;;  %v6783_v37 = vld [vmem:[%s8282_s18 + $0x8c] sm:$0x1] }
  0xe0   : > { %7461 = vmatmul.mubr.bf16.gmra.mrb[24].mxu1 %v6407_v9  ;;  %7718 = vmatprep.subr.bf16.mxu0 %v8158_v2  ;;  %v4671_v63 = vshrl.u32 %v6776_v53, 16  ;;  %v4646_v0 = vsel %vm8305_vm2, %v4641_v54, %v4645_v40  ;;  %v4663_v3 = vrot.slane %v4661_v59, 5  ;;  %v4677_v7 = vshll.u32 %v6777_v57, 16  ;;  %v6785_v57 = vld [vmem:[%s8282_s18 + $0x94] sm:$0xf] }
  0xe1   : > { %7685 = vmatmul.mubr.bf16.gmra.mrb[8].mxu0 %v6823_v43  ;;  %7464 = vmatprep.mubr.bf16.mxu1 %v6408_v41  ;;  %v4650_v55 = vor.u32 %v4649_v45, %v4645_v40  ;;  %v1740_v18 = vsel %vm8405_vm5, %v1738_v56, %v1739_v52  ;;  %v4669_v5 = vrot.slane %v4667_v62, 5  ;;  %v4682_v19 = vshrl.u32 %v6778_v12, 16  ;;  %v8156_v41 = vld [vmem:[%s8282_s18 + $0x24] sm:$0xff]  }
  0xe2   : > { %v4673_v6 = vrot.slane %v4671_v63, 4  ;;  %v6409_v10 = vcombine.low %v1737_v61, %v1740_v18  ;;  %v4679_v16 = vrot.slane %v4677_v7, 5  ;;  %v4685_v21 = vshll.u32 %v6778_v12, 16  ;;  %v6786_v61 = vld [vmem:[%s8282_s18 + $0x98] sm:$0x1] }
  0xe3   : > { %7719 = vmatpush3.bf16.msra.mxu0 %v8158_v2  ;;  %v4651_v1 = vrot.slane %v4650_v55, 4  ;;  %v4660_v2 = vrot.slane %v4658_v58, 4  ;;  %v4691_v22 = vshll.u32 %v6779_v13, 16  ;;  %v4695_v47 = vshrl.u32 %v6779_v13, 16  ;;  %v6784_v55 = vld [vmem:[%s8282_s18 + $0x90] sm:$0xf] }
  0xe4   : > { %7720 = vmatprep.subr.bf16.mxu0 %v8161_v14  ;;  %v4674_v15 = vor.u32 %v4673_v6, %v4669_v5  ;;  %v4684_v24 = vrot.slane %v4682_v19, 4  ;;  %v4701_v25 = vshll.u32 %v6780_v17, 16  ;;  %v4687_v29 = vrot.slane %v4685_v21, 5  ;;  %v6789_v12 = vld [vmem:[%s8282_s18 + $0xa4] sm:$0x1]  ;;  %v8157_v17 = vld [vmem:[%s8282_s18 + $0x30] sm:$0xff]  }
  0xe5   : > { %v4656_v9 = vsel %vm8305_vm2, %v4651_v1, %v4655_v49  ;;  %v4664_v11 = vor.u32 %v4663_v3, %v4660_v2  ;;  %v4693_v30 = vrot.slane %v4691_v22, 5  ;;  %v4697_v31 = vrot.slane %v4695_v47, 4  ;;  %v6787_v3 = vld [vmem:[%s8282_s18 + $0x9c] sm:$0xf] }
  0xe6   : > { %v4675_v23 = vrot.slane %v4674_v15, 4  ;;  %v4703_v35 = vrot.slane %v4701_v25, 5  ;;  %v4706_v38 = vshrl.u32 %v6781_v26, 16  ;;  %v4709_v39 = vshll.u32 %v6781_v26, 16 }
  0xe7   : > { %7721 = vmatpush3.bf16.msra.mxu0 %v8161_v14  ;;  %v6824_v14 = vcombine.low %v4646_v0, %v4656_v9  ;;  %v4665_v20 = vrot.slane %v4664_v11, 4  ;;  %v4688_v27 = vor.u32 %v4687_v29, %v4684_v24  ;;  %v4698_v42 = vor.u32 %v4697_v31, %v4693_v30  ;;  %v6788_v9 = vld [vmem:[%s8282_s18 + $0xa0] sm:$0xf]  ;;  %v8175_v29 = vld [vmem:[%s9372_s1 + $0x110] sm:$0xff]  }
  0xe8   : > { %7722 = vmatprep.subr.bf16.mxu0 %v8164_v48  ;;  %7465 = vmatmul.mubr.bf16.gmra.mrb[28].mxu1 %v6409_v10  ;;  %v4680_v34 = vsel %vm8305_vm2, %v4675_v23, %v4679_v16  ;;  %v4715_v43 = vshll.u32 %v6782_v32, 16  ;;  %v4708_v44 = vrot.slane %v4706_v38, 4  ;;  %v4711_v45 = vrot.slane %v4709_v39, 5  ;;  %v8159_v23 = vld [vmem:[%s8282_s18 + $0x3c] sm:$0xff]   ;;  %v6791_v38 = vld [vmem:[%s8282_s18 + $0xac] sm:$0xf] }
  0xe9   : > { %7688 = vmatprep.mubr.bf16.mxu0 %v6824_v14  ;;  %7484 = vmatprep.mubr.bf16.mxu1 %v8153_v8  ;;  %v4670_v28 = vsel %vm8305_vm2, %v4665_v20, %v4669_v5  ;;  %v4719_v46 = vshrl.u32 %v6782_v32, 16  ;;  %v4689_v49 = vrot.slane %v4688_v27, 4  ;;  %v4699_v50 = vrot.slane %v4698_v42, 4  ;;  %v8174_v8 = vld [vmem:[%s9372_s1 + $0x108] sm:$0xff]   ;;  %v6792_v39 = vld [vmem:[%s8282_s18 + $0xb0] sm:$0x1] }
  0xea   : > { %v6825_v40 = vcombine.low %v4670_v28, %v4680_v34  ;;  %v4717_v51 = vrot.slane %v4715_v43, 5  ;;  %v4712_v52 = vor.u32 %v4711_v45, %v4708_v44  ;;  %v4730_v56 = vshrl.u32 %v6784_v55, 16  ;;  %v6790_v34 = vld [vmem:[%s8282_s18 + $0xa8] sm:$0xf] }
  0xeb   : > { %7723 = vmatpush3.bf16.msra.mxu0 %v8164_v48  ;;  %v4725_v48 = vshll.u32 %v6783_v37, 16  ;;  %v4721_v53 = vrot.slane %v4719_v46, 4  ;;  %v4694_v58 = vsel %vm8305_vm2, %v4689_v49, %v4693_v30  ;;  %v4704_v59 = vsel %vm8305_vm2, %v4699_v50, %v4703_v35  ;;  %v8160_v49 = vld [vmem:[%s8282_s18 + $0x48] sm:$0xff]   ;;  %v8176_v50 = vld [vmem:[%s9372_s1 + $0x118] sm:$0xff]  }
  0xec   : > { %7689 = vmatmul.mubr.bf16.gmra.mrb[12].mxu0 %v6825_v40  ;;  %v4733_v62 = vshll.u32 %v6784_v55, 16  ;;  %v6826_v63 = vcombine.low %v4694_v58, %v4704_v59  ;;  %v4713_v0 = vrot.slane %v4712_v52, 4  ;;  %v4739_v2 = vshll.u32 %v6785_v57, 16  ;;  %v6793_v55 = vld [vmem:[%s8282_s18 + $0xb4] sm:$0xf] }
  0xed   : > { %v4727_v54 = vrot.slane %v4725_v48, 5  ;;  %v4722_v1 = vor.u32 %v4721_v53, %v4717_v51  ;;  %v4732_v18 = vrot.slane %v4730_v56, 4  ;;  %v4743_v6 = vshrl.u32 %v6785_v57, 16  ;;  %v8162_v57 = vld [vmem:[%s8282_s18 + $0x54] sm:$0xff]  }
  0xee   : > { %v4735_v5 = vrot.slane %v4733_v62, 5  ;;  %v4749_v7 = vshll.u32 %v6786_v61, 16  ;;  %7692 = vmatprep.mubr.bf16.mxu0 %v6826_v63  ;;  %v4718_v10 = vsel %vm8305_vm2, %v4713_v0, %v4717_v51  ;;  %v4741_v11 = vrot.slane %v4739_v2, 5  ;;  %v6794_v56 = vld [vmem:[%s8282_s18 + $0xb8] sm:$0xf] }
  0xef   : > { %v4754_v13 = vshrl.u32 %v6787_v3, 16  ;;  %v4745_v15 = vrot.slane %v4743_v6, 4  ;;  %v4757_v19 = vshll.u32 %v6787_v3, 16  ;;  %v4763_v22 = vshll.u32 %v6788_v9, 16  ;;  %v6795_v62 = vld [vmem:[%s8282_s18 + $0xbc] sm:$0x1] }
  0xf0   : > { %7485 = vmatmul.mubr.bf16.vlgmr.msra.gmra.mrb[0].mxu1 %v8154_v36  ;;  %v4736_v14 = vor.u32 %v4735_v5, %v4732_v18  ;;  %v4751_v16 = vrot.slane %v4749_v7, 5  ;;  %v4767_v47 = vshrl.u32 %v6788_v9, 16  ;;  %v4773_v32 = vshll.u32 %v6789_v12, 16  ;;  %v8177_v7 = vld [vmem:[%s9372_s1 + $0x120] sm:$0xff]  }
  0xf1   : > { %7764 = vmatpush3.bf16.msra.mxu1 %v8909_v60  ;;  %7488 = vmatprep.mubr.bf16.mxu1 %v8156_v41  ;;  %v4723_v60 = vrot.slane %v4722_v1, 4  ;;  %v4756_v21 = vrot.slane %v4754_v13, 4  ;;  %v4746_v26 = vor.u32 %v4745_v15, %v4741_v11  ;;  %v4759_v28 = vrot.slane %v4757_v19, 5  ;;  %v6797_v15 = vld [vmem:[%s8282_s18 + $0xc4] sm:$0xf] }
  0xf2   : > { %7757 = vmatprep.subr.bf16.mxu1 %v8174_v8  ;;  %v4737_v25 = vrot.slane %v4736_v14, 4  ;;  %v4765_v30 = vrot.slane %v4763_v22, 5  ;;  %v4769_v31 = vrot.slane %v4767_v47, 4  ;;  %v4778_v40 = vshrl.u32 %v6790_v34, 16 }
  0xf3   : > { %v4728_v20 = vsel %vm8305_vm2, %v4723_v60, %v4727_v54  ;;  %v4747_v36 = vrot.slane %v4746_v26, 4  ;;  %v4760_v37 = vor.u32 %v4759_v28, %v4756_v21  ;;  %v4775_v42 = vrot.slane %v4773_v32, 5  ;;  %v6798_v21 = vld [vmem:[%s8282_s18 + $0xc8] sm:$0x1]  ;;  %v8163_v26 = vld [vmem:[%s8282_s18 + $0x60] sm:$0xff]  }
  0xf4   : > { %v6827_v24 = vcombine.low %v4718_v10, %v4728_v20  ;;  %v4742_v35 = vsel %vm8305_vm2, %v4737_v25, %v4741_v11  ;;  %v4770_v27 = vor.u32 %v4769_v31, %v4765_v30  ;;  %v4781_v43 = vshll.u32 %v6790_v34, 16  ;;  %v6796_v11 = vld [vmem:[%s8282_s18 + $0xc0] sm:$0xf]  ;;  %v8178_v28 = vld [vmem:[%s9372_s1 + $0x128] sm:$0xff]  }
  0xf5   : > { %7765 = vmatpush3.bf16.msra.mxu1 %v8174_v8  ;;  %v4787_v41 = vshll.u32 %v6791_v38, 16  ;;  %v4752_v44 = vsel %vm8305_vm2, %v4747_v36, %v4751_v16  ;;  %v4761_v45 = vrot.slane %v4760_v37, 4  ;;  %v4780_v46 = vrot.slane %v4778_v40, 4  ;;  %v6799_v34 = vld [vmem:[%s8282_s18 + $0xcc] sm:$0xf] }
  0xf6   : > { %7758 = vmatprep.subr.bf16.mxu1 %v8175_v29  ;;  %7693 = vmatmul.mubr.bf16.gmra.mrb[16].mxu0 %v6827_v24  ;;  %v4791_v48 = vshrl.u32 %v6791_v38, 16  ;;  %v6828_v51 = vcombine.low %v4742_v35, %v4752_v44  ;;  %v4771_v52 = vrot.slane %v4770_v27, 4  ;;  %v4783_v53 = vrot.slane %v4781_v43, 5  ;;  %v6800_v35 = vld [vmem:[%s8282_s18 + $0xd0] sm:$0xf] }
  0xf7   : > { %v4789_v54 = vrot.slane %v4787_v41, 5  ;;  %v4766_v58 = vsel %vm8305_vm2, %v4761_v45, %v4765_v30  ;;  %v4797_v61 = vshll.u32 %v6792_v39, 16  ;;  %v4802_v1 = vshrl.u32 %v6793_v55, 16  ;;  %v8165_v36 = vld [vmem:[%s8282_s18 + $0x6c] sm:$0xff]   ;;  %v6801_v40 = vld [vmem:[%s8282_s18 + $0xd4] sm:$0x1] }
  0xf8   : > { %7489 = vmatmul.mubr.bf16.gmra.mrb[4].mxu1 %v8157_v17  ;;  %v4793_v59 = vrot.slane %v4791_v48, 4  ;;  %7696 = vmatprep.mubr.bf16.mxu0 %v6828_v51  ;;  %v4776_v63 = vsel %vm8305_vm2, %v4771_v52, %v4775_v42  ;;  %v4784_v0 = vor.u32 %v4783_v53, %v4780_v46  ;;  %v4805_v2 = vshll.u32 %v6793_v55, 16 }
  0xf9   : > { %7492 = vmatprep.mubr.bf16.mxu1 %v8159_v23  ;;  %7766 = vmatpush3.bf16.msra.mxu1 %v8175_v29  ;;  %v6829_v3 = vcombine.low %v4766_v58, %v4776_v63  ;;  %v4799_v5 = vrot.slane %v4797_v61, 5  ;;  %v4811_v6 = vshll.u32 %v6794_v56, 16  ;;  %v4804_v9 = vrot.slane %v4802_v1, 4  ;;  %v6842_v61 = vld [vmem:[%s8282_s18 + $0x18] sm:$0xe] }
  0xfa   : > { %7759 = vmatprep.subr.bf16.mxu1 %v8176_v50  ;;  %v4794_v18 = vor.u32 %v4793_v59, %v4789_v54  ;;  %v4785_v8 = vrot.slane %v4784_v0, 4  ;;  %v4807_v10 = vrot.slane %v4805_v2, 5  ;;  %v4815_v60 = vshrl.u32 %v6794_v56, 16  ;;  %v6843_v56 = vld [vmem:[%s8282_s18 + $0x1c] sm:$0xf] }
  0xfb   : > { %v4813_v13 = vrot.slane %v4811_v6, 5  ;;  %v4821_v14 = vshll.u32 %v6795_v62, 16  ;;  %v4826_v16 = vshrl.u32 %v6796_v11, 16  ;;  %v4829_v22 = vshll.u32 %v6796_v11, 16  ;;  %v6844_v0 = vld [vmem:[%s8282_s18 + $0x20] sm:$0x1] }
  0xfc   : > { %v4795_v12 = vrot.slane %v4794_v18, 4  ;;  %v4790_v17 = vsel %vm8305_vm2, %v4785_v8, %v4789_v54  ;;  %v4808_v19 = vor.u32 %v4807_v10, %v4804_v9  ;;  %v4817_v20 = vrot.slane %v4815_v60, 4  ;;  %v8166_v6 = vld [vmem:[%s8282_s18 + $0x78] sm:$0xff]   ;;  %v6845_v60 = vld [vmem:[%s8282_s18 + $0x24] sm:$0xe] }
  0xfd   : > { %7767 = vmatpush3.bf16.msra.mxu1 %v8176_v50  ;;  %v4823_v23 = vrot.slane %v4821_v14, 5  ;;  %v4828_v24 = vrot.slane %v4826_v16, 4  ;;  %v4835_v25 = vshll.u32 %v6797_v15, 16  ;;  %v4831_v32 = vrot.slane %v4829_v22, 5  ;;  %v8179_v50 = vld [vmem:[%s9372_s1 + $0x130] sm:$0xff]   ;;  %v8167_v16 = vld [vmem:[%s8282_s18 + $0x84] sm:$0xff]  }
  0xfe   : > { %7760 = vmatprep.subr.bf16.mxu1 %v8177_v7  ;;  %7697 = vmatmul.mubr.bf16.gmra.mrb[20].mxu0 %v6829_v3  ;;  %v4800_v47 = vsel %vm8305_vm2, %v4795_v12, %v4799_v5  ;;  %v4809_v30 = vrot.slane %v4808_v19, 4  ;;  %v4818_v31 = vor.u32 %v4817_v20, %v4813_v13  ;;  %v4839_v38 = vshrl.u32 %v6797_v15, 16  ;;  %v6846_v11 = vld [vmem:[%s8282_s18 + $0x28] sm:$0xf]  ;;  %v6847_v15 = vld [vmem:[%s8282_s18 + $0x2c] sm:$0x1] }
  0xff   : > { %v6830_v29 = vcombine.low %v4790_v17, %v4800_v47  ;;  %v4837_v37 = vrot.slane %v4835_v25, 5  ;;  %v4845_v39 = vshll.u32 %v6798_v21, 16  ;;  %v4850_v27 = vshrl.u32 %v6799_v34, 16  ;;  %v6848_v22 = vld [vmem:[%s8282_s18 + $0x30] sm:$0xe] }
 0x100   : > { %7493 = vmatmul.mubr.bf16.gmra.mrb[8].mxu1 %v8160_v49  ;;  %v4814_v42 = vsel %vm8305_vm2, %v4809_v30, %v4813_v13  ;;  %v4819_v43 = vrot.slane %v4818_v31, 4  ;;  %v4832_v41 = vor.u32 %v4831_v32, %v4828_v24  ;;  %v4853_v44 = vshll.u32 %v6799_v34, 16  ;;  %v6849_v25 = vld [vmem:[%s8282_s18 + $0x34] sm:$0xf] }
 0x101   : > { %7496 = vmatprep.mubr.bf16.mxu1 %v8162_v57  ;;  %7768 = vmatpush3.bf16.msra.mxu1 %v8177_v7  ;;  %v4841_v45 = vrot.slane %v4839_v38, 4  ;;  %v4847_v46 = vrot.slane %v4845_v39, 5  ;;  %v4852_v48 = vrot.slane %v4850_v27, 4  ;;  %v4859_v49 = vshll.u32 %v6800_v35, 16  ;;  %v8180_v7 = vld [vmem:[%s9372_s1 + $0x138] sm:$0xff]  }
 0x102   : > { %7761 = vmatprep.subr.bf16.mxu1 %v8178_v28  ;;  %7700 = vmatprep.mubr.bf16.mxu0 %v6830_v29  ;;  %v4824_v51 = vsel %vm8305_vm2, %v4819_v43, %v4823_v23  ;;  %v4833_v52 = vrot.slane %v4832_v41, 4  ;;  %v4855_v53 = vrot.slane %v4853_v44, 5  ;;  %v4863_v54 = vshrl.u32 %v6800_v35, 16  ;;  %v6853_v38 = vld [vmem:[%s8282_s18 + $0x44] sm:$0x1] }
 0x103   : > { %v6831_v55 = vcombine.low %v4814_v42, %v4824_v51  ;;  %v4842_v57 = vor.u32 %v4841_v45, %v4837_v37  ;;  %v4861_v58 = vrot.slane %v4859_v49, 5  ;;  %v4869_v59 = vshll.u32 %v6801_v40, 16  ;;  %v8168_v42 = vld [vmem:[%s8282_s18 + $0x90] sm:$0xff]   ;;  %v6854_v41 = vld [vmem:[%s8282_s18 + $0x48] sm:$0xe] }
 0x104   : > { %v4856_v62 = vor.u32 %v4855_v53, %v4852_v48  ;;  %v4865_v63 = vrot.slane %v4863_v54, 4  ;;  %v6890_v1 = vrot.slane %v6842_v61, 9  ;;  %v4838_v2 = vsel %vm8305_vm2, %v4833_v52, %v4837_v37  ;;  %v6852_v37 = vld [vmem:[%s8282_s18 + $0x40] sm:$0xf]  ;;  %v6855_v49 = vld [vmem:[%s8282_s18 + $0x4c] sm:$0xf] }
 0x105   : > { %7769 = vmatpush3.bf16.msra.mxu1 %v8178_v28  ;;  %v4843_v3 = vrot.slane %v4842_v57, 4  ;;  %v5357_v18 = vrot.slane %v6843_v56, 5  ;;  %v5360_v5 = vrot.slane %v6844_v0, 5  ;;  %v4871_v10 = vrot.slane %v4869_v59, 5  ;;  %v8169_v48 = vld [vmem:[%s8282_s18 + $0x9c] sm:$0xff]  }
 0x106   : > { %7762 = vmatprep.subr.bf16.mxu1 %v8179_v50  ;;  %7701 = vmatmul.mubr.bf16.gmra.mrb[24].mxu0 %v6831_v55  ;;  %v4857_v8 = vrot.slane %v4856_v62, 4  ;;  %v4866_v9 = vor.u32 %v4865_v63, %v4861_v58  ;;  %v5364_v21 = vrot.slane %v6846_v11, 5  ;;  %v6891_v23 = vrot.slane %v6845_v60, 9  ;;  %v6857_v57 = vld [vmem:[%s8282_s18 + $0x54] sm:$0xe] }
 0x107   : > { %v4848_v12 = vsel %vm8305_vm2, %v4843_v3, %v4847_v46  ;;  %v5358_v13 = vsel %vm8405_vm5, %v6890_v1, %v5357_v18  ;;  %v5359_v14 = vrot.slane %v5357_v18, 4  ;;  %v5367_v24 = vrot.slane %v6847_v15, 5  ;;  %v6859_v59 = vld [vmem:[%s8282_s18 + $0x5c] sm:$0x1]  ;;  %v6860_v18 = vld [vmem:[%s8282_s18 + $0x60] sm:$0xe] }
 0x108   : > { %7497 = vmatmul.mubr.bf16.gmra.mrb[12].mxu1 %v8163_v26  ;;  %v6832_v17 = vcombine.low %v4838_v2, %v4848_v12  ;;  %v4862_v19 = vsel %vm8305_vm2, %v4857_v8, %v4861_v58  ;;  %v4867_v20 = vrot.slane %v4866_v9, 4  ;;  %v6850_v26 = vld [vmem:[%s8282_s18 + $0x38] sm:$0x1]  ;;  %v5366_v30 = vrot.slane %v5364_v21, 4  ;;  %v6862_v8 = vld [vmem:[%s8282_s18 + $0x68] sm:$0x1] }
 0x109   : > { %7500 = vmatprep.mubr.bf16.mxu1 %v8165_v36  ;;  %7770 = vmatpush3.bf16.msra.mxu1 %v8179_v50  ;;  %v5361_v47 = vsel %vm8405_vm5, %v5359_v14, %v5360_v5  ;;  %v6892_v31 = vrot.slane %v6848_v22, 9  ;;  %v5371_v34 = vrot.slane %v6849_v25, 5  ;;  %v5374_v35 = vrot.slane %v6850_v26, 5  ;;  %v6851_v36 = vld [vmem:[%s8282_s18 + $0x3c] sm:$0xe]  ;;  %v8170_v15 = vld [vmem:[%s8282_s18 + $0xa8] sm:$0xff]  }
 0x10a   : > { %7763 = vmatprep.subr.bf16.mxu1 %v8180_v7  ;;  %7704 = vmatprep.mubr.bf16.mxu0 %v6832_v17  ;;  %v4872_v28 = vsel %vm8305_vm2, %v4867_v20, %v4871_v10  ;;  %v6922_v29 = vcombine.low %v5358_v13, %v5361_v47  ;;  %v6893_v39 = vrot.slane %v6851_v36, 9  ;;  %v5378_v40 = vrot.slane %v6852_v37, 5  ;;  %v6856_v50 = vld [vmem:[%s8282_s18 + $0x50] sm:$0x1]  ;;  %v6858_v58 = vld [vmem:[%s8282_s18 + $0x58] sm:$0xf] }
 0x10b   : > { %v6833_v32 = vcombine.low %v4862_v19, %v4872_v28  ;;  %v5373_v27 = vrot.slane %v5371_v34, 4  ;;  %v5381_v43 = vrot.slane %v6853_v38, 5  ;;  %v5365_v44 = vsel %vm8405_vm5, %v6891_v23, %v5364_v21  ;;  %v6861_v5 = vld [vmem:[%s8282_s18 + $0x64] sm:$0xf]  ;;  %v6863_v13 = vld [vmem:[%s8282_s18 + $0x6c] sm:$0xe] }
 0x10c   : > { %v5368_v45 = vsel %vm8405_vm5, %v5366_v30, %v5367_v24  ;;  %v5380_v46 = vrot.slane %v5378_v40, 4  ;;  %v6894_v51 = vrot.slane %v6854_v41, 9  ;;  %v5372_v52 = vsel %vm8405_vm5, %v6892_v31, %v5371_v34  ;;  %v6864_v19 = vld [vmem:[%s8282_s18 + $0x70] sm:$0xf]  ;;  %v6865_v20 = vld [vmem:[%s8282_s18 + $0x74] sm:$0x1] }
 0x10d   : > { %7771 = vmatpush3.bf16.msra.mxu1 %v8180_v7  ;;  %v5375_v53 = vsel %vm8405_vm5, %v5373_v27, %v5374_v35  ;;  %v5385_v54 = vrot.slane %v6855_v49, 5  ;;  %v5388_v55 = vrot.slane %v6856_v50, 5  ;;  %v6923_v61 = vcombine.low %v5365_v44, %v5368_v45  ;;  %v8171_v23 = vld [vmem:[%s8282_s18 + $0xb4] sm:$0xff]   ;;  %v6514_v26 = vld [vmem:[%s8282_s18 + $0x6c] sm:$0xf] }
 0x10e   : > { %7705 = vmatmul.mubr.bf16.gmra.mrb[28].mxu0 %v6833_v32  ;;  %v9119_v56 = vsel %vm8405_vm5, %v6893_v39, %v5378_v40  ;;  %v6895_v63 = vrot.slane %v6857_v57, 9  ;;  %v6924_v0 = vcombine.low %v5372_v52, %v5375_v53  ;;  %v9123_v1 = vsel %vm8405_vm5, %v5380_v46, %v5381_v43  ;;  %v6515_v28 = vld [vmem:[%s8282_s18 + $0x70] sm:$0xf]  ;;  %v6516_v31 = vld [vmem:[%s8282_s18 + $0x74] sm:$0x1] }
 0x10f   : > { %7724 = vmatprep.mubr.bf16.mxu0 %v6922_v29  ;;  %v5387_v62 = vrot.slane %v5385_v54, 4  ;;  %v5392_v2 = vrot.slane %v6858_v58, 5  ;;  %v5395_v3 = vrot.slane %v6859_v59, 5  ;;  %v6896_v9 = vrot.slane %v6860_v18, 9  ;;  %v6866_v35 = vld [vmem:[%s8282_s18 + $0x78] sm:$0xe] }
 0x110   : > { %7501 = vmatmul.mubr.bf16.gmra.mrb[16].mxu1 %v8166_v6  ;;  %v9129_v6 = vsel %vm8405_vm5, %v6894_v51, %v5385_v54  ;;  %v5399_v10 = vrot.slane %v6861_v5, 5  ;;  %v5402_v12 = vrot.slane %v6862_v8, 5  ;;  %v6925_v14 = vcombine.low %v9119_v56, %v9123_v1  ;;  %v6867_v40 = vld [vmem:[%s8282_s18 + $0x7c] sm:$0xf]  ;;  %v6868_v27 = vld [vmem:[%s8282_s18 + $0x80] sm:$0x1] }
 0x111   : > { %7504 = vmatprep.mubr.bf16.mxu1 %v8167_v16  ;;  %v9133_v7 = vsel %vm8405_vm5, %v5387_v62, %v5388_v55  ;;  %v9138_v60 = vsel %vm8405_vm5, %v6895_v63, %v5392_v2  ;;  %v5394_v11 = vrot.slane %v5392_v2, 4  ;;  %v6897_v21 = vrot.slane %v6863_v13, 9  ;;  %v6517_v45 = vld [vmem:[%s8282_s18 + $0x78] sm:$0xf]  ;;  %v6518_v51 = vld [vmem:[%s8282_s18 + $0x7c] sm:$0xf] }
 0x112   : > { %v9146_v16 = vsel %vm8405_vm5, %v6896_v9, %v5399_v10  ;;  %v5401_v17 = vrot.slane %v5399_v10, 4  ;;  %v6926_v22 = vcombine.low %v9129_v6, %v9133_v7  ;;  %v5406_v24 = vrot.slane %v6864_v19, 5  ;;  %v6519_v57 = vld [vmem:[%s8282_s18 + $0x80] sm:$0x1]  ;;  %v6869_v62 = vld [vmem:[%s8282_s18 + $0x84] sm:$0xe] }
 0x113   : > { %v9154_v47 = vsel %vm8405_vm5, %v5394_v11, %v5395_v3  ;;  %v5409_v25 = vrot.slane %v6865_v20, 5  ;;  %v2819_v32 = vshrl.u32 %v6514_v26, 16  ;;  %v2822_v34 = vshll.u32 %v6514_v26, 16  ;;  %v6870_v3 = vld [vmem:[%s8282_s18 + $0x88] sm:$0xf]  ;;  %v8172_v9 = vld [vmem:[%s8282_s18 + $0xc0] sm:$0xff]  }
 0x114   : > { %v6927_v29 = vcombine.low %v9138_v60, %v9154_v47  ;;  %v9163_v30 = vsel %vm8405_vm5, %v5401_v17, %v5402_v12  ;;  %v9171_v37 = vsel %vm8405_vm5, %v6897_v21, %v5406_v24  ;;  %v5408_v38 = vrot.slane %v5406_v24, 4  ;;  %v6871_v8 = vld [vmem:[%s8282_s18 + $0x8c] sm:$0x1]  ;;  %v6521_v21 = vld [vmem:[%s8282_s18 + $0x88] sm:$0xf] }
 0x115   : > { %v6928_v36 = vcombine.low %v9146_v16, %v9163_v30  ;;  %v2828_v39 = vshll.u32 %v6515_v28, 16  ;;  %v2824_v43 = vrot.slane %v2822_v34, 5  ;;  %v2832_v41 = vshrl.u32 %v6515_v28, 16 }
 0x116   : > { %7725 = vmatmul.mubr.bf16.vlgmr.msra.gmra.mrb[0].mxu0 %v6923_v61  ;;  %v2838_v44 = vshll.u32 %v6516_v31, 16  ;;  %v9178_v46 = vsel %vm8405_vm5, %v5408_v38, %v5409_v25  ;;  %v6898_v49 = vrot.slane %v6866_v35, 9  ;;  %v5413_v50 = vrot.slane %v6867_v40, 5  ;;  %v6522_v31 = vld [vmem:[%s8282_s18 + $0x8c] sm:$0x1] }
 0x117   : > { %7728 = vmatprep.mubr.bf16.mxu0 %v6924_v0  ;;  %v6929_v52 = vcombine.low %v9171_v37, %v9178_v46  ;;  %v2834_v54 = vrot.slane %v2832_v41, 4  ;;  %v5416_v61 = vrot.slane %v6868_v27, 5  ;;  %v2843_v56 = vshrl.u32 %v6517_v45, 16  ;;  %v6872_v27 = vld [vmem:[%s8282_s18 + $0x90] sm:$0xe] }
 0x118   : > { %7505 = vmatmul.mubr.bf16.gmra.mrb[20].mxu1 %v8168_v42  ;;  %v2821_v42 = vrot.slane %v2819_v32, 4  ;;  %v2840_v55 = vrot.slane %v2838_v44, 5  ;;  %v9186_v58 = vsel %vm8405_vm5, %v6898_v49, %v5413_v50  ;;  %v5415_v59 = vrot.slane %v5413_v50, 4 }
 0x119   : > { %7508 = vmatprep.mubr.bf16.mxu1 %v8169_v48  ;;  %v2830_v48 = vrot.slane %v2828_v39, 5  ;;  %v2846_v1 = vshll.u32 %v6517_v45, 16  ;;  %v2852_v2 = vshll.u32 %v6518_v51, 16  ;;  %v2845_v5 = vrot.slane %v2843_v56, 4  ;;  %v6873_v45 = vld [vmem:[%s8282_s18 + $0x94] sm:$0xf] }
 0x11a   : > { %v2825_v53 = vor.u32 %v2824_v43, %v2821_v42  ;;  %v9192_v18 = vsel %vm8405_vm5, %v5415_v59, %v5416_v61  ;;  %v2856_v6 = vshrl.u32 %v6518_v51, 16  ;;  %v2862_v7 = vshll.u32 %v6519_v57, 16  ;;  %v6524_v57 = vld [vmem:[%s8282_s18 + $0x94] sm:$0xf] }
 0x11b   : > { %v2835_v0 = vor.u32 %v2834_v54, %v2830_v48  ;;  %v6930_v12 = vcombine.low %v9186_v58, %v9192_v18  ;;  %v2848_v13 = vrot.slane %v2846_v1, 5  ;;  %v6899_v20 = vrot.slane %v6869_v62, 9  ;;  %v6523_v54 = vld [vmem:[%s8282_s18 + $0x90] sm:$0xf]  ;;  %v6875_v1 = vld [vmem:[%s8282_s18 + $0x9c] sm:$0xe] }
 0x11c   : > { %v2826_v63 = vrot.slane %v2825_v53, 4  ;;  %v2858_v17 = vrot.slane %v2856_v6, 4  ;;  %v2864_v19 = vrot.slane %v2862_v7, 5  ;;  %v5420_v24 = vrot.slane %v6870_v3, 5  ;;  %v6874_v53 = vld [vmem:[%s8282_s18 + $0x98] sm:$0x1] }
 0x11d   : > { %v2836_v11 = vrot.slane %v2835_v0, 4  ;;  %v5423_v25 = vrot.slane %v6871_v8, 5  ;;  %v2876_v40 = vshll.u32 %v6521_v21, 16  ;;  %v2880_v44 = vshrl.u32 %v6521_v21, 16  ;;  %v6876_v7 = vld [vmem:[%s8282_s18 + $0xa0] sm:$0xf] }
 0x11e   : > { %7729 = vmatmul.mubr.bf16.gmra.mrb[4].mxu0 %v6925_v14  ;;  %v2831_v10 = vsel %vm8305_vm2, %v2826_v63, %v2830_v48  ;;  %v6520_v14 = vld [vmem:[%s8282_s18 + $0x84] sm:$0xf]  ;;  %v9207_v38 = vsel %vm8405_vm5, %v6899_v20, %v5420_v24  ;;  %v5422_v39 = vrot.slane %v5420_v24, 4  ;;  %v2886_v51 = vshll.u32 %v6522_v31, 16  ;;  %v6525_v63 = vld [vmem:[%s8282_s18 + $0x98] sm:$0x1] }
 0x11f   : > { %7732 = vmatprep.mubr.bf16.mxu0 %v6926_v22  ;;  %v2841_v22 = vsel %vm8305_vm2, %v2836_v11, %v2840_v55  ;;  %v2867_v32 = vshrl.u32 %v6520_v14, 16  ;;  %v2870_v34 = vshll.u32 %v6520_v14, 16  ;;  %v2878_v50 = vrot.slane %v2876_v40, 5  ;;  %v6526_v20 = vld [vmem:[%s8282_s18 + $0x9c] sm:$0xf] }
 0x120   : > { %7509 = vmatmul.mubr.bf16.gmra.mrb[24].mxu1 %v8170_v15  ;;  %v2854_v15 = vrot.slane %v2852_v2, 5  ;;  %v6562_v26 = vcombine.low %v2831_v10, %v2841_v22  ;;  %v9218_v49 = vsel %vm8405_vm5, %v5422_v39, %v5423_v25  ;;  %v2882_v55 = vrot.slane %v2880_v44, 4  ;;  %v6527_v25 = vld [vmem:[%s8282_s18 + $0xa0] sm:$0xf]  ;;  %v6528_v39 = vld [vmem:[%s8282_s18 + $0xa4] sm:$0x1] }
 0x121   : > { %7512 = vmatprep.mubr.bf16.mxu1 %v8171_v23  ;;  %v2849_v23 = vor.u32 %v2848_v13, %v2845_v5  ;;  %v2869_v43 = vrot.slane %v2867_v32, 4  ;;  %v2872_v41 = vrot.slane %v2870_v34, 5  ;;  %v6931_v47 = vcombine.low %v9207_v38, %v9218_v49  ;;  %v6877_v13 = vld [vmem:[%s8282_s18 + $0xa4] sm:$0x1]  ;;  %v6879_v44 = vld [vmem:[%s8282_s18 + $0xac] sm:$0xf] }
 0x122   : > { %v2859_v28 = vor.u32 %v2858_v17, %v2854_v15  ;;  %v2888_v61 = vrot.slane %v2886_v51, 5  ;;  %v6900_v56 = vrot.slane %v6872_v27, 9  ;;  %v5427_v62 = vrot.slane %v6873_v45, 5 }
 0x123   : > { %v2850_v35 = vrot.slane %v2849_v23, 4  ;;  %v2883_v16 = vor.u32 %v2882_v55, %v2878_v50  ;;  %v5430_v30 = vrot.slane %v6874_v53, 5  ;;  %v2894_v5 = vshll.u32 %v6523_v54, 16  ;;  %v6880_v53 = vld [vmem:[%s8282_s18 + $0xb0] sm:$0x1] }
 0x124   : > { %v2860_v42 = vrot.slane %v2859_v28, 4  ;;  %v9234_v2 = vsel %vm8405_vm5, %v6900_v56, %v5427_v62  ;;  %v5429_v3 = vrot.slane %v5427_v62, 4  ;;  %v2900_v6 = vshll.u32 %v6524_v57, 16 }
 0x125   : > { %v2855_v48 = vsel %vm8305_vm2, %v2850_v35, %v2854_v15  ;;  %v2904_v11 = vshrl.u32 %v6524_v57, 16  ;;  %v2896_v15 = vrot.slane %v2894_v5, 5  ;;  %v6901_v24 = vrot.slane %v6875_v1, 9 }
 0x126   : > { %7733 = vmatmul.mubr.bf16.gmra.mrb[8].mxu0 %v6927_v29  ;;  %v2865_v60 = vsel %vm8305_vm2, %v2860_v42, %v2864_v19  ;;  %v2873_v29 = vor.u32 %v2872_v41, %v2869_v43  ;;  %v5431_v14 = vsel %vm8405_vm5, %v5429_v3, %v5430_v30  ;;  %v2902_v17 = vrot.slane %v2900_v6, 5  ;;  %v6878_v43 = vld [vmem:[%s8282_s18 + $0xa8] sm:$0xe] }
 0x127   : > { %7736 = vmatprep.mubr.bf16.mxu0 %v6928_v36  ;;  %v6563_v59 = vcombine.low %v2855_v48, %v2865_v60  ;;  %v2891_v36 = vshrl.u32 %v6523_v54, 16  ;;  %v2910_v19 = vshll.u32 %v6525_v63, 16  ;;  %v6932_v22 = vcombine.low %v9234_v2, %v5431_v14  ;;  %v6529_v54 = vld [vmem:[%s8282_s18 + $0xa8] sm:$0xf]  ;;  %v6881_v2 = vld [vmem:[%s8282_s18 + $0xb4] sm:$0xe] }
 0x128   : > { %7513 = vmatmul.mubr.bf16.gmra.mrb[28].mxu1 %v8172_v9  ;;  %v2874_v0 = vrot.slane %v2873_v29, 4  ;;  %v2884_v9 = vrot.slane %v2883_v16, 4  ;;  %v2906_v23 = vrot.slane %v2904_v11, 4  ;;  %v5434_v32 = vrot.slane %v6876_v7, 5  ;;  %v6883_v14 = vld [vmem:[%s8282_s18 + $0xbc] sm:$0x1] }
 0x129   : > { %7548 = vmatprep.mubr.bf16.mxu1 %v6562_v26  ;;  %v2893_v10 = vrot.slane %v2891_v36, 4  ;;  %v2912_v31 = vrot.slane %v2910_v19, 5  ;;  %v5437_v35 = vrot.slane %v6877_v13, 5  ;;  %v2915_v40 = vshrl.u32 %v6526_v20, 16 }
 0x12a   : > { %v2879_v8 = vsel %vm8305_vm2, %v2874_v0, %v2878_v50  ;;  %v2889_v21 = vsel %vm8305_vm2, %v2884_v9, %v2888_v61  ;;  %v2907_v34 = vor.u32 %v2906_v23, %v2902_v17  ;;  %v2918_v27 = vshll.u32 %v6526_v20, 16  ;;  %v6531_v0 = vld [vmem:[%s8282_s18 + $0xb0] sm:$0x1]  ;;  %v6533_v23 = vld [vmem:[%s8282_s18 + $0xb8] sm:$0xf] }
 0x12b   : > { %v6564_v26 = vcombine.low %v2879_v8, %v2889_v21  ;;  %v2897_v28 = vor.u32 %v2896_v15, %v2893_v10  ;;  %v9256_v46 = vsel %vm8405_vm5, %v6901_v24, %v5434_v32  ;;  %v2924_v42 = vshll.u32 %v6527_v25, 16  ;;  %v6882_v8 = vld [vmem:[%s8282_s18 + $0xb8] sm:$0xf] }
 0x12c   : > { %v2908_v58 = vrot.slane %v2907_v34, 4  ;;  %v2917_v18 = vrot.slane %v2915_v40, 4  ;;  %v2928_v41 = vshrl.u32 %v6527_v25, 16  ;;  %v2934_v51 = vshll.u32 %v6528_v39, 16  ;;  %v6534_v34 = vld [vmem:[%s8282_s18 + $0xbc] sm:$0x1] }
 0x12d   : > { %v2898_v37 = vrot.slane %v2897_v28, 4  ;;  %v2926_v50 = vrot.slane %v2924_v42, 5  ;;  %v6902_v62 = vrot.slane %v6878_v43, 9  ;;  %v5441_v63 = vrot.slane %v6879_v44, 5 }
 0x12e   : > { %7737 = vmatmul.mubr.bf16.gmra.mrb[12].mxu0 %v6929_v52  ;;  %v5436_v52 = vrot.slane %v5434_v32, 4  ;;  %v2913_v60 = vsel %vm8305_vm2, %v2908_v58, %v2912_v31  ;;  %v2930_v57 = vrot.slane %v2928_v41, 4  ;;  %v2936_v56 = vrot.slane %v2934_v51, 5  ;;  %v6535_v51 = vld [vmem:[%s8282_s18 + $0xc0] sm:$0xf] }
 0x12f   : > { %7740 = vmatprep.mubr.bf16.mxu0 %v6930_v12  ;;  %v2920_v12 = vrot.slane %v2918_v27, 5  ;;  %v2903_v45 = vsel %vm8305_vm2, %v2898_v37, %v2902_v17  ;;  %v5444_v36 = vrot.slane %v6880_v53, 5  ;;  %v2939_v1 = vshrl.u32 %v6529_v54, 16  ;;  %v6532_v17 = vld [vmem:[%s8282_s18 + $0xb4] sm:$0xf] }
 0x130   : > { %7549 = vmatmul.mubr.bf16.vlgmr.msra.gmra.mrb[16].mxu1 %v6563_v59  ;;  %v9264_v48 = vsel %vm8405_vm5, %v5436_v52, %v5437_v35  ;;  %v6530_v59 = vld [vmem:[%s8282_s18 + $0xac] sm:$0xf]  ;;  %v6565_v61 = vcombine.low %v2903_v45, %v2913_v60  ;;  %v2931_v30 = vor.u32 %v2930_v57, %v2926_v50  ;;  %v5442_v3 = vsel %vm8405_vm5, %v6902_v62, %v5441_v63  ;;  %v6884_v52 = vld [vmem:[%s8282_s18 + $0xc0] sm:$0xe] }
 0x131   : > { %7552 = vmatprep.mubr.bf16.mxu1 %v6564_v26  ;;  %v6933_v29 = vcombine.low %v9256_v46, %v9264_v48  ;;  %v2921_v55 = vor.u32 %v2920_v12, %v2917_v18  ;;  %v5443_v5 = vrot.slane %v5441_v63, 4  ;;  %v2942_v6 = vshll.u32 %v6529_v54, 16  ;;  %v6885_v12 = vld [vmem:[%s8282_s18 + $0xc4] sm:$0xf] }
 0x132   : > { %v2948_v7 = vshll.u32 %v6530_v59, 16  ;;  %v2932_v10 = vrot.slane %v2931_v30, 4  ;;  %v2941_v11 = vrot.slane %v2939_v1, 4  ;;  %v2952_v13 = vshrl.u32 %v6530_v59, 16 }
 0x133   : > { %v2922_v16 = vrot.slane %v2921_v55, 4  ;;  %v5445_v38 = vsel %vm8405_vm5, %v5443_v5, %v5444_v36  ;;  %v2944_v49 = vrot.slane %v2942_v6, 5  ;;  %v2958_v15 = vshll.u32 %v6531_v0, 16  ;;  %v6887_v5 = vld [vmem:[%s8282_s18 + $0xcc] sm:$0xe] }
 0x134   : > { %v2937_v19 = vsel %vm8305_vm2, %v2932_v10, %v2936_v56  ;;  %v6934_v20 = vcombine.low %v5442_v3, %v5445_v38  ;;  %v2954_v21 = vrot.slane %v2952_v13, 4  ;;  %v5448_v28 = vrot.slane %v6882_v8, 5  ;;  %v6888_v10 = vld [vmem:[%s8282_s18 + $0xd0] sm:$0xf] }
 0x135   : > { %v2927_v9 = vsel %vm8305_vm2, %v2922_v16, %v2926_v50  ;;  %v2945_v25 = vor.u32 %v2944_v49, %v2941_v11  ;;  %v2960_v26 = vrot.slane %v2958_v15, 5  ;;  %v5451_v32 = vrot.slane %v6883_v14, 5  ;;  %v6886_v50 = vld [vmem:[%s8282_s18 + $0xc8] sm:$0x1]  ;;  %v6889_v49 = vld [vmem:[%s8282_s18 + $0xd4] sm:$0x1] }
 0x136   : > { %7741 = vmatmul.mubr.bf16.gmra.mrb[16].mxu0 %v6931_v47  ;;  %v2950_v47 = vrot.slane %v2948_v7, 5  ;;  %v6566_v24 = vcombine.low %v2927_v9, %v2937_v19  ;;  %v2963_v35 = vshrl.u32 %v6532_v17, 16  ;;  %v2966_v39 = vshll.u32 %v6532_v17, 16  ;;  %v6537_v16 = vld [vmem:[%s8282_s18 + $0xc8] sm:$0x1] }
 0x137   : > { %7744 = vmatprep.mubr.bf16.mxu0 %v6932_v22  ;;  %v6903_v22 = vrot.slane %v6881_v2, 9  ;;  %v2946_v40 = vrot.slane %v2945_v25, 4  ;;  %v5450_v37 = vrot.slane %v5448_v28, 4  ;;  %v2972_v46 = vshll.u32 %v6533_v23, 16 }
 0x138   : > { %7553 = vmatmul.mubr.bf16.gmra.mrb[20].mxu1 %v6565_v61  ;;  %v2955_v31 = vor.u32 %v2954_v21, %v2950_v47  ;;  %v2965_v43 = vrot.slane %v2963_v35, 4  ;;  %v2968_v58 = vrot.slane %v2966_v39, 5  ;;  %v2976_v18 = vshrl.u32 %v6533_v23, 16 }
 0x139   : > { %7556 = vmatprep.mubr.bf16.mxu1 %v6566_v24  ;;  %v5449_v27 = vsel %vm8405_vm5, %v6903_v22, %v5448_v28  ;;  %v2951_v41 = vsel %vm8305_vm2, %v2946_v40, %v2950_v47  ;;  %v5452_v44 = vsel %vm8405_vm5, %v5450_v37, %v5451_v32  ;;  %v2974_v45 = vrot.slane %v2972_v46, 5 }
 0x13a   : > { %v2956_v42 = vrot.slane %v2955_v31, 4  ;;  %v2982_v48 = vshll.u32 %v6534_v34, 16  ;;  %v6935_v54 = vcombine.low %v5449_v27, %v5452_v44  ;;  %v2969_v60 = vor.u32 %v2968_v58, %v2965_v43 }
 0x13b   : > { %v2978_v55 = vrot.slane %v2976_v18, 4  ;;  %v6904_v61 = vrot.slane %v6884_v52, 9  ;;  %v5455_v56 = vrot.slane %v6885_v12, 5  ;;  %v5458_v0 = vrot.slane %v6886_v50, 5 }
 0x13c   : > { %v2961_v53 = vsel %vm8305_vm2, %v2956_v42, %v2960_v26  ;;  %v2984_v59 = vrot.slane %v2982_v48, 5  ;;  %v2970_v62 = vrot.slane %v2969_v60, 4  ;;  %v2987_v30 = vshrl.u32 %v6535_v51, 16 }
 0x13d   : > { %v6567_v57 = vcombine.low %v2951_v41, %v2961_v53  ;;  %v2979_v63 = vor.u32 %v2978_v55, %v2974_v45  ;;  %v5456_v36 = vsel %vm8405_vm5, %v6904_v61, %v5455_v56  ;;  %v5457_v1 = vrot.slane %v5455_v56, 4 }
 0x13e   : > { %7745 = vmatmul.mubr.bf16.gmra.mrb[20].mxu0 %v6933_v29  ;;  %v6536_v29 = vld [vmem:[%s8282_s18 + $0xc4] sm:$0xf]  ;;  %v2990_v2 = vshll.u32 %v6535_v51, 16  ;;  %v2975_v6 = vsel %vm8305_vm2, %v2970_v62, %v2974_v45  ;;  %v2989_v8 = vrot.slane %v2987_v30, 4  ;;  %v3006_v38 = vshll.u32 %v6537_v16, 16  ;;  %s6980_s18 = sshll.u32 %s9384_s12, 7 }
 0x13f   : > { %7748 = vmatprep.mubr.bf16.mxu0 %v6934_v20  ;;  %v2996_v3 = vshll.u32 %v6536_v29, 16  ;;  %v2980_v7 = vrot.slane %v2979_v63, 4  ;;  %v3000_v9 = vshrl.u32 %v6536_v29, 16  ;;  %v5459_v11 = vsel %vm8405_vm5, %v5457_v1, %v5458_v0  ;;  %s9336_s27 = scalar_lea.vmem %s9373_s2, %s6980_s18 }
 0x140   : > { %7557 = vmatmul.mubr.bf16.gmra.mrb[24].mxu1 %v6567_v57  ;;  %v2992_v13 = vrot.slane %v2990_v2, 5  ;;  %v6936_v15 = vcombine.low %v5456_v36, %v5459_v11  ;;  %v6905_v19 = vrot.slane %v6887_v5, 9  ;;  %v5462_v22 = vrot.slane %v6888_v10, 5 }
 0x141   : > { %v2998_v14 = vrot.slane %v2996_v3, 5  ;;  %v2985_v47 = vsel %vm8305_vm2, %v2980_v7, %v2984_v59  ;;  %v3002_v17 = vrot.slane %v3000_v9, 4  ;;  %v3008_v24 = vrot.slane %v3006_v38, 5 }
 0x142   : > { %v6568_v20 = vcombine.low %v2975_v6, %v2985_v47  ;;  %v2993_v21 = vor.u32 %v2992_v13, %v2989_v8  ;;  %v5465_v25 = vrot.slane %v6889_v49, 5  ;;  %v5463_v28 = vsel %vm8405_vm5, %v6905_v19, %v5462_v22 }
 0x143   : > { %v3003_v23 = vor.u32 %v3002_v17, %v2998_v14  ;;  %v5464_v31 = vrot.slane %v5462_v22, 4 }
 0x144   : > { %7560 = vmatprep.mubr.bf16.mxu1 %v6568_v20  ;;  %v2994_v26 = vrot.slane %v2993_v21, 4 }
 0x145   : > { %v3004_v32 = vrot.slane %v3003_v23, 4  ;;  %v5466_v35 = vsel %vm8405_vm5, %v5464_v31, %v5465_v25 }
 0x146   : > { %7749 = vmatmul.mubr.bf16.gmra.mrb[24].mxu0 %v6935_v54  ;;  %v2999_v34 = vsel %vm8305_vm2, %v2994_v26, %v2998_v14  ;;  %v6937_v40 = vcombine.low %v5463_v28, %v5466_v35 }
 0x147   : > { %7752 = vmatprep.mubr.bf16.mxu0 %v6936_v15  ;;  %v3009_v39 = vsel %vm8305_vm2, %v3004_v32, %v3008_v24 }
 0x148   : > { %v6569_v27 = vcombine.low %v2999_v34, %v3009_v39 }
 0x14a   : > { %7561 = vmatmul.mubr.bf16.gmra.mrb[28].mxu1 %v6569_v27 }
 0x14e   : > { %7753 = vmatmul.mubr.bf16.gmra.mrb[28].mxu0 %v6937_v40 }
 0x1c3   : > { %v7486_v37 = vpop.f32.mrb[0].mxu1 }
 0x1c4   : > { %v2387_v46 = vpop.f32.mrb[1].mxu1 }
 0x1c5   : > { %v7487_v52 = vpop.f32.mrb[2].mxu1 }
 0x1c6   : > { %v2390_v42 = vpop.f32.mrb[3].mxu1 }
 0x1cb   : > { %v7490_v43 = vpop.f32.mrb[4].mxu1 }
 0x1cc   : > { %v2403_v58 = vpop.f32.mrb[5].mxu1 }
 0x1cd   : > { %v7491_v18 = vpop.f32.mrb[6].mxu1 }
 0x1ce   : > { %v2406_v12 = vpop.f32.mrb[7].mxu1 }
 0x1d3   : > { %v7494_v41 = vpop.f32.mrb[8].mxu1 }
 0x1d4   : > { %v2419_v44 = vpop.f32.mrb[9].mxu1 }
 0x1d5   : > { %v7495_v4 = vpop.f32.mrb[10].mxu1 }
 0x1d6   : > { %v2422_v45 = vpop.f32.mrb[11].mxu1 }
 0x1db   : > { %v9324_v48 = vpop.f32.mrb[12].mxu1 }
 0x1dc   : > { %v9326_v33 = vpop.f32.mrb[13].mxu1 }
 0x1dd   : > { %v9328_v50 = vpop.f32.mrb[14].mxu1 }
 0x1de   : > { %v9330_v51 = vpop.f32.mrb[15].mxu1 }
 0x1e9   : > { %v7726_v53 = vpop.f32.mrb[0].mxu0 }
 0x1ea   : > { %v7772_v54 = vadd.f32 %v7726_v53, %v7486_v37  ;;  %v5662_v60 = vpop.f32.mrb[1].mxu0 }
 0x1eb   : > { %v7773_v55 = vadd.f32 %v5662_v60, %v2387_v46  ;;  %v7727_v29 = vpop.f32.mrb[2].mxu0 }
 0x1ec   : > { %v7774_v57 = vadd.f32 %v7727_v29, %v7487_v52  ;;  %v5665_v59 = vpop.f32.mrb[3].mxu0  ;;  %v6084_v30 = vmul.f32 %v7772_v54, %v7772_v54 }
 0x1ed   : > { %v7775_v61 = vadd.f32 %v5665_v59, %v2390_v42  ;;  %v6082_v62 = vmul.f32 %v7773_v55, %v7773_v55 }
 0x1ee   : > { %v7021_v56 = vpack.c.bf16 %v7774_v57, %v7772_v54  ;;  %v6085_v6 = vmul.f32 %v7774_v57, %v7774_v57 }
 0x1ef   : > { %v7016_v63 = vpack.c.bf16 %v7775_v61, %v7773_v55  ;;  %v6045_v0 = vadd.f32 %v7775_v61, %v7773_v55  ;;  %v6083_v16 = vmul.f32 %v7775_v61, %v7775_v61 }
 0x1f0   : > { %7093 = vst [vmem:[%s9336_s27 + $0x8] sm:$0xff] %v7021_v56  }
 0x1f1   : > { %7017 = vst [vmem:[%s9336_s27] sm:$0xff] %v7016_v63   ;;  %v6046_v36 = vadd.f32 %v7772_v54, %v6045_v0  ;;  %v6114_v1 = vadd.f32 %v6083_v16, %v6082_v62  ;;  %v7730_v2 = vpop.f32.mrb[4].mxu0 }
 0x1f2   : > { %v7776_v3 = vadd.f32 %v7730_v2, %v7490_v43  ;;  %v5678_v5 = vpop.f32.mrb[5].mxu0 }
 0x1f3   : > { %v6115_v7 = vadd.f32 %v6114_v1, %v6084_v30  ;;  %v7777_v8 = vadd.f32 %v5678_v5, %v2403_v58  ;;  %v6047_v9 = vadd.f32 %v7774_v57, %v6046_v36  ;;  %v7731_v10 = vpop.f32.mrb[6].mxu0 }
 0x1f4   : > { %v7778_v11 = vadd.f32 %v7731_v10, %v7491_v18  ;;  %v5681_v13 = vpop.f32.mrb[7].mxu0  ;;  %v6088_v22 = vmul.f32 %v7776_v3, %v7776_v3 }
 0x1f5   : > { %v6048_v14 = vadd.f32 %v7777_v8, %v6047_v9  ;;  %v6086_v38 = vmul.f32 %v7777_v8, %v7777_v8  ;;  %v6116_v49 = vadd.f32 %v6115_v7, %v6085_v6  ;;  %v7779_v47 = vadd.f32 %v5681_v13, %v2406_v12 }
 0x1f6   : > { %v7031_v15 = vpack.c.bf16 %v7778_v11, %v7776_v3  ;;  %v6089_v31 = vmul.f32 %v7778_v11, %v7778_v11 }
 0x1f7   : > { %v6117_v17 = vadd.f32 %v6116_v49, %v6086_v38  ;;  %v7026_v19 = vpack.c.bf16 %v7779_v47, %v7777_v8  ;;  %v6049_v20 = vadd.f32 %v7779_v47, %v6048_v14  ;;  %v6087_v21 = vmul.f32 %v7779_v47, %v7779_v47 }
 0x1f8   : > { %7095 = vst [vmem:[%s9336_s27 + $0x18] sm:$0xff] %v7031_v15  }
 0x1f9   : > { %7094 = vst [vmem:[%s9336_s27 + $0x10] sm:$0xff] %v7026_v19   ;;  %v6050_v23 = vadd.f32 %v7776_v3, %v6049_v20  ;;  %v6118_v24 = vadd.f32 %v6117_v17, %v6087_v21  ;;  %v7734_v25 = vpop.f32.mrb[8].mxu0 }
 0x1fa   : > { %v7780_v26 = vadd.f32 %v7734_v25, %v7494_v41  ;;  %v5694_v28 = vpop.f32.mrb[9].mxu0 }
 0x1fb   : > { %v6119_v32 = vadd.f32 %v6118_v24, %v6088_v22  ;;  %v7781_v34 = vadd.f32 %v5694_v28, %v2419_v44  ;;  %v6051_v35 = vadd.f32 %v7778_v11, %v6050_v23  ;;  %v7735_v39 = vpop.f32.mrb[10].mxu0 }
 0x1fc   : > { %v7782_v40 = vadd.f32 %v7735_v39, %v7495_v4  ;;  %v5697_v27 = vpop.f32.mrb[11].mxu0  ;;  %v6092_v60 = vmul.f32 %v7780_v26, %v7780_v26 }
 0x1fd   : > { %v6052_v37 = vadd.f32 %v7781_v34, %v6051_v35  ;;  %v6090_v46 = vmul.f32 %v7781_v34, %v7781_v34  ;;  %v6120_v52 = vadd.f32 %v6119_v32, %v6089_v31  ;;  %v7783_v42 = vadd.f32 %v5697_v27, %v2422_v45 }
 0x1fe   : > { %v7041_v43 = vpack.c.bf16 %v7782_v40, %v7780_v26  ;;  %v6093_v56 = vmul.f32 %v7782_v40, %v7782_v40 }
 0x1ff   : > { %v6121_v58 = vadd.f32 %v6120_v52, %v6090_v46  ;;  %v7036_v18 = vpack.c.bf16 %v7783_v42, %v7781_v34  ;;  %v6053_v12 = vadd.f32 %v7783_v42, %v6052_v37  ;;  %v6091_v53 = vmul.f32 %v7783_v42, %v7783_v42 }
 0x200   : > { %7097 = vst [vmem:[%s9336_s27 + $0x28] sm:$0xff] %v7041_v43  }
 0x201   : > { %7096 = vst [vmem:[%s9336_s27 + $0x20] sm:$0xff] %v7036_v18   ;;  %v6054_v44 = vadd.f32 %v7780_v26, %v6053_v12  ;;  %v6122_v55 = vadd.f32 %v6121_v58, %v6091_v53  ;;  %v7738_v29 = vpop.f32.mrb[12].mxu0 }
 0x202   : > { %v7784_v4 = vadd.f32 %v7738_v29, %v9324_v48  ;;  %v5710_v59 = vpop.f32.mrb[13].mxu0 }
 0x203   : > { %v7550_v41 = vpop.f32.mrb[16].mxu1  ;;  %v6123_v45 = vadd.f32 %v6122_v55, %v6092_v60  ;;  %v7785_v62 = vadd.f32 %v5710_v59, %v9326_v33  ;;  %v6055_v63 = vadd.f32 %v7782_v40, %v6054_v44  ;;  %v7739_v0 = vpop.f32.mrb[14].mxu0 }
 0x204   : > { %v3269_v54 = vpop.f32.mrb[17].mxu1  ;;  %v7786_v16 = vadd.f32 %v7739_v0, %v9328_v50  ;;  %v5713_v30 = vpop.f32.mrb[15].mxu0  ;;  %v6096_v9 = vmul.f32 %v7784_v4, %v7784_v4 }
 0x205   : > { %v7551_v57 = vpop.f32.mrb[18].mxu1  ;;  %v6056_v36 = vadd.f32 %v7785_v62, %v6055_v63  ;;  %v6094_v1 = vmul.f32 %v7785_v62, %v7785_v62  ;;  %v6124_v2 = vadd.f32 %v6123_v45, %v6093_v56  ;;  %v7787_v3 = vadd.f32 %v5713_v30, %v9330_v51 }
 0x206   : > { %v3272_v61 = vpop.f32.mrb[19].mxu1  ;;  %v7051_v5 = vpack.c.bf16 %v7786_v16, %v7784_v4  ;;  %v6097_v49 = vmul.f32 %v7786_v16, %v7786_v16 }
 0x207   : > { %v6125_v48 = vadd.f32 %v6124_v2, %v6094_v1  ;;  %v7046_v6 = vpack.c.bf16 %v7787_v3, %v7785_v62  ;;  %v6057_v7 = vadd.f32 %v7787_v3, %v6056_v36  ;;  %v6095_v8 = vmul.f32 %v7787_v3, %v7787_v3 }
 0x208   : > { %7099 = vst [vmem:[%s9336_s27 + $0x38] sm:$0xff] %v7051_v5  }
 0x209   : > { %7098 = vst [vmem:[%s9336_s27 + $0x30] sm:$0xff] %v7046_v6   ;;  %v6058_v33 = vadd.f32 %v7784_v4, %v6057_v7  ;;  %v6126_v10 = vadd.f32 %v6125_v48, %v6095_v8  ;;  %v7742_v11 = vpop.f32.mrb[16].mxu0 }
 0x20a   : > { %v7788_v14 = vadd.f32 %v7742_v11, %v7550_v41  ;;  %v5726_v50 = vpop.f32.mrb[17].mxu0 }
 0x20b   : > { %v7554_v13 = vpop.f32.mrb[20].mxu1  ;;  %v6127_v47 = vadd.f32 %v6126_v10, %v6096_v9  ;;  %v7789_v15 = vadd.f32 %v5726_v50, %v3269_v54  ;;  %v6059_v51 = vadd.f32 %v7786_v16, %v6058_v33  ;;  %v7743_v17 = vpop.f32.mrb[18].mxu0 }
 0x20c   : > { %v3285_v38 = vpop.f32.mrb[21].mxu1  ;;  %v7790_v20 = vadd.f32 %v7743_v17, %v7551_v57  ;;  %v5729_v21 = vpop.f32.mrb[19].mxu0  ;;  %v6100_v39 = vmul.f32 %v7788_v14, %v7788_v14 }
 0x20d   : > { %v7555_v19 = vpop.f32.mrb[22].mxu1  ;;  %v6060_v23 = vadd.f32 %v7789_v15, %v6059_v51  ;;  %v6098_v24 = vmul.f32 %v7789_v15, %v7789_v15  ;;  %v6128_v25 = vadd.f32 %v6127_v47, %v6097_v49  ;;  %v7791_v26 = vadd.f32 %v5729_v21, %v3272_v61 }
 0x20e   : > { %v3288_v22 = vpop.f32.mrb[23].mxu1  ;;  %v7061_v28 = vpack.c.bf16 %v7790_v20, %v7788_v14  ;;  %v6101_v42 = vmul.f32 %v7790_v20, %v7790_v20 }
 0x20f   : > { %v6129_v31 = vadd.f32 %v6128_v25, %v6098_v24  ;;  %v7056_v32 = vpack.c.bf16 %v7791_v26, %v7789_v15  ;;  %v6061_v34 = vadd.f32 %v7791_v26, %v6060_v23  ;;  %v6099_v35 = vmul.f32 %v7791_v26, %v7791_v26 }
 0x210   : > { %7101 = vst [vmem:[%s9336_s27 + $0x48] sm:$0xff] %v7061_v28  }
 0x211   : > { %7100 = vst [vmem:[%s9336_s27 + $0x40] sm:$0xff] %v7056_v32   ;;  %v6062_v40 = vadd.f32 %v7788_v14, %v6061_v34  ;;  %v6130_v27 = vadd.f32 %v6129_v31, %v6099_v35  ;;  %v7746_v37 = vpop.f32.mrb[20].mxu0 }
 0x212   : > { %v7792_v46 = vadd.f32 %v7746_v37, %v7554_v13  ;;  %v5742_v52 = vpop.f32.mrb[21].mxu0 }
 0x213   : > { %v6131_v43 = vadd.f32 %v6130_v27, %v6100_v39  ;;  %v7793_v58 = vadd.f32 %v5742_v52, %v3285_v38  ;;  %v6063_v18 = vadd.f32 %v7790_v20, %v6062_v40  ;;  %v7747_v12 = vpop.f32.mrb[22].mxu0  ;;  %v7558_v29 = vpop.f32.mrb[24].mxu1 }
 0x214   : > { %v7794_v53 = vadd.f32 %v7747_v12, %v7555_v19  ;;  %v5745_v41 = vpop.f32.mrb[23].mxu0  ;;  %v3301_v4 = vpop.f32.mrb[25].mxu1  ;;  %v6104_v0 = vmul.f32 %v7792_v46, %v7792_v46 }
 0x215   : > { %v6064_v54 = vadd.f32 %v7793_v58, %v6063_v18  ;;  %v6102_v60 = vmul.f32 %v7793_v58, %v7793_v58  ;;  %v6132_v44 = vadd.f32 %v6131_v43, %v6101_v42  ;;  %v7795_v55 = vadd.f32 %v5745_v41, %v3288_v22  ;;  %v7559_v62 = vpop.f32.mrb[26].mxu1 }
 0x216   : > { %v7071_v57 = vpack.c.bf16 %v7794_v53, %v7792_v46  ;;  %v3304_v63 = vpop.f32.mrb[27].mxu1  ;;  %v6105_v3 = vmul.f32 %v7794_v53, %v7794_v53 }
 0x217   : > { %v6133_v59 = vadd.f32 %v6132_v44, %v6102_v60  ;;  %v7066_v61 = vpack.c.bf16 %v7795_v55, %v7793_v58  ;;  %v6065_v56 = vadd.f32 %v7795_v55, %v6064_v54  ;;  %v6103_v45 = vmul.f32 %v7795_v55, %v7795_v55 }
 0x218   : > { %7103 = vst [vmem:[%s9336_s27 + $0x58] sm:$0xff] %v7071_v57  }
 0x219   : > { %7102 = vst [vmem:[%s9336_s27 + $0x50] sm:$0xff] %v7066_v61   ;;  %v6066_v16 = vadd.f32 %v7792_v46, %v6065_v56  ;;  %v6134_v30 = vadd.f32 %v6133_v59, %v6103_v45  ;;  %v7750_v36 = vpop.f32.mrb[24].mxu0 }
 0x21a   : > { %v7796_v1 = vadd.f32 %v7750_v36, %v7558_v29  ;;  %v5758_v2 = vpop.f32.mrb[25].mxu0 }
 0x21b   : > { %v6135_v5 = vadd.f32 %v6134_v30, %v6104_v0  ;;  %v7797_v48 = vadd.f32 %v5758_v2, %v3301_v4  ;;  %v6067_v6 = vadd.f32 %v7794_v53, %v6066_v16  ;;  %v7751_v7 = vpop.f32.mrb[26].mxu0 }
 0x21c   : > { %v7798_v8 = vadd.f32 %v7751_v7, %v7559_v62  ;;  %v5761_v9 = vpop.f32.mrb[27].mxu0  ;;  %v6108_v15 = vmul.f32 %v7796_v1, %v7796_v1 }
 0x21d   : > { %v6068_v33 = vadd.f32 %v7797_v48, %v6067_v6  ;;  %v6106_v10 = vmul.f32 %v7797_v48, %v7797_v48  ;;  %v6136_v11 = vadd.f32 %v6135_v5, %v6105_v3  ;;  %v7799_v13 = vadd.f32 %v5761_v9, %v3304_v63  ;;  %v7562_v19 = vpop.f32.mrb[28].mxu1 }
 0x21e   : > { %v7081_v14 = vpack.c.bf16 %v7798_v8, %v7796_v1  ;;  %v3317_v22 = vpop.f32.mrb[29].mxu1  ;;  %v6109_v24 = vmul.f32 %v7798_v8, %v7798_v8 }
 0x21f   : > { %v6137_v50 = vadd.f32 %v6136_v11, %v6106_v10  ;;  %v7076_v38 = vpack.c.bf16 %v7799_v13, %v7797_v48  ;;  %v6069_v49 = vadd.f32 %v7799_v13, %v6068_v33  ;;  %v6107_v47 = vmul.f32 %v7799_v13, %v7799_v13  ;;  %v7563_v31 = vpop.f32.mrb[30].mxu1 }
 0x220   : > { %7105 = vst [vmem:[%s9336_s27 + $0x68] sm:$0xff] %v7081_v14   ;;  %v3320_v35 = vpop.f32.mrb[31].mxu1 }
 0x221   : > { %7104 = vst [vmem:[%s9336_s27 + $0x60] sm:$0xff] %v7076_v38   ;;  %v6070_v51 = vadd.f32 %v7796_v1, %v6069_v49  ;;  %v6138_v17 = vadd.f32 %v6137_v50, %v6107_v47  ;;  %v7754_v20 = vpop.f32.mrb[28].mxu0 }
 0x222   : > { %v7800_v21 = vadd.f32 %v7754_v20, %v7562_v19  ;;  %v5774_v23 = vpop.f32.mrb[29].mxu0 }
 0x223   : > { %v6139_v25 = vadd.f32 %v6138_v17, %v6108_v15  ;;  %v7801_v26 = vadd.f32 %v5774_v23, %v3317_v22  ;;  %v6071_v28 = vadd.f32 %v7798_v8, %v6070_v51  ;;  %v7755_v32 = vpop.f32.mrb[30].mxu0 }
 0x224   : > { %v7802_v34 = vadd.f32 %v7755_v32, %v7563_v31  ;;  %v5777_v39 = vpop.f32.mrb[31].mxu0  ;;  %v6112_v12 = vmul.f32 %v7800_v21, %v7800_v21 }
 0x225   : > { %v6072_v40 = vadd.f32 %v7801_v26, %v6071_v28  ;;  %v6110_v27 = vmul.f32 %v7801_v26, %v7801_v26  ;;  %v6140_v37 = vadd.f32 %v6139_v25, %v6109_v24  ;;  %v7803_v46 = vadd.f32 %v5777_v39, %v3320_v35 }
 0x226   : > { %v7091_v52 = vpack.c.bf16 %v7802_v34, %v7800_v21  ;;  %v6113_v54 = vmul.f32 %v7802_v34, %v7802_v34 }
 0x227   : > { %v6141_v42 = vadd.f32 %v6140_v37, %v6110_v27  ;;  %v7086_v43 = vpack.c.bf16 %v7803_v46, %v7801_v26  ;;  %v6073_v58 = vadd.f32 %v7803_v46, %v6072_v40  ;;  %v6111_v18 = vmul.f32 %v7803_v46, %v7803_v46 }
 0x228   : > { %7107 = vst [vmem:[%s9336_s27 + $0x78] sm:$0xff] %v7091_v52  }
 0x229   : > { %7106 = vst [vmem:[%s9336_s27 + $0x70] sm:$0xff] %v7086_v43   ;;  %v6074_v53 = vadd.f32 %v7800_v21, %v6073_v58  ;;  %v6142_v41 = vadd.f32 %v6141_v42, %v6111_v18 }
 0x22b   : > { %v6075_v60 = vadd.f32 %v7802_v34, %v6074_v53  ;;  %v6143_v44 = vadd.f32 %v6142_v41, %v6112_v12 }
 0x22d   : > { %v6076_v55 = vrot.slane %v6075_v60, 4  ;;  %v6144_v29 = vadd.f32 %v6143_v44, %v6113_v54 }
 0x22f   : > { %v6077_v57 = vadd.f32 %v6076_v55, %v6075_v60  ;;  %v6145_v4 = vrot.slane %v6144_v29, 4 }
 0x231   : > { %v6078_v59 = vrot.slane %v6077_v57, 2  ;;  %v6146_v61 = vadd.f32 %v6145_v4, %v6144_v29 }
 0x233   : > { %v6079_v56 = vadd.f32 %v6078_v59, %v6077_v57  ;;  %v6147_v45 = vrot.slane %v6146_v61, 2 }
 0x235   : > { %v6080_v62 = vrot.slane %v6079_v56, 1  ;;  %v6148_v63 = vadd.f32 %v6147_v45, %v6146_v61 }
 0x237   : > { %v6149_v0 = vrot.slane %v6148_v63, 1  ;;  %v6081_v16 = vadd.f32 %v6080_v62, %v6079_v56 }
 0x239   : > { %v6150_v30 = vadd.f32 %v6149_v0, %v6148_v63 }
 0x23b   : > { %v6152_v36 = vsel %vm6151_vm6, %v6081_v16, %v6150_v30 }
 0x23c   : > { %6153 = vst [vmem:[%s226_s4] sm:$0x3] %v6152_v36 }
 0x23d PF: > { %s14_s14 = sadd.s32 1, %s8203_s14   ;;  %s9379_s12 = smov %s8199_s13 }
 0x23e   : > { %p11_p5 = scmp.ge.s32.totalorder %s14_s14, 4   ;;  %s9380_s13 = smov %s9382_s15 }
 0x240   :  { %13 = sbr.rel (!%p11_p5) target bundleno = 2 (0x2), region = 83 }

</bundles_post_ra>
